<compile_context>
chip_gen: v7x
topology: tpu7x:2x2x1
jax: 0.10.0
libtpu: 0.0.40
codegen_flags: <defaults>
</compile_context>

<pallas_src>
import numpy as np
import jax
import jax.numpy as jnp
from jax import lax
from jax.experimental import pallas as pl
from jax.experimental.pallas import tpu as pltpu

# ----- small, module-consistent sizes --------------------------------------
B = 2            # batch
IN_DIM = 8       # in_dim
OUT_DIM = 16     # out_dim  (in_dim != out_dim -> residual path is a 1x1 conv)
TIME_DIM = 32    # time_dim
H = 16
W = 16
N_GROUPS = 8     # GroupNorm groups
HW = H * W
NTOT = B * HW    # flattened batch*spatial lane axis (512)
EPS = 1e-5       # torch GroupNorm default eps

TAPS = [(dy, dx) for dy in range(3) for dx in range(3)]   # (ky, kx) order


# ----- in-kernel math helpers ----------------------------------------------
def _erf(x):
    # Abramowitz & Stegun 7.1.26 polynomial (|abs err| <= 1.5e-7): effectively
    # exact erf at float32 precision.  The divide uses the EUP approximate
    # reciprocal plus one Newton step (keeps VALU pressure low, ~1e-6 rel err).
    p = 0.3275911
    a1, a2, a3, a4, a5 = (0.254829592, -0.284496736, 1.421413741,
                          -1.453152027, 1.061405429)
    sign = jnp.where(x >= 0.0, 1.0, -1.0)
    ax = jnp.abs(x)
    d = 1.0 + p * ax
    r = pl.reciprocal(d, approx=True)
    r = r * (2.0 - d * r)                       # one Newton-Raphson refinement
    poly = ((((a5 * r + a4) * r + a3) * r + a2) * r + a1) * r
    return sign * (1.0 - poly * jnp.exp(-ax * ax))


def _gelu(x):
    # exact (erf-based) GELU == torch.nn.GELU(approximate='none')
    return 0.5 * x * (1.0 + _erf(x * 0.7071067811865476))


# ----- the Pallas kernel (whole batch in one invocation) ---------------------
def conv_res_block_kernel(
    x_ref,        # (IN_DIM, NTOT)      input activations, channel-major
    t_ref,        # (TIME_DIM, B)       time embedding input
    masks_ref,    # (9 + B, NTOT)       rows 0..8 tap masks, rows 9.. sample ind.
    vecs_ref,     # (OUT_DIM, 8)        packed per-channel parameter vectors
    w1_ref,       # (OUT_DIM, 9*IN_DIM) fused conv1 weights
    w2_ref,       # (OUT_DIM, 9*OUT_DIM + IN_DIM) fused conv2 + residual weights
    tw_ref,       # (OUT_DIM, TIME_DIM) time linear weight
    pool2_ref,    # (OUT_DIM, OUT_DIM)  group-pooling matrix for norm2
    out_ref,      # (OUT_DIM, NTOT)
    tap_ref,      # scratch (9*OUT_DIM + IN_DIM, NTOT)
):
    x = x_ref[...]                                          # (Cin, NTOT)
    inds = [masks_ref[9 + b:10 + b, :] for b in range(B)]   # per-sample 0/1 rows

    # packed per-channel parameter columns
    gn1_w = vecs_ref[0:IN_DIM, 0:1]
    gn1_b = vecs_ref[0:IN_DIM, 1:2]
    b1 = vecs_ref[:, 2:3]
    tb = vecs_ref[:, 3:4]
    gn2_w = vecs_ref[:, 4:5]
    gn2_b = vecs_ref[:, 5:6]
    b2r = vecs_ref[:, 6:7]                                  # conv2_b + res_b

    def blend(cols):
        # cols: list of B arrays of shape (C, 1) -> per-sample broadcast (C, NTOT)
        acc = cols[0] * inds[0]
        for c, ind in zip(cols[1:], inds[1:]):
            acc = acc + c * ind
        return acc

    def group_norm(v, gamma, beta, pool):
        # v: (C, NTOT); per-sample statistics via aligned static lane slices.
        means, invs = [], []
        for b in range(B):
            vb = v[:, b * HW:(b + 1) * HW]                  # (C, HW), 128-aligned
            s = jnp.sum(vb, axis=1, keepdims=True)          # (C, 1) lane reduce
            s2 = jnp.sum(vb * vb, axis=1, keepdims=True)
            if pool is None:                                # channels_per_group == 1
                mean = s * (1.0 / HW)
                ex2 = s2 * (1.0 / HW)
            else:                                           # group pooling (cpg > 1)
                mean = jnp.dot(pool, s, preferred_element_type=jnp.float32)
                ex2 = jnp.dot(pool, s2, preferred_element_type=jnp.float32)
            means.append(mean)
            invs.append(lax.rsqrt(ex2 - mean * mean + EPS)) # biased var (torch)
        mean = blend(means)
        inv = blend(invs)
        return (v - mean) * inv * gamma + beta

    def build_taps(g, c):
        # Roll + mask each 3x3 tap of g (C, NTOT) straight into the scratch slab.
        # Rolling the full B*HW lane axis is correct: every position where a
        # roll wraps across a sample (or array) boundary is an out-of-bounds
        # tap and is zeroed by the precomputed mask.
        for k, (dy, dx) in enumerate(TAPS):
            off = (dy - 1) * W + (dx - 1)
            rolled = g if off == 0 else pltpu.roll(g, (-off) % NTOT, axis=1)
            tap_ref[k * c:(k + 1) * c, :] = rolled * masks_ref[k:k + 1, :]

    # --- norm1 -> GELU -> conv1 (bias + per-sample time embedding fused in) ---
    g1 = _gelu(group_norm(x, gn1_w, gn1_b, None))
    build_taps(g1, IN_DIM)                                  # scratch rows [0, 72)
    te = jnp.dot(tw_ref[...], _gelu(t_ref[...]),
                 preferred_element_type=jnp.float32) + tb   # (Cout, B)
    te_b = blend([te[:, b:b + 1] for b in range(B)])        # (Cout, NTOT)
    h = jnp.dot(w1_ref[...], tap_ref[0:9 * IN_DIM, :],
                preferred_element_type=jnp.float32) + (b1 + te_b)

    # --- norm2 -> GELU -> dropout(identity) -> conv2, residual 1x1 fused ---
    g2 = _gelu(group_norm(h, gn2_w, gn2_b, pool2_ref[...]))
    build_taps(g2, OUT_DIM)                                 # scratch rows [0, 144)
    tap_ref[9 * OUT_DIM:9 * OUT_DIM + IN_DIM, :] = x        # residual K-rows [144,152)
    out_ref[...] = jnp.dot(w2_ref[...], tap_ref[...],
                           preferred_element_type=jnp.float32) + b2r


# ----- host-side constants ----------------------------------------------------
def _host_masks():
    m = np.zeros((9 + B, NTOT), np.float32)
    p = np.arange(HW)
    r, c = p // W, p % W
    for k, (dy, dx) in enumerate(TAPS):
        rr, cc = r + dy - 1, c + dx - 1
        ok = ((rr >= 0) & (rr < H) & (cc >= 0) & (cc < W)).astype(np.float32)
        m[k] = np.tile(ok, B)
    for b in range(B):
        m[9 + b, b * HW:(b + 1) * HW] = 1.0                 # sample indicator rows
    return m


# ----- wrapper: parameter re-layout + pallas_call ----------------------------
def conv_res_block(x_nchw, t, tp):
    """tp: torch-layout parameter dict (OIHW conv weights, [out,in] linear)."""
    # Channel-major, flattened batch*spatial layout (lane axis = B*HW).
    x_cm = jnp.transpose(x_nchw.reshape(B, IN_DIM, HW).astype(jnp.float32),
                         (1, 0, 2)).reshape(IN_DIM, NTOT)
    t_cm = jnp.transpose(t.astype(jnp.float32), (1, 0))     # (TIME_DIM, B)

    # Fused 3x3 conv weights: OIHW -> (O, KH, KW, I) -> (O, 9*I); stacked tap
    # row order in-kernel is (ky*3 + kx)*C + ci, matching this reshape.
    w1f = jnp.transpose(tp["conv1_w"], (0, 2, 3, 1)).reshape(OUT_DIM, 9 * IN_DIM)
    w2f = jnp.transpose(tp["conv2_w"], (0, 2, 3, 1)).reshape(OUT_DIM, 9 * OUT_DIM)
    resw = tp["res_w"][:, :, 0, 0]                          # (Cout, Cin)
    w2aug = jnp.concatenate([w2f, resw], axis=1)            # (Cout, 9*Cout + Cin)

    # Group-pooling matrix for norm2 (channels_per_group = 2 here).
    cpg2 = OUT_DIM // N_GROUPS
    pool2 = np.kron(np.eye(N_GROUPS, dtype=np.float32),
                    np.ones((cpg2, cpg2), dtype=np.float32)) / float(cpg2 * HW)
    pool2 = jnp.asarray(pool2)

    masks = jnp.asarray(_host_masks())                      # (9 + B, NTOT)

    # Pack the per-channel parameter vectors into one (OUT_DIM, 8) slab.
    pad = lambda v: jnp.pad(v.astype(jnp.float32), (0, OUT_DIM - v.shape[0]))
    vecs = jnp.stack(
        [pad(tp["gn1_w"]), pad(tp["gn1_b"]),
         tp["conv1_b"].astype(jnp.float32), tp["time_b"].astype(jnp.float32),
         tp["gn2_w"].astype(jnp.float32), tp["gn2_b"].astype(jnp.float32),
         (tp["conv2_b"] + tp["res_b"]).astype(jnp.float32),
         jnp.zeros((OUT_DIM,), jnp.float32)], axis=1)       # (OUT_DIM, 8)

    args = (x_cm, t_cm, masks, vecs, w1f, w2aug,
            tp["time_w"].astype(jnp.float32), pool2)

    def spec(shape):
        n = len(shape)
        return pl.BlockSpec(shape, lambda i, _n=n: (0,) * _n)

    flops = 2 * OUT_DIM * NTOT * (9 * IN_DIM + 9 * OUT_DIM + IN_DIM) \
        + 2 * OUT_DIM * TIME_DIM * B
    transcendentals = (IN_DIM + OUT_DIM) * NTOT + TIME_DIM * B
    bytes_accessed = 4 * (sum(int(np.prod(a.shape)) for a in args)
                          + OUT_DIM * NTOT)

    out_cm = pl.pallas_call(
        conv_res_block_kernel,
        out_shape=jax.ShapeDtypeStruct((OUT_DIM, NTOT), jnp.float32),
        grid=(1,),
        in_specs=[spec(a.shape) for a in args],
        out_specs=spec((OUT_DIM, NTOT)),
        scratch_shapes=[pltpu.VMEM((9 * OUT_DIM + IN_DIM, NTOT), jnp.float32)],
        cost_estimate=pl.CostEstimate(flops=flops,
                                      transcendentals=transcendentals,
                                      bytes_accessed=bytes_accessed),
    )(*args)

    return jnp.transpose(out_cm.reshape(OUT_DIM, B, HW),
                         (1, 0, 2)).reshape(B, OUT_DIM, H, W)


# ----- pure-JAX reference (mirrors the PyTorch forward exactly) --------------
def reference(x, t, tp):
    def gn(v, w, b):
        Bb, C, Hh, Ww = v.shape
        vr = v.reshape(Bb, N_GROUPS, C // N_GROUPS, Hh, Ww)
        mean = vr.mean(axis=(2, 3, 4), keepdims=True)
        var = vr.var(axis=(2, 3, 4), keepdims=True)
        vn = ((vr - mean) / jnp.sqrt(var + EPS)).reshape(Bb, C, Hh, Ww)
        return vn * w[None, :, None, None] + b[None, :, None, None]

    def gelu(v):
        return jax.nn.gelu(v, approximate=False)

    def conv(v, w, b, pad):
        y = lax.conv_general_dilated(
            v, w, (1, 1), ((pad, pad), (pad, pad)),
            dimension_numbers=("NCHW", "OIHW", "NCHW"),
            precision=lax.Precision.HIGHEST)
        return y + b[None, :, None, None]

    h = conv(gelu(gn(x, tp["gn1_w"], tp["gn1_b"])), tp["conv1_w"], tp["conv1_b"], 1)
    te = gelu(t) @ tp["time_w"].T + tp["time_b"]
    h = h + te[:, :, None, None]
    h = conv(gelu(gn(h, tp["gn2_w"], tp["gn2_b"])), tp["conv2_w"], tp["conv2_b"], 1)
    res = conv(x, tp["res_w"], tp["res_b"], 0)
    return h + res


# ----- main ------------------------------------------------------------------
if __name__ == "__main__":
    jax.config.update("jax_default_matmul_precision", "highest")

    key = jax.random.PRNGKey(0)
    ks = jax.random.split(key, 16)
    n = jax.random.normal

    torch_params = {
        "gn1_w": 1.0 + 0.1 * n(ks[0], (IN_DIM,), jnp.float32),
        "gn1_b": 0.1 * n(ks[1], (IN_DIM,), jnp.float32),
        "conv1_w": 0.10 * n(ks[2], (OUT_DIM, IN_DIM, 3, 3), jnp.float32),
        "conv1_b": 0.10 * n(ks[3], (OUT_DIM,), jnp.float32),
        "gn2_w": 1.0 + 0.1 * n(ks[4], (OUT_DIM,), jnp.float32),
        "gn2_b": 0.1 * n(ks[5], (OUT_DIM,), jnp.float32),
        "conv2_w": 0.08 * n(ks[6], (OUT_DIM, OUT_DIM, 3, 3), jnp.float32),
        "conv2_b": 0.10 * n(ks[7], (OUT_DIM,), jnp.float32),
        "res_w": 0.30 * n(ks[8], (OUT_DIM, IN_DIM, 1, 1), jnp.float32),
        "res_b": 0.10 * n(ks[9], (OUT_DIM,), jnp.float32),
        "time_w": 0.15 * n(ks[10], (OUT_DIM, TIME_DIM), jnp.float32),
        "time_b": 0.10 * n(ks[11], (OUT_DIM,), jnp.float32),
    }

    x = n(ks[12], (B, IN_DIM, H, W), jnp.float32)   # [B, in_dim, h, w]
    t = n(ks[13], (B, TIME_DIM), jnp.float32)       # [B, time_dim]

    out = conv_res_block(x, t, torch_params)
    out = jax.block_until_ready(out)

    ref = jax.block_until_ready(reference(x, t, torch_params))
    err = float(jnp.max(jnp.abs(out - ref)))
    assert out.shape == (B, OUT_DIM, H, W), out.shape
    assert err < 1e-4, f"max abs error vs reference: {err}"

    print("KERNEL_OK")
</pallas_src>

<mosaic_0001>
module attributes {stable_mosaic.version = 11 : i64} {
  func.func @conv_res_block_kernel(%arg0: i32, %arg1: memref<8x512xf32, #tpu.memory_space<vmem>>, %arg2: memref<32x2xf32, #tpu.memory_space<vmem>>, %arg3: memref<11x512xf32, #tpu.memory_space<vmem>>, %arg4: memref<16x8xf32, #tpu.memory_space<vmem>>, %arg5: memref<16x72xf32, #tpu.memory_space<vmem>>, %arg6: memref<16x152xf32, #tpu.memory_space<vmem>>, %arg7: memref<16x32xf32, #tpu.memory_space<vmem>>, %arg8: memref<16x16xf32, #tpu.memory_space<vmem>>, %arg9: memref<16x512xf32, #tpu.memory_space<vmem>>, %arg10: memref<152x512xf32, #tpu.memory_space<vmem>>) attributes {dimension_semantics = [#tpu.dimension_semantics<arbitrary>], iteration_bounds = array<i64: 1>, scalar_prefetch = 0 : i64, scratch_operands = 1 : i64, tpu.core_type = #tpu.core_type<tc>, window_params = [{pipeline_mode = #tpu.pipeline_mode<synchronous>, transform_indices = @transform_0, window_bounds = array<i64: 8, 512>}, {pipeline_mode = #tpu.pipeline_mode<synchronous>, transform_indices = @transform_1, window_bounds = array<i64: 32, 2>}, {pipeline_mode = #tpu.pipeline_mode<synchronous>, transform_indices = @transform_2, window_bounds = array<i64: 11, 512>}, {pipeline_mode = #tpu.pipeline_mode<synchronous>, transform_indices = @transform_3, window_bounds = array<i64: 16, 8>}, {pipeline_mode = #tpu.pipeline_mode<synchronous>, transform_indices = @transform_4, window_bounds = array<i64: 16, 72>}, {pipeline_mode = #tpu.pipeline_mode<synchronous>, transform_indices = @transform_5, window_bounds = array<i64: 16, 152>}, {pipeline_mode = #tpu.pipeline_mode<synchronous>, transform_indices = @transform_6, window_bounds = array<i64: 16, 32>}, {pipeline_mode = #tpu.pipeline_mode<synchronous>, transform_indices = @transform_7, window_bounds = array<i64: 16, 16>}, {pipeline_mode = #tpu.pipeline_mode<synchronous>, transform_indices = @transform_8, window_bounds = array<i64: 16, 512>}]} {
    %c0 = arith.constant 0 : index
    %c0_0 = arith.constant 0 : index
    %0 = vector.load %arg1[%c0, %c0_0] : memref<8x512xf32, #tpu.memory_space<vmem>>, vector<8x512xf32>
    %c9 = arith.constant 9 : index
    %c0_1 = arith.constant 0 : index
    %1 = vector.load %arg3[%c9, %c0_1] : memref<11x512xf32, #tpu.memory_space<vmem>>, vector<1x512xf32>
    %c10 = arith.constant 10 : index
    %c0_2 = arith.constant 0 : index
    %2 = vector.load %arg3[%c10, %c0_2] : memref<11x512xf32, #tpu.memory_space<vmem>>, vector<1x512xf32>
    %c0_3 = arith.constant 0 : index
    %c0_4 = arith.constant 0 : index
    %3 = vector.load %arg4[%c0_3, %c0_4] : memref<16x8xf32, #tpu.memory_space<vmem>>, vector<8x1xf32>
    %c0_5 = arith.constant 0 : index
    %c1 = arith.constant 1 : index
    %4 = vector.load %arg4[%c0_5, %c1] : memref<16x8xf32, #tpu.memory_space<vmem>>, vector<8x1xf32>
    %c0_6 = arith.constant 0 : index
    %c2 = arith.constant 2 : index
    %5 = vector.load %arg4[%c0_6, %c2] : memref<16x8xf32, #tpu.memory_space<vmem>>, vector<16x1xf32>
    %c0_7 = arith.constant 0 : index
    %c3 = arith.constant 3 : index
    %6 = vector.load %arg4[%c0_7, %c3] : memref<16x8xf32, #tpu.memory_space<vmem>>, vector<16x1xf32>
    %c0_8 = arith.constant 0 : index
    %c4 = arith.constant 4 : index
    %7 = vector.load %arg4[%c0_8, %c4] : memref<16x8xf32, #tpu.memory_space<vmem>>, vector<16x1xf32>
    %c0_9 = arith.constant 0 : index
    %c5 = arith.constant 5 : index
    %8 = vector.load %arg4[%c0_9, %c5] : memref<16x8xf32, #tpu.memory_space<vmem>>, vector<16x1xf32>
    %c0_10 = arith.constant 0 : index
    %c6 = arith.constant 6 : index
    %9 = vector.load %arg4[%c0_10, %c6] : memref<16x8xf32, #tpu.memory_space<vmem>>, vector<16x1xf32>
    %10 = vector.extract_strided_slice %0 {offsets = [0, 0], sizes = [8, 256], strides = [1, 1]} : vector<8x512xf32> to vector<8x256xf32>
    %cst = arith.constant dense<0.000000e+00> : vector<8xf32>
    %11 = vector.multi_reduction <add>, %10, %cst [1] : vector<8x256xf32> to vector<8xf32>
    %12 = vector.shape_cast %11 : vector<8xf32> to vector<8x1xf32>
    %13 = arith.mulf %10, %10 : vector<8x256xf32>
    %cst_11 = arith.constant dense<0.000000e+00> : vector<8xf32>
    %14 = vector.multi_reduction <add>, %13, %cst_11 [1] : vector<8x256xf32> to vector<8xf32>
    %15 = vector.shape_cast %14 : vector<8xf32> to vector<8x1xf32>
    %cst_12 = arith.constant 3.906250e-03 : f32
    %16 = vector.broadcast %cst_12 : f32 to vector<8x1xf32>
    %17 = arith.mulf %12, %16 : vector<8x1xf32>
    %cst_13 = arith.constant 3.906250e-03 : f32
    %18 = vector.broadcast %cst_13 : f32 to vector<8x1xf32>
    %19 = arith.mulf %15, %18 : vector<8x1xf32>
    %20 = arith.mulf %17, %17 : vector<8x1xf32>
    %21 = arith.subf %19, %20 : vector<8x1xf32>
    %cst_14 = arith.constant 9.99999974E-6 : f32
    %22 = vector.broadcast %cst_14 : f32 to vector<8x1xf32>
    %23 = arith.addf %21, %22 : vector<8x1xf32>
    %24 = math.rsqrt %23 : vector<8x1xf32>
    %25 = vector.extract_strided_slice %0 {offsets = [0, 256], sizes = [8, 256], strides = [1, 1]} : vector<8x512xf32> to vector<8x256xf32>
    %cst_15 = arith.constant dense<0.000000e+00> : vector<8xf32>
    %26 = vector.multi_reduction <add>, %25, %cst_15 [1] : vector<8x256xf32> to vector<8xf32>
    %27 = vector.shape_cast %26 : vector<8xf32> to vector<8x1xf32>
    %28 = arith.mulf %25, %25 : vector<8x256xf32>
    %cst_16 = arith.constant dense<0.000000e+00> : vector<8xf32>
    %29 = vector.multi_reduction <add>, %28, %cst_16 [1] : vector<8x256xf32> to vector<8xf32>
    %30 = vector.shape_cast %29 : vector<8xf32> to vector<8x1xf32>
    %cst_17 = arith.constant 3.906250e-03 : f32
    %31 = vector.broadcast %cst_17 : f32 to vector<8x1xf32>
    %32 = arith.mulf %27, %31 : vector<8x1xf32>
    %cst_18 = arith.constant 3.906250e-03 : f32
    %33 = vector.broadcast %cst_18 : f32 to vector<8x1xf32>
    %34 = arith.mulf %30, %33 : vector<8x1xf32>
    %35 = arith.mulf %32, %32 : vector<8x1xf32>
    %36 = arith.subf %34, %35 : vector<8x1xf32>
    %cst_19 = arith.constant 9.99999974E-6 : f32
    %37 = vector.broadcast %cst_19 : f32 to vector<8x1xf32>
    %38 = arith.addf %36, %37 : vector<8x1xf32>
    %39 = math.rsqrt %38 : vector<8x1xf32>
    %40 = vector.broadcast %17 : vector<8x1xf32> to vector<8x512xf32>
    %41 = vector.broadcast %1 : vector<1x512xf32> to vector<8x512xf32>
    %42 = arith.mulf %40, %41 : vector<8x512xf32>
    %43 = vector.broadcast %32 : vector<8x1xf32> to vector<8x512xf32>
    %44 = vector.broadcast %2 : vector<1x512xf32> to vector<8x512xf32>
    %45 = arith.mulf %43, %44 : vector<8x512xf32>
    %46 = arith.addf %42, %45 : vector<8x512xf32>
    %47 = vector.broadcast %24 : vector<8x1xf32> to vector<8x512xf32>
    %48 = vector.broadcast %1 : vector<1x512xf32> to vector<8x512xf32>
    %49 = arith.mulf %47, %48 : vector<8x512xf32>
    %50 = vector.broadcast %39 : vector<8x1xf32> to vector<8x512xf32>
    %51 = vector.broadcast %2 : vector<1x512xf32> to vector<8x512xf32>
    %52 = arith.mulf %50, %51 : vector<8x512xf32>
    %53 = arith.addf %49, %52 : vector<8x512xf32>
    %54 = arith.subf %0, %46 : vector<8x512xf32>
    %55 = arith.mulf %54, %53 : vector<8x512xf32>
    %56 = vector.broadcast %3 : vector<8x1xf32> to vector<8x512xf32>
    %57 = arith.mulf %55, %56 : vector<8x512xf32>
    %58 = vector.broadcast %4 : vector<8x1xf32> to vector<8x512xf32>
    %59 = arith.addf %57, %58 : vector<8x512xf32>
    %cst_20 = arith.constant 5.000000e-01 : f32
    %60 = vector.broadcast %cst_20 : f32 to vector<8x512xf32>
    %61 = arith.mulf %60, %59 : vector<8x512xf32>
    %cst_21 = arith.constant 0.707106769 : f32
    %62 = vector.broadcast %cst_21 : f32 to vector<8x512xf32>
    %63 = arith.mulf %59, %62 : vector<8x512xf32>
    %cst_22 = arith.constant 0.000000e+00 : f32
    %64 = vector.broadcast %cst_22 : f32 to vector<8x512xf32>
    %65 = arith.cmpf oge, %63, %64 : vector<8x512xf32>
    %cst_23 = arith.constant 1.000000e+00 : f32
    %cst_24 = arith.constant -1.000000e+00 : f32
    %66 = vector.broadcast %cst_23 : f32 to vector<8x512xf32>
    %67 = vector.broadcast %cst_24 : f32 to vector<8x512xf32>
    %68 = arith.select %65, %66, %67 : vector<8x512xi1>, vector<8x512xf32>
    %69 = math.absf %63 : vector<8x512xf32>
    %cst_25 = arith.constant 0.327591091 : f32
    %70 = vector.broadcast %cst_25 : f32 to vector<8x512xf32>
    %71 = arith.mulf %70, %69 : vector<8x512xf32>
    %cst_26 = arith.constant 1.000000e+00 : f32
    %72 = vector.broadcast %cst_26 : f32 to vector<8x512xf32>
    %73 = arith.addf %72, %71 : vector<8x512xf32>
    %74 = tpu.reciprocal %73 {approx = true} : vector<8x512xf32> -> vector<8x512xf32>
    %75 = arith.mulf %73, %74 : vector<8x512xf32>
    %cst_27 = arith.constant 2.000000e+00 : f32
    %76 = vector.broadcast %cst_27 : f32 to vector<8x512xf32>
    %77 = arith.subf %76, %75 : vector<8x512xf32>
    %78 = arith.mulf %74, %77 : vector<8x512xf32>
    %cst_28 = arith.constant 1.06140542 : f32
    %79 = vector.broadcast %cst_28 : f32 to vector<8x512xf32>
    %80 = arith.mulf %79, %78 : vector<8x512xf32>
    %cst_29 = arith.constant -1.45315206 : f32
    %81 = vector.broadcast %cst_29 : f32 to vector<8x512xf32>
    %82 = arith.addf %80, %81 : vector<8x512xf32>
    %83 = arith.mulf %82, %78 : vector<8x512xf32>
    %cst_30 = arith.constant 1.42141378 : f32
    %84 = vector.broadcast %cst_30 : f32 to vector<8x512xf32>
    %85 = arith.addf %83, %84 : vector<8x512xf32>
    %86 = arith.mulf %85, %78 : vector<8x512xf32>
    %cst_31 = arith.constant -0.284496725 : f32
    %87 = vector.broadcast %cst_31 : f32 to vector<8x512xf32>
    %88 = arith.addf %86, %87 : vector<8x512xf32>
    %89 = arith.mulf %88, %78 : vector<8x512xf32>
    %cst_32 = arith.constant 0.254829586 : f32
    %90 = vector.broadcast %cst_32 : f32 to vector<8x512xf32>
    %91 = arith.addf %89, %90 : vector<8x512xf32>
    %92 = arith.mulf %91, %78 : vector<8x512xf32>
    %cst_33 = arith.constant 0.000000e+00 : f32
    %93 = vector.broadcast %cst_33 : f32 to vector<8x512xf32>
    %94 = arith.subf %93, %69 : vector<8x512xf32>
    %95 = arith.mulf %94, %69 : vector<8x512xf32>
    %96 = math.exp %95 : vector<8x512xf32>
    %97 = arith.mulf %92, %96 : vector<8x512xf32>
    %cst_34 = arith.constant 1.000000e+00 : f32
    %98 = vector.broadcast %cst_34 : f32 to vector<8x512xf32>
    %99 = arith.subf %98, %97 : vector<8x512xf32>
    %100 = arith.mulf %68, %99 : vector<8x512xf32>
    %cst_35 = arith.constant 1.000000e+00 : f32
    %101 = vector.broadcast %cst_35 : f32 to vector<8x512xf32>
    %102 = arith.addf %101, %100 : vector<8x512xf32>
    %103 = arith.mulf %61, %102 : vector<8x512xf32>
    %c17_i32 = arith.constant 17 : i32
    %104 = tpu.dynamic_rotate %103 by %c17_i32 dim 1 : vector<8x512xf32>, i32 -> vector<8x512xf32>
    %c0_36 = arith.constant 0 : index
    %c0_37 = arith.constant 0 : index
    %105 = vector.load %arg3[%c0_36, %c0_37] : memref<11x512xf32, #tpu.memory_space<vmem>>, vector<1x512xf32>
    %106 = vector.broadcast %105 : vector<1x512xf32> to vector<8x512xf32>
    %107 = arith.mulf %104, %106 : vector<8x512xf32>
    %c0_38 = arith.constant 0 : index
    %c0_39 = arith.constant 0 : index
    %108 = vector.load %arg10[%c0_38, %c0_39] : memref<152x512xf32, #tpu.memory_space<vmem>>, vector<8x512xf32>
    tpu.vector_store %arg10[%c0_38, %c0_39], %107 {strides = array<i32>} : memref<152x512xf32, #tpu.memory_space<vmem>>, vector<8x512xf32>,
    %c16_i32 = arith.constant 16 : i32
    %109 = tpu.dynamic_rotate %103 by %c16_i32 dim 1 : vector<8x512xf32>, i32 -> vector<8x512xf32>
    %c1_40 = arith.constant 1 : index
    %c0_41 = arith.constant 0 : index
    %110 = vector.load %arg3[%c1_40, %c0_41] : memref<11x512xf32, #tpu.memory_space<vmem>>, vector<1x512xf32>
    %111 = vector.broadcast %110 : vector<1x512xf32> to vector<8x512xf32>
    %112 = arith.mulf %109, %111 : vector<8x512xf32>
    %c8 = arith.constant 8 : index
    %c0_42 = arith.constant 0 : index
    %113 = vector.load %arg10[%c8, %c0_42] : memref<152x512xf32, #tpu.memory_space<vmem>>, vector<8x512xf32>
    tpu.vector_store %arg10[%c8, %c0_42], %112 {strides = array<i32>} : memref<152x512xf32, #tpu.memory_space<vmem>>, vector<8x512xf32>,
    %c15_i32 = arith.constant 15 : i32
    %114 = tpu.dynamic_rotate %103 by %c15_i32 dim 1 : vector<8x512xf32>, i32 -> vector<8x512xf32>
    %c2_43 = arith.constant 2 : index
    %c0_44 = arith.constant 0 : index
    %115 = vector.load %arg3[%c2_43, %c0_44] : memref<11x512xf32, #tpu.memory_space<vmem>>, vector<1x512xf32>
    %116 = vector.broadcast %115 : vector<1x512xf32> to vector<8x512xf32>
    %117 = arith.mulf %114, %116 : vector<8x512xf32>
    %c16 = arith.constant 16 : index
    %c0_45 = arith.constant 0 : index
    %118 = vector.load %arg10[%c16, %c0_45] : memref<152x512xf32, #tpu.memory_space<vmem>>, vector<8x512xf32>
    tpu.vector_store %arg10[%c16, %c0_45], %117 {strides = array<i32>} : memref<152x512xf32, #tpu.memory_space<vmem>>, vector<8x512xf32>,
    %c1_i32 = arith.constant 1 : i32
    %119 = tpu.dynamic_rotate %103 by %c1_i32 dim 1 : vector<8x512xf32>, i32 -> vector<8x512xf32>
    %c3_46 = arith.constant 3 : index
    %c0_47 = arith.constant 0 : index
    %120 = vector.load %arg3[%c3_46, %c0_47] : memref<11x512xf32, #tpu.memory_space<vmem>>, vector<1x512xf32>
    %121 = vector.broadcast %120 : vector<1x512xf32> to vector<8x512xf32>
    %122 = arith.mulf %119, %121 : vector<8x512xf32>
    %c24 = arith.constant 24 : index
    %c0_48 = arith.constant 0 : index
    %123 = vector.load %arg10[%c24, %c0_48] : memref<152x512xf32, #tpu.memory_space<vmem>>, vector<8x512xf32>
    tpu.vector_store %arg10[%c24, %c0_48], %122 {strides = array<i32>} : memref<152x512xf32, #tpu.memory_space<vmem>>, vector<8x512xf32>,
    %c4_49 = arith.constant 4 : index
    %c0_50 = arith.constant 0 : index
    %124 = vector.load %arg3[%c4_49, %c0_50] : memref<11x512xf32, #tpu.memory_space<vmem>>, vector<1x512xf32>
    %125 = vector.broadcast %124 : vector<1x512xf32> to vector<8x512xf32>
    %126 = arith.mulf %103, %125 : vector<8x512xf32>
    %c32 = arith.constant 32 : index
    %c0_51 = arith.constant 0 : index
    %127 = vector.load %arg10[%c32, %c0_51] : memref<152x512xf32, #tpu.memory_space<vmem>>, vector<8x512xf32>
    tpu.vector_store %arg10[%c32, %c0_51], %126 {strides = array<i32>} : memref<152x512xf32, #tpu.memory_space<vmem>>, vector<8x512xf32>,
    %c511_i32 = arith.constant 511 : i32
    %128 = tpu.dynamic_rotate %103 by %c511_i32 dim 1 : vector<8x512xf32>, i32 -> vector<8x512xf32>
    %c5_52 = arith.constant 5 : index
    %c0_53 = arith.constant 0 : index
    %129 = vector.load %arg3[%c5_52, %c0_53] : memref<11x512xf32, #tpu.memory_space<vmem>>, vector<1x512xf32>
    %130 = vector.broadcast %129 : vector<1x512xf32> to vector<8x512xf32>
    %131 = arith.mulf %128, %130 : vector<8x512xf32>
    %c40 = arith.constant 40 : index
    %c0_54 = arith.constant 0 : index
    %132 = vector.load %arg10[%c40, %c0_54] : memref<152x512xf32, #tpu.memory_space<vmem>>, vector<8x512xf32>
    tpu.vector_store %arg10[%c40, %c0_54], %131 {strides = array<i32>} : memref<152x512xf32, #tpu.memory_space<vmem>>, vector<8x512xf32>,
    %c497_i32 = arith.constant 497 : i32
    %133 = tpu.dynamic_rotate %103 by %c497_i32 dim 1 : vector<8x512xf32>, i32 -> vector<8x512xf32>
    %c6_55 = arith.constant 6 : index
    %c0_56 = arith.constant 0 : index
    %134 = vector.load %arg3[%c6_55, %c0_56] : memref<11x512xf32, #tpu.memory_space<vmem>>, vector<1x512xf32>
    %135 = vector.broadcast %134 : vector<1x512xf32> to vector<8x512xf32>
    %136 = arith.mulf %133, %135 : vector<8x512xf32>
    %c48 = arith.constant 48 : index
    %c0_57 = arith.constant 0 : index
    %137 = vector.load %arg10[%c48, %c0_57] : memref<152x512xf32, #tpu.memory_space<vmem>>, vector<8x512xf32>
    tpu.vector_store %arg10[%c48, %c0_57], %136 {strides = array<i32>} : memref<152x512xf32, #tpu.memory_space<vmem>>, vector<8x512xf32>,
    %c496_i32 = arith.constant 496 : i32
    %138 = tpu.dynamic_rotate %103 by %c496_i32 dim 1 : vector<8x512xf32>, i32 -> vector<8x512xf32>
    %c7 = arith.constant 7 : index
    %c0_58 = arith.constant 0 : index
    %139 = vector.load %arg3[%c7, %c0_58] : memref<11x512xf32, #tpu.memory_space<vmem>>, vector<1x512xf32>
    %140 = vector.broadcast %139 : vector<1x512xf32> to vector<8x512xf32>
    %141 = arith.mulf %138, %140 : vector<8x512xf32>
    %c56 = arith.constant 56 : index
    %c0_59 = arith.constant 0 : index
    %142 = vector.load %arg10[%c56, %c0_59] : memref<152x512xf32, #tpu.memory_space<vmem>>, vector<8x512xf32>
    tpu.vector_store %arg10[%c56, %c0_59], %141 {strides = array<i32>} : memref<152x512xf32, #tpu.memory_space<vmem>>, vector<8x512xf32>,
    %c495_i32 = arith.constant 495 : i32
    %143 = tpu.dynamic_rotate %103 by %c495_i32 dim 1 : vector<8x512xf32>, i32 -> vector<8x512xf32>
    %c8_60 = arith.constant 8 : index
    %c0_61 = arith.constant 0 : index
    %144 = vector.load %arg3[%c8_60, %c0_61] : memref<11x512xf32, #tpu.memory_space<vmem>>, vector<1x512xf32>
    %145 = vector.broadcast %144 : vector<1x512xf32> to vector<8x512xf32>
    %146 = arith.mulf %143, %145 : vector<8x512xf32>
    %c64 = arith.constant 64 : index
    %c0_62 = arith.constant 0 : index
    %147 = vector.load %arg10[%c64, %c0_62] : memref<152x512xf32, #tpu.memory_space<vmem>>, vector<8x512xf32>
    tpu.vector_store %arg10[%c64, %c0_62], %146 {strides = array<i32>} : memref<152x512xf32, #tpu.memory_space<vmem>>, vector<8x512xf32>,
    %c0_63 = arith.constant 0 : index
    %c0_64 = arith.constant 0 : index
    %148 = vector.load %arg7[%c0_63, %c0_64] : memref<16x32xf32, #tpu.memory_space<vmem>>, vector<16x32xf32>
    %c0_65 = arith.constant 0 : index
    %c0_66 = arith.constant 0 : index
    %149 = vector.load %arg2[%c0_65, %c0_66] : memref<32x2xf32, #tpu.memory_space<vmem>>, vector<32x2xf32>
    %cst_67 = arith.constant 5.000000e-01 : f32
    %150 = vector.broadcast %cst_67 : f32 to vector<32x2xf32>
    %151 = arith.mulf %150, %149 : vector<32x2xf32>
    %cst_68 = arith.constant 0.707106769 : f32
    %152 = vector.broadcast %cst_68 : f32 to vector<32x2xf32>
    %153 = arith.mulf %149, %152 : vector<32x2xf32>
    %cst_69 = arith.constant 0.000000e+00 : f32
    %154 = vector.broadcast %cst_69 : f32 to vector<32x2xf32>
    %155 = arith.cmpf oge, %153, %154 : vector<32x2xf32>
    %cst_70 = arith.constant 1.000000e+00 : f32
    %cst_71 = arith.constant -1.000000e+00 : f32
    %156 = vector.broadcast %cst_70 : f32 to vector<32x2xf32>
    %157 = vector.broadcast %cst_71 : f32 to vector<32x2xf32>
    %158 = arith.select %155, %156, %157 : vector<32x2xi1>, vector<32x2xf32>
    %159 = math.absf %153 : vector<32x2xf32>
    %cst_72 = arith.constant 0.327591091 : f32
    %160 = vector.broadcast %cst_72 : f32 to vector<32x2xf32>
    %161 = arith.mulf %160, %159 : vector<32x2xf32>
    %cst_73 = arith.constant 1.000000e+00 : f32
    %162 = vector.broadcast %cst_73 : f32 to vector<32x2xf32>
    %163 = arith.addf %162, %161 : vector<32x2xf32>
    %164 = tpu.reciprocal %163 {approx = true} : vector<32x2xf32> -> vector<32x2xf32>
    %165 = arith.mulf %163, %164 : vector<32x2xf32>
    %cst_74 = arith.constant 2.000000e+00 : f32
    %166 = vector.broadcast %cst_74 : f32 to vector<32x2xf32>
    %167 = arith.subf %166, %165 : vector<32x2xf32>
    %168 = arith.mulf %164, %167 : vector<32x2xf32>
    %cst_75 = arith.constant 1.06140542 : f32
    %169 = vector.broadcast %cst_75 : f32 to vector<32x2xf32>
    %170 = arith.mulf %169, %168 : vector<32x2xf32>
    %cst_76 = arith.constant -1.45315206 : f32
    %171 = vector.broadcast %cst_76 : f32 to vector<32x2xf32>
    %172 = arith.addf %170, %171 : vector<32x2xf32>
    %173 = arith.mulf %172, %168 : vector<32x2xf32>
    %cst_77 = arith.constant 1.42141378 : f32
    %174 = vector.broadcast %cst_77 : f32 to vector<32x2xf32>
    %175 = arith.addf %173, %174 : vector<32x2xf32>
    %176 = arith.mulf %175, %168 : vector<32x2xf32>
    %cst_78 = arith.constant -0.284496725 : f32
    %177 = vector.broadcast %cst_78 : f32 to vector<32x2xf32>
    %178 = arith.addf %176, %177 : vector<32x2xf32>
    %179 = arith.mulf %178, %168 : vector<32x2xf32>
    %cst_79 = arith.constant 0.254829586 : f32
    %180 = vector.broadcast %cst_79 : f32 to vector<32x2xf32>
    %181 = arith.addf %179, %180 : vector<32x2xf32>
    %182 = arith.mulf %181, %168 : vector<32x2xf32>
    %cst_80 = arith.constant 0.000000e+00 : f32
    %183 = vector.broadcast %cst_80 : f32 to vector<32x2xf32>
    %184 = arith.subf %183, %159 : vector<32x2xf32>
    %185 = arith.mulf %184, %159 : vector<32x2xf32>
    %186 = math.exp %185 : vector<32x2xf32>
    %187 = arith.mulf %182, %186 : vector<32x2xf32>
    %cst_81 = arith.constant 1.000000e+00 : f32
    %188 = vector.broadcast %cst_81 : f32 to vector<32x2xf32>
    %189 = arith.subf %188, %187 : vector<32x2xf32>
    %190 = arith.mulf %158, %189 : vector<32x2xf32>
    %cst_82 = arith.constant 1.000000e+00 : f32
    %191 = vector.broadcast %cst_82 : f32 to vector<32x2xf32>
    %192 = arith.addf %191, %190 : vector<32x2xf32>
    %193 = arith.mulf %151, %192 : vector<32x2xf32>
    %cst_83 = arith.constant dense<0.000000e+00> : vector<16x2xf32>
    %194 = tpu.matmul %148, %193, %cst_83 {dimension_numbers = #tpu.dot_dimension_numbers<[1], [0], [0], [1], [0, 0, 1, 1], [], []>, precision = #tpu.contract_precision<fp32>} : vector<16x32xf32>, vector<32x2xf32>, vector<16x2xf32> -> vector<16x2xf32>
    %195 = vector.broadcast %6 : vector<16x1xf32> to vector<16x2xf32>
    %196 = arith.addf %194, %195 : vector<16x2xf32>
    %197 = vector.extract_strided_slice %196 {offsets = [0, 0], sizes = [16, 1], strides = [1, 1]} : vector<16x2xf32> to vector<16x1xf32>
    %198 = vector.extract_strided_slice %196 {offsets = [0, 1], sizes = [16, 1], strides = [1, 1]} : vector<16x2xf32> to vector<16x1xf32>
    %199 = vector.broadcast %197 : vector<16x1xf32> to vector<16x512xf32>
    %200 = vector.broadcast %1 : vector<1x512xf32> to vector<16x512xf32>
    %201 = arith.mulf %199, %200 : vector<16x512xf32>
    %202 = vector.broadcast %198 : vector<16x1xf32> to vector<16x512xf32>
    %203 = vector.broadcast %2 : vector<1x512xf32> to vector<16x512xf32>
    %204 = arith.mulf %202, %203 : vector<16x512xf32>
    %205 = arith.addf %201, %204 : vector<16x512xf32>
    %c0_84 = arith.constant 0 : index
    %c0_85 = arith.constant 0 : index
    %206 = vector.load %arg5[%c0_84, %c0_85] : memref<16x72xf32, #tpu.memory_space<vmem>>, vector<16x72xf32>
    %c0_86 = arith.constant 0 : index
    %c0_87 = arith.constant 0 : index
    %207 = vector.load %arg10[%c0_86, %c0_87] : memref<152x512xf32, #tpu.memory_space<vmem>>, vector<72x512xf32>
    %cst_88 = arith.constant dense<0.000000e+00> : vector<16x512xf32>
    %208 = tpu.matmul %206, %207, %cst_88 {dimension_numbers = #tpu.dot_dimension_numbers<[1], [0], [0], [1], [0, 0, 1, 1], [], []>, precision = #tpu.contract_precision<fp32>} : vector<16x72xf32>, vector<72x512xf32>, vector<16x512xf32> -> vector<16x512xf32>
    %209 = vector.broadcast %5 : vector<16x1xf32> to vector<16x512xf32>
    %210 = arith.addf %209, %205 : vector<16x512xf32>
    %211 = arith.addf %208, %210 : vector<16x512xf32>
    %c0_89 = arith.constant 0 : index
    %c0_90 = arith.constant 0 : index
    %212 = vector.load %arg8[%c0_89, %c0_90] : memref<16x16xf32, #tpu.memory_space<vmem>>, vector<16x16xf32>
    %213 = vector.extract_strided_slice %211 {offsets = [0, 0], sizes = [16, 256], strides = [1, 1]} : vector<16x512xf32> to vector<16x256xf32>
    %cst_91 = arith.constant dense<0.000000e+00> : vector<16xf32>
    %214 = vector.multi_reduction <add>, %213, %cst_91 [1] : vector<16x256xf32> to vector<16xf32>
    %215 = vector.shape_cast %214 : vector<16xf32> to vector<16x1xf32>
    %216 = arith.mulf %213, %213 : vector<16x256xf32>
    %cst_92 = arith.constant dense<0.000000e+00> : vector<16xf32>
    %217 = vector.multi_reduction <add>, %216, %cst_92 [1] : vector<16x256xf32> to vector<16xf32>
    %218 = vector.shape_cast %217 : vector<16xf32> to vector<16x1xf32>
    %cst_93 = arith.constant dense<0.000000e+00> : vector<16x1xf32>
    %219 = tpu.matmul %212, %215, %cst_93 {dimension_numbers = #tpu.dot_dimension_numbers<[1], [0], [0], [1], [0, 0, 1, 1], [], []>, precision = #tpu.contract_precision<fp32>} : vector<16x16xf32>, vector<16x1xf32>, vector<16x1xf32> -> vector<16x1xf32>
    %cst_94 = arith.constant dense<0.000000e+00> : vector<16x1xf32>
    %220 = tpu.matmul %212, %218, %cst_94 {dimension_numbers = #tpu.dot_dimension_numbers<[1], [0], [0], [1], [0, 0, 1, 1], [], []>, precision = #tpu.contract_precision<fp32>} : vector<16x16xf32>, vector<16x1xf32>, vector<16x1xf32> -> vector<16x1xf32>
    %221 = arith.mulf %219, %219 : vector<16x1xf32>
    %222 = arith.subf %220, %221 : vector<16x1xf32>
    %cst_95 = arith.constant 9.99999974E-6 : f32
    %223 = vector.broadcast %cst_95 : f32 to vector<16x1xf32>
    %224 = arith.addf %222, %223 : vector<16x1xf32>
    %225 = math.rsqrt %224 : vector<16x1xf32>
    %226 = vector.extract_strided_slice %211 {offsets = [0, 256], sizes = [16, 256], strides = [1, 1]} : vector<16x512xf32> to vector<16x256xf32>
    %cst_96 = arith.constant dense<0.000000e+00> : vector<16xf32>
    %227 = vector.multi_reduction <add>, %226, %cst_96 [1] : vector<16x256xf32> to vector<16xf32>
    %228 = vector.shape_cast %227 : vector<16xf32> to vector<16x1xf32>
    %229 = arith.mulf %226, %226 : vector<16x256xf32>
    %cst_97 = arith.constant dense<0.000000e+00> : vector<16xf32>
    %230 = vector.multi_reduction <add>, %229, %cst_97 [1] : vector<16x256xf32> to vector<16xf32>
    %231 = vector.shape_cast %230 : vector<16xf32> to vector<16x1xf32>
    %cst_98 = arith.constant dense<0.000000e+00> : vector<16x1xf32>
    %232 = tpu.matmul %212, %228, %cst_98 {dimension_numbers = #tpu.dot_dimension_numbers<[1], [0], [0], [1], [0, 0, 1, 1], [], []>, precision = #tpu.contract_precision<fp32>} : vector<16x16xf32>, vector<16x1xf32>, vector<16x1xf32> -> vector<16x1xf32>
    %cst_99 = arith.constant dense<0.000000e+00> : vector<16x1xf32>
    %233 = tpu.matmul %212, %231, %cst_99 {dimension_numbers = #tpu.dot_dimension_numbers<[1], [0], [0], [1], [0, 0, 1, 1], [], []>, precision = #tpu.contract_precision<fp32>} : vector<16x16xf32>, vector<16x1xf32>, vector<16x1xf32> -> vector<16x1xf32>
    %234 = arith.mulf %232, %232 : vector<16x1xf32>
    %235 = arith.subf %233, %234 : vector<16x1xf32>
    %cst_100 = arith.constant 9.99999974E-6 : f32
    %236 = vector.broadcast %cst_100 : f32 to vector<16x1xf32>
    %237 = arith.addf %235, %236 : vector<16x1xf32>
    %238 = math.rsqrt %237 : vector<16x1xf32>
    %239 = vector.broadcast %219 : vector<16x1xf32> to vector<16x512xf32>
    %240 = vector.broadcast %1 : vector<1x512xf32> to vector<16x512xf32>
    %241 = arith.mulf %239, %240 : vector<16x512xf32>
    %242 = vector.broadcast %232 : vector<16x1xf32> to vector<16x512xf32>
    %243 = vector.broadcast %2 : vector<1x512xf32> to vector<16x512xf32>
    %244 = arith.mulf %242, %243 : vector<16x512xf32>
    %245 = arith.addf %241, %244 : vector<16x512xf32>
    %246 = vector.broadcast %225 : vector<16x1xf32> to vector<16x512xf32>
    %247 = vector.broadcast %1 : vector<1x512xf32> to vector<16x512xf32>
    %248 = arith.mulf %246, %247 : vector<16x512xf32>
    %249 = vector.broadcast %238 : vector<16x1xf32> to vector<16x512xf32>
    %250 = vector.broadcast %2 : vector<1x512xf32> to vector<16x512xf32>
    %251 = arith.mulf %249, %250 : vector<16x512xf32>
    %252 = arith.addf %248, %251 : vector<16x512xf32>
    %253 = arith.subf %211, %245 : vector<16x512xf32>
    %254 = arith.mulf %253, %252 : vector<16x512xf32>
    %255 = vector.broadcast %7 : vector<16x1xf32> to vector<16x512xf32>
    %256 = arith.mulf %254, %255 : vector<16x512xf32>
    %257 = vector.broadcast %8 : vector<16x1xf32> to vector<16x512xf32>
    %258 = arith.addf %256, %257 : vector<16x512xf32>
    %cst_101 = arith.constant 5.000000e-01 : f32
    %259 = vector.broadcast %cst_101 : f32 to vector<16x512xf32>
    %260 = arith.mulf %259, %258 : vector<16x512xf32>
    %cst_102 = arith.constant 0.707106769 : f32
    %261 = vector.broadcast %cst_102 : f32 to vector<16x512xf32>
    %262 = arith.mulf %258, %261 : vector<16x512xf32>
    %cst_103 = arith.constant 0.000000e+00 : f32
    %263 = vector.broadcast %cst_103 : f32 to vector<16x512xf32>
    %264 = arith.cmpf oge, %262, %263 : vector<16x512xf32>
    %cst_104 = arith.constant 1.000000e+00 : f32
    %cst_105 = arith.constant -1.000000e+00 : f32
    %265 = vector.broadcast %cst_104 : f32 to vector<16x512xf32>
    %266 = vector.broadcast %cst_105 : f32 to vector<16x512xf32>
    %267 = arith.select %264, %265, %266 : vector<16x512xi1>, vector<16x512xf32>
    %268 = math.absf %262 : vector<16x512xf32>
    %cst_106 = arith.constant 0.327591091 : f32
    %269 = vector.broadcast %cst_106 : f32 to vector<16x512xf32>
    %270 = arith.mulf %269, %268 : vector<16x512xf32>
    %cst_107 = arith.constant 1.000000e+00 : f32
    %271 = vector.broadcast %cst_107 : f32 to vector<16x512xf32>
    %272 = arith.addf %271, %270 : vector<16x512xf32>
    %273 = tpu.reciprocal %272 {approx = true} : vector<16x512xf32> -> vector<16x512xf32>
    %274 = arith.mulf %272, %273 : vector<16x512xf32>
    %cst_108 = arith.constant 2.000000e+00 : f32
    %275 = vector.broadcast %cst_108 : f32 to vector<16x512xf32>
    %276 = arith.subf %275, %274 : vector<16x512xf32>
    %277 = arith.mulf %273, %276 : vector<16x512xf32>
    %cst_109 = arith.constant 1.06140542 : f32
    %278 = vector.broadcast %cst_109 : f32 to vector<16x512xf32>
    %279 = arith.mulf %278, %277 : vector<16x512xf32>
    %cst_110 = arith.constant -1.45315206 : f32
    %280 = vector.broadcast %cst_110 : f32 to vector<16x512xf32>
    %281 = arith.addf %279, %280 : vector<16x512xf32>
    %282 = arith.mulf %281, %277 : vector<16x512xf32>
    %cst_111 = arith.constant 1.42141378 : f32
    %283 = vector.broadcast %cst_111 : f32 to vector<16x512xf32>
    %284 = arith.addf %282, %283 : vector<16x512xf32>
    %285 = arith.mulf %284, %277 : vector<16x512xf32>
    %cst_112 = arith.constant -0.284496725 : f32
    %286 = vector.broadcast %cst_112 : f32 to vector<16x512xf32>
    %287 = arith.addf %285, %286 : vector<16x512xf32>
    %288 = arith.mulf %287, %277 : vector<16x512xf32>
    %cst_113 = arith.constant 0.254829586 : f32
    %289 = vector.broadcast %cst_113 : f32 to vector<16x512xf32>
    %290 = arith.addf %288, %289 : vector<16x512xf32>
    %291 = arith.mulf %290, %277 : vector<16x512xf32>
    %cst_114 = arith.constant 0.000000e+00 : f32
    %292 = vector.broadcast %cst_114 : f32 to vector<16x512xf32>
    %293 = arith.subf %292, %268 : vector<16x512xf32>
    %294 = arith.mulf %293, %268 : vector<16x512xf32>
    %295 = math.exp %294 : vector<16x512xf32>
    %296 = arith.mulf %291, %295 : vector<16x512xf32>
    %cst_115 = arith.constant 1.000000e+00 : f32
    %297 = vector.broadcast %cst_115 : f32 to vector<16x512xf32>
    %298 = arith.subf %297, %296 : vector<16x512xf32>
    %299 = arith.mulf %267, %298 : vector<16x512xf32>
    %cst_116 = arith.constant 1.000000e+00 : f32
    %300 = vector.broadcast %cst_116 : f32 to vector<16x512xf32>
    %301 = arith.addf %300, %299 : vector<16x512xf32>
    %302 = arith.mulf %260, %301 : vector<16x512xf32>
    %c17_i32_117 = arith.constant 17 : i32
    %303 = tpu.dynamic_rotate %302 by %c17_i32_117 dim 1 : vector<16x512xf32>, i32 -> vector<16x512xf32>
    %c0_118 = arith.constant 0 : index
    %c0_119 = arith.constant 0 : index
    %304 = vector.load %arg3[%c0_118, %c0_119] : memref<11x512xf32, #tpu.memory_space<vmem>>, vector<1x512xf32>
    %305 = vector.broadcast %304 : vector<1x512xf32> to vector<16x512xf32>
    %306 = arith.mulf %303, %305 : vector<16x512xf32>
    %c0_120 = arith.constant 0 : index
    %c0_121 = arith.constant 0 : index
    %307 = vector.load %arg10[%c0_120, %c0_121] : memref<152x512xf32, #tpu.memory_space<vmem>>, vector<16x512xf32>
    tpu.vector_store %arg10[%c0_120, %c0_121], %306 {strides = array<i32>} : memref<152x512xf32, #tpu.memory_space<vmem>>, vector<16x512xf32>,
    %c16_i32_122 = arith.constant 16 : i32
    %308 = tpu.dynamic_rotate %302 by %c16_i32_122 dim 1 : vector<16x512xf32>, i32 -> vector<16x512xf32>
    %c1_123 = arith.constant 1 : index
    %c0_124 = arith.constant 0 : index
    %309 = vector.load %arg3[%c1_123, %c0_124] : memref<11x512xf32, #tpu.memory_space<vmem>>, vector<1x512xf32>
    %310 = vector.broadcast %309 : vector<1x512xf32> to vector<16x512xf32>
    %311 = arith.mulf %308, %310 : vector<16x512xf32>
    %c16_125 = arith.constant 16 : index
    %c0_126 = arith.constant 0 : index
    %312 = vector.load %arg10[%c16_125, %c0_126] : memref<152x512xf32, #tpu.memory_space<vmem>>, vector<16x512xf32>
    tpu.vector_store %arg10[%c16_125, %c0_126], %311 {strides = array<i32>} : memref<152x512xf32, #tpu.memory_space<vmem>>, vector<16x512xf32>,
    %c15_i32_127 = arith.constant 15 : i32
    %313 = tpu.dynamic_rotate %302 by %c15_i32_127 dim 1 : vector<16x512xf32>, i32 -> vector<16x512xf32>
    %c2_128 = arith.constant 2 : index
    %c0_129 = arith.constant 0 : index
    %314 = vector.load %arg3[%c2_128, %c0_129] : memref<11x512xf32, #tpu.memory_space<vmem>>, vector<1x512xf32>
    %315 = vector.broadcast %314 : vector<1x512xf32> to vector<16x512xf32>
    %316 = arith.mulf %313, %315 : vector<16x512xf32>
    %c32_130 = arith.constant 32 : index
    %c0_131 = arith.constant 0 : index
    %317 = vector.load %arg10[%c32_130, %c0_131] : memref<152x512xf32, #tpu.memory_space<vmem>>, vector<16x512xf32>
    tpu.vector_store %arg10[%c32_130, %c0_131], %316 {strides = array<i32>} : memref<152x512xf32, #tpu.memory_space<vmem>>, vector<16x512xf32>,
    %c1_i32_132 = arith.constant 1 : i32
    %318 = tpu.dynamic_rotate %302 by %c1_i32_132 dim 1 : vector<16x512xf32>, i32 -> vector<16x512xf32>
    %c3_133 = arith.constant 3 : index
    %c0_134 = arith.constant 0 : index
    %319 = vector.load %arg3[%c3_133, %c0_134] : memref<11x512xf32, #tpu.memory_space<vmem>>, vector<1x512xf32>
    %320 = vector.broadcast %319 : vector<1x512xf32> to vector<16x512xf32>
    %321 = arith.mulf %318, %320 : vector<16x512xf32>
    %c48_135 = arith.constant 48 : index
    %c0_136 = arith.constant 0 : index
    %322 = vector.load %arg10[%c48_135, %c0_136] : memref<152x512xf32, #tpu.memory_space<vmem>>, vector<16x512xf32>
    tpu.vector_store %arg10[%c48_135, %c0_136], %321 {strides = array<i32>} : memref<152x512xf32, #tpu.memory_space<vmem>>, vector<16x512xf32>,
    %c4_137 = arith.constant 4 : index
    %c0_138 = arith.constant 0 : index
    %323 = vector.load %arg3[%c4_137, %c0_138] : memref<11x512xf32, #tpu.memory_space<vmem>>, vector<1x512xf32>
    %324 = vector.broadcast %323 : vector<1x512xf32> to vector<16x512xf32>
    %325 = arith.mulf %302, %324 : vector<16x512xf32>
    %c64_139 = arith.constant 64 : index
    %c0_140 = arith.constant 0 : index
    %326 = vector.load %arg10[%c64_139, %c0_140] : memref<152x512xf32, #tpu.memory_space<vmem>>, vector<16x512xf32>
    tpu.vector_store %arg10[%c64_139, %c0_140], %325 {strides = array<i32>} : memref<152x512xf32, #tpu.memory_space<vmem>>, vector<16x512xf32>,
    %c511_i32_141 = arith.constant 511 : i32
    %327 = tpu.dynamic_rotate %302 by %c511_i32_141 dim 1 : vector<16x512xf32>, i32 -> vector<16x512xf32>
    %c5_142 = arith.constant 5 : index
    %c0_143 = arith.constant 0 : index
    %328 = vector.load %arg3[%c5_142, %c0_143] : memref<11x512xf32, #tpu.memory_space<vmem>>, vector<1x512xf32>
    %329 = vector.broadcast %328 : vector<1x512xf32> to vector<16x512xf32>
    %330 = arith.mulf %327, %329 : vector<16x512xf32>
    %c80 = arith.constant 80 : index
    %c0_144 = arith.constant 0 : index
    %331 = vector.load %arg10[%c80, %c0_144] : memref<152x512xf32, #tpu.memory_space<vmem>>, vector<16x512xf32>
    tpu.vector_store %arg10[%c80, %c0_144], %330 {strides = array<i32>} : memref<152x512xf32, #tpu.memory_space<vmem>>, vector<16x512xf32>,
    %c497_i32_145 = arith.constant 497 : i32
    %332 = tpu.dynamic_rotate %302 by %c497_i32_145 dim 1 : vector<16x512xf32>, i32 -> vector<16x512xf32>
    %c6_146 = arith.constant 6 : index
    %c0_147 = arith.constant 0 : index
    %333 = vector.load %arg3[%c6_146, %c0_147] : memref<11x512xf32, #tpu.memory_space<vmem>>, vector<1x512xf32>
    %334 = vector.broadcast %333 : vector<1x512xf32> to vector<16x512xf32>
    %335 = arith.mulf %332, %334 : vector<16x512xf32>
    %c96 = arith.constant 96 : index
    %c0_148 = arith.constant 0 : index
    %336 = vector.load %arg10[%c96, %c0_148] : memref<152x512xf32, #tpu.memory_space<vmem>>, vector<16x512xf32>
    tpu.vector_store %arg10[%c96, %c0_148], %335 {strides = array<i32>} : memref<152x512xf32, #tpu.memory_space<vmem>>, vector<16x512xf32>,
    %c496_i32_149 = arith.constant 496 : i32
    %337 = tpu.dynamic_rotate %302 by %c496_i32_149 dim 1 : vector<16x512xf32>, i32 -> vector<16x512xf32>
    %c7_150 = arith.constant 7 : index
    %c0_151 = arith.constant 0 : index
    %338 = vector.load %arg3[%c7_150, %c0_151] : memref<11x512xf32, #tpu.memory_space<vmem>>, vector<1x512xf32>
    %339 = vector.broadcast %338 : vector<1x512xf32> to vector<16x512xf32>
    %340 = arith.mulf %337, %339 : vector<16x512xf32>
    %c112 = arith.constant 112 : index
    %c0_152 = arith.constant 0 : index
    %341 = vector.load %arg10[%c112, %c0_152] : memref<152x512xf32, #tpu.memory_space<vmem>>, vector<16x512xf32>
    tpu.vector_store %arg10[%c112, %c0_152], %340 {strides = array<i32>} : memref<152x512xf32, #tpu.memory_space<vmem>>, vector<16x512xf32>,
    %c495_i32_153 = arith.constant 495 : i32
    %342 = tpu.dynamic_rotate %302 by %c495_i32_153 dim 1 : vector<16x512xf32>, i32 -> vector<16x512xf32>
    %c8_154 = arith.constant 8 : index
    %c0_155 = arith.constant 0 : index
    %343 = vector.load %arg3[%c8_154, %c0_155] : memref<11x512xf32, #tpu.memory_space<vmem>>, vector<1x512xf32>
    %344 = vector.broadcast %343 : vector<1x512xf32> to vector<16x512xf32>
    %345 = arith.mulf %342, %344 : vector<16x512xf32>
    %c128 = arith.constant 128 : index
    %c0_156 = arith.constant 0 : index
    %346 = vector.load %arg10[%c128, %c0_156] : memref<152x512xf32, #tpu.memory_space<vmem>>, vector<16x512xf32>
    tpu.vector_store %arg10[%c128, %c0_156], %345 {strides = array<i32>} : memref<152x512xf32, #tpu.memory_space<vmem>>, vector<16x512xf32>,
    %c144 = arith.constant 144 : index
    %c0_157 = arith.constant 0 : index
    %347 = vector.load %arg10[%c144, %c0_157] : memref<152x512xf32, #tpu.memory_space<vmem>>, vector<8x512xf32>
    tpu.vector_store %arg10[%c144, %c0_157], %0 {strides = array<i32>} : memref<152x512xf32, #tpu.memory_space<vmem>>, vector<8x512xf32>,
    %c0_158 = arith.constant 0 : index
    %c0_159 = arith.constant 0 : index
    %348 = vector.load %arg6[%c0_158, %c0_159] : memref<16x152xf32, #tpu.memory_space<vmem>>, vector<16x152xf32>
    %c0_160 = arith.constant 0 : index
    %c0_161 = arith.constant 0 : index
    %349 = vector.load %arg10[%c0_160, %c0_161] : memref<152x512xf32, #tpu.memory_space<vmem>>, vector<152x512xf32>
    %cst_162 = arith.constant dense<0.000000e+00> : vector<16x512xf32>
    %350 = tpu.matmul %348, %349, %cst_162 {dimension_numbers = #tpu.dot_dimension_numbers<[1], [0], [0], [1], [0, 0, 1, 1], [], []>, precision = #tpu.contract_precision<fp32>} : vector<16x152xf32>, vector<152x512xf32>, vector<16x512xf32> -> vector<16x512xf32>
    %351 = vector.broadcast %9 : vector<16x1xf32> to vector<16x512xf32>
    %352 = arith.addf %350, %351 : vector<16x512xf32>
    %c0_163 = arith.constant 0 : index
    %c0_164 = arith.constant 0 : index
    %353 = vector.load %arg9[%c0_163, %c0_164] : memref<16x512xf32, #tpu.memory_space<vmem>>, vector<16x512xf32>
    tpu.vector_store %arg9[%c0_163, %c0_164], %352 {strides = array<i32>} : memref<16x512xf32, #tpu.memory_space<vmem>>, vector<16x512xf32>,
    return
  }
  func.func @transform_0(%arg0: i32) -> (i32, i32) {
    %c0_i32 = arith.constant 0 : i32
    %c0_i32_0 = arith.constant 0 : i32
    %c0_i32_1 = arith.constant 0 : i32
    return %c0_i32, %c0_i32_0 : i32, i32
  }
  func.func @transform_1(%arg0: i32) -> (i32, i32) {
    %c0_i32 = arith.constant 0 : i32
    %c0_i32_0 = arith.constant 0 : i32
    %c0_i32_1 = arith.constant 0 : i32
    return %c0_i32, %c0_i32_0 : i32, i32
  }
  func.func @transform_2(%arg0: i32) -> (i32, i32) {
    %c0_i32 = arith.constant 0 : i32
    %c0_i32_0 = arith.constant 0 : i32
    %c0_i32_1 = arith.constant 0 : i32
    return %c0_i32, %c0_i32_0 : i32, i32
  }
  func.func @transform_3(%arg0: i32) -> (i32, i32) {
    %c0_i32 = arith.constant 0 : i32
    %c0_i32_0 = arith.constant 0 : i32
    %c0_i32_1 = arith.constant 0 : i32
    return %c0_i32, %c0_i32_0 : i32, i32
  }
  func.func @transform_4(%arg0: i32) -> (i32, i32) {
    %c0_i32 = arith.constant 0 : i32
    %c0_i32_0 = arith.constant 0 : i32
    %c0_i32_1 = arith.constant 0 : i32
    return %c0_i32, %c0_i32_0 : i32, i32
  }
  func.func @transform_5(%arg0: i32) -> (i32, i32) {
    %c0_i32 = arith.constant 0 : i32
    %c0_i32_0 = arith.constant 0 : i32
    %c0_i32_1 = arith.constant 0 : i32
    return %c0_i32, %c0_i32_0 : i32, i32
  }
  func.func @transform_6(%arg0: i32) -> (i32, i32) {
    %c0_i32 = arith.constant 0 : i32
    %c0_i32_0 = arith.constant 0 : i32
    %c0_i32_1 = arith.constant 0 : i32
    return %c0_i32, %c0_i32_0 : i32, i32
  }
  func.func @transform_7(%arg0: i32) -> (i32, i32) {
    %c0_i32 = arith.constant 0 : i32
    %c0_i32_0 = arith.constant 0 : i32
    %c0_i32_1 = arith.constant 0 : i32
    return %c0_i32, %c0_i32_0 : i32, i32
  }
  func.func @transform_8(%arg0: i32) -> (i32, i32) {
    %c0_i32 = arith.constant 0 : i32
    %c0_i32_0 = arith.constant 0 : i32
    %c0_i32_1 = arith.constant 0 : i32
    return %c0_i32, %c0_i32_0 : i32, i32
  }
}

</mosaic_0001>

<bundles_post_ra>
// kernel: tpu_custom_call.1
= control target key start
LH: loop header
LB: loop body
LE: loop exit
PB: predicated region body
PF: predicated region fallthrough
CT: control target
= control target key end

     0   :  { %13 = vsyncpa [#allocation4], 0  ;;  %s13412_s0 = inlined_call_operand.hbm [shape: f32[8,512], index: 0, kind: input, shape index: {}]   ;;  %s13413_s1 = inlined_call_operand.vmem [shape: f32[32,2], index: 1, kind: input, shape index: {}]   ;;  %s13414_s2 = inlined_call_operand.vmem [shape: f32[11,512], index: 2, kind: input, shape index: {}]   ;;  %s13415_s3 = inlined_call_operand.vmem [shape: f32[16,8], index: 3, kind: input, shape index: {}]   ;;  %s13416_s4 = inlined_call_operand.hbm [shape: f32[16,72], index: 4, kind: input, shape index: {}]   ;;  %s13417_s5 = inlined_call_operand.hbm [shape: f32[16,152], index: 5, kind: input, shape index: {}]   ;;  %s13418_s6 = inlined_call_operand.vmem [shape: f32[16,32], index: 6, kind: input, shape index: {}]   ;;  %s13419_s7 = inlined_call_operand.hbm [shape: f32[16,16], index: 7, kind: input, shape index: {}]   ;;  %s13420_s8 = inlined_call_operand.hbm [shape: f32[16,512], index: 8, kind: output, shape index: {}]  }
   0x1   :  { %14 = vsyncpa [#allocation7], 0 }
   0x2   :  { %15 = vsyncpa [#allocation10], 0 }
   0x3   :  { %16 = vsyncpa [#allocation5], 0  ;;  %s9581_s27 = smov [#allocation6]   ;;  %s9463_s9 = scalar_lea.hbm %s13416_s4, 256 }
   0x4   :  { %s38_s28 = sshll.u32 %s9581_s27, 4  ;;  %p9464_p0 = scmp.ne.s32.totalorder %s13416_s4, %s9463_s9  ;;  %s39_s28 = int_to_ptr.vmem [resolvable:$true] %s38_s28 }
   0x5   :  { %p9467_p1 = scmp.lt.u32.totalorder %s9463_s9, %s13416_s4 }
   0x7   :  { %p9469_p2 = pnand %p9467_p1, %p9464_p0 }
   0x9   :  { %9472 = shalt.err (!%p9469_p2)
}
   0xa   :  { %s9473_s14 = scalar_lea.vmem %s39_s28, 256  ;;  %p9478_p4 = scmp.lt.s32.totalorder %s39_s28, %s39_s28 }
   0xb   :  { %p9474_p3 = scmp.ne.s32.totalorder %s39_s28, %s9473_s14  ;;  %p9479_p5 = scmp.lt.s32.totalorder %s9473_s14, %s9473_s14 }
   0xd   :  { %p9480_p6 = por %p9479_p5, %p9478_p4 }
   0xf   :  { %p9481_p7 = pnand %p9480_p6, %p9474_p3 }
  0x11   :  { %9484 = shalt.err (!%p9481_p7)
}
  0x12   :  { %s9582_s15 = smov 128   ;;  %s9583_s16 = smov 8  }
  0x13   :  { %44 = dma.hbm_to_vmem [thread:$0]  %s13416_s4, 256, %s39_s28, [#allocation7], %s9582_s15, %s9582_s15, %s9583_s16  }
  0x14   :  { %s9584_s19 = smov [#allocation3]   ;;  %s9585_s21 = smov [#allocation8]  }
  0x15   :  { %s23_s20 = sshll.u32 %s9584_s19, 4  ;;  %s50_s22 = sshll.u32 %s9585_s21, 4  ;;  %s24_s20 = int_to_ptr.vmem [resolvable:$true] %s23_s20  ;;  %s51_s22 = int_to_ptr.vmem [resolvable:$true] %s50_s22 }
  0x16   :  { %s9485_s25 = scalar_lea.hbm %s13412_s0, 512 }
  0x17   :  { %p9486_p8 = scmp.ne.s32.totalorder %s13412_s0, %s9485_s25  ;;  %p9489_p9 = scmp.lt.u32.totalorder %s9485_s25, %s13412_s0 }
  0x19   :  { %p9491_p10 = pnand %p9489_p9, %p9486_p8 }
  0x1b   :  { %9494 = shalt.err (!%p9491_p10)
}
  0x1c   :  { %s9495_s4 = scalar_lea.vmem %s24_s20, 512  ;;  %p9500_p12 = scmp.lt.s32.totalorder %s24_s20, %s24_s20 }
  0x1d   :  { %p9496_p11 = scmp.ne.s32.totalorder %s24_s20, %s9495_s4  ;;  %p9501_p13 = scmp.lt.s32.totalorder %s9495_s4, %s9495_s4 }
  0x1f   :  { %p9502_p0 = por %p9501_p13, %p9500_p12 }
  0x21   :  { %p9503_p1 = pnand %p9502_p0, %p9496_p11 }
  0x23   :  { %9506 = shalt.err (!%p9503_p1)
}
  0x24   :  { %26 = dma.hbm_to_vmem [thread:$0]  %s13412_s0, 512, %s24_s20, [#allocation4]  }
  0x25   :  { %s9507_s12 = scalar_lea.hbm %s13417_s5, 512 }
  0x26   :  { %p9508_p2 = scmp.ne.s32.totalorder %s13417_s5, %s9507_s12  ;;  %p9511_p3 = scmp.lt.u32.totalorder %s9507_s12, %s13417_s5 }
  0x28   :  { %p9513_p4 = pnand %p9511_p3, %p9508_p2 }
  0x2a   :  { %9516 = shalt.err (!%p9513_p4)
}
  0x2b   :  { %s9517_s19 = scalar_lea.vmem %s51_s22, 512  ;;  %p9522_p6 = scmp.lt.s32.totalorder %s51_s22, %s51_s22 }
  0x2c   :  { %p9518_p5 = scmp.ne.s32.totalorder %s51_s22, %s9517_s19  ;;  %p9523_p7 = scmp.lt.s32.totalorder %s9517_s19, %s9517_s19 }
  0x2e   :  { %p9524_p8 = por %p9523_p7, %p9522_p6 }
  0x30   :  { %p9525_p9 = pnand %p9524_p8, %p9518_p5 }
  0x32   :  { %9528 = shalt.err (!%p9525_p9)
}
  0x33   :  { %s9586_s0 = smov 256   ;;  %s9587_s20 = smov 16  }
  0x34   :  { %56 = dma.hbm_to_vmem [thread:$0]  %s13417_s5, 512, %s51_s22, [#allocation7], %s9586_s0, %s9586_s0, %s9587_s20  }
  0x35   :  { %s9588_s24 = smov [#allocation9]   ;;  %s9529_s29 = scalar_lea.hbm %s13419_s7, 256 }
  0x36   :  { %s64_s25 = sshll.u32 %s9588_s24, 4  ;;  %p9530_p10 = scmp.ne.s32.totalorder %s13419_s7, %s9529_s29  ;;  %s65_s25 = int_to_ptr.vmem [resolvable:$true] %s64_s25 }
  0x37   :  { %p9533_p11 = scmp.lt.u32.totalorder %s9529_s29, %s13419_s7 }
  0x39   :  { %p9535_p12 = pnand %p9533_p11, %p9530_p10 }
  0x3b   :  { %9538 = shalt.err (!%p9535_p12)
}
  0x3c   :  { %s9539_s10 = scalar_lea.vmem %s65_s25, 256  ;;  %p9544_p0 = scmp.lt.s32.totalorder %s65_s25, %s65_s25 }
  0x3d   :  { %p9540_p13 = scmp.ne.s32.totalorder %s65_s25, %s9539_s10  ;;  %p9545_p1 = scmp.lt.s32.totalorder %s9539_s10, %s9539_s10 }
  0x3f   :  { %p9546_p2 = por %p9545_p1, %p9544_p0 }
  0x41   :  { %p9547_p3 = pnand %p9546_p2, %p9540_p13 }
  0x43   :  { %9550 = shalt.err (!%p9547_p3)
}
  0x44   :  { %70 = dma.hbm_to_vmem [thread:$0]  %s13419_s7, 256, %s65_s25, [#allocation10], %s9582_s15, %s9582_s15, %s9583_s16  }
  0x45   :  { %9573 = dma.done.wait [#allocation4], 512  }
  0x46   :  { %9574 = vsyncadd [#allocation4], 4294966784 }
  0x47   :  { %9575 = dma.done.wait [#allocation7], 768  }
  0x48   :  { %9576 = vsyncadd [#allocation7], 4294966528 }
  0x49   :  { %9577 = dma.done.wait [#allocation10], 256  }
  0x4a   :  { %9578 = vsyncadd [#allocation10], 4294967040  ;;  %v13425_v0 = vmov 0   ;;  %v13427_v1 = vmov 1   ;;  %v9710_v2 = vld [vmem:[#allocation3] sm:$0xff]  ;;  %v9712_v3 = vld [vmem:[#allocation3 + $0x8] sm:$0xff] }
  0x4b   :  { %9361 = vset.pattern.permute.xlu0 %v13425_v0  ;;  %9362 = vset.pattern.permute.xlu1 %v13427_v1  ;;  %v9714_v4 = vld [vmem:[#allocation3 + $0x10] sm:$0xff]  ;;  %v93_v5 = vadd.f32 %v9712_v3, %v9710_v2  ;;  %v96_v6 = vmul.f32 %v9710_v2, %v9710_v2  ;;  %v97_v7 = vmul.f32 %v9712_v3, %v9712_v3  ;;  %v9722_v8 = vld [vmem:[#allocation3 + $0x18] sm:$0xff]  ;;  %v9733_v14 = vld [vmem:[%s13415_s3] sm:$0xff]  ;;  %vm843_vm4 = vcmask 261120   ;;  %s9592_s27 = smov 17   ;;  %s9593_s29 = smov 15  }
  0x4c   :  { %v110_v9 = vmul.f32 %v9714_v4, %v9714_v4  ;;  %v111_v10 = vmul.f32 %v9722_v8, %v9722_v8  ;;  %v107_v12 = vadd.f32 %v9722_v8, %v9714_v4  ;;  %v9740_v15 = vld [vmem:[%s13413_s1] sm:$0xff]  ;;  %v9745_v16 = vld [vmem:[%s13413_s1 + $0x8] sm:$0xff]  ;;  %v9758_v21 = vld [vmem:[%s13413_s1 + $0x10] sm:$0xff]  ;;  %s9594_s30 = smov 1   ;;  %s9595_s4 = smov 127   ;;  %vm1474_vm11 = vcmask 588800  }
  0x4d   :  { %94 = vadd.xlane.f32.xlu0 %v93_v5  ;;  %v98_v11 = vadd.f32 %v97_v7, %v96_v6  ;;  %v9748_v17 = vmul.f32 0.70710677, %v9740_v15  ;;  %v9751_v18 = vmul.f32 0.70710677, %v9745_v16  ;;  %v9763_v22 = vld [vmem:[%s13413_s1 + $0x18] sm:$0xff]  ;;  %s9596_s28 = smov 113  }
  0x4e   :  { %v112_v13 = vadd.f32 %v111_v10, %v110_v9  ;;  %v9766_v25 = vmul.f32 0.70710677, %v9758_v21  ;;  %v9769_v26 = vmul.f32 0.70710677, %v9763_v22  ;;  %s9597_s9 = smov 112   ;;  %s9598_s10 = smov 111  }
  0x4f   :  { %99 = vadd.xlane.f32.xlu1 %v98_v11  ;;  %v734_v19 = vand.u32 2147483647, %v9748_v17  ;;  %v735_v20 = vand.u32 2147483647, %v9751_v18  ;;  %vm726_vm0 = vcmp.ge.f32.partialorder %v9748_v17, 0.0  ;;  %vm727_vm1 = vcmp.ge.f32.partialorder %v9751_v18, 0.0 }
  0x50   :  { %v736_v29 = vand.u32 2147483647, %v9766_v25  ;;  %v737_v30 = vand.u32 2147483647, %v9769_v26  ;;  %v719_v17 = vmul.f32 0.5, %v9745_v16  ;;  %vm728_vm2 = vcmp.ge.f32.partialorder %v9766_v25, 0.0 }
  0x51   :  { %108 = vadd.xlane.f32.xlu0 %v107_v12  ;;  %v738_v23 = vmul.f32 0.3275911, %v734_v19  ;;  %v739_v24 = vmul.f32 0.3275911, %v735_v20  ;;  %v798_v50 = vsub.f32 0.0, %v734_v19  ;;  %v799_v51 = vsub.f32 0.0, %v735_v20 }
  0x52   :  { %v740_v31 = vmul.f32 0.3275911, %v736_v29  ;;  %v741_v32 = vmul.f32 0.3275911, %v737_v30  ;;  %v800_v9 = vsub.f32 0.0, %v736_v29  ;;  %v801_v10 = vsub.f32 0.0, %v737_v30 }
  0x53   :  { %113 = vadd.xlane.f32.xlu1 %v112_v13  ;;  %v742_v27 = vadd.f32 1.0, %v738_v23  ;;  %v743_v28 = vadd.f32 1.0, %v739_v24  ;;  %v802_v56 = vmul.f32 %v798_v50, %v734_v19  ;;  %v803_v57 = vmul.f32 %v799_v51, %v735_v20 }
  0x54   :  { %v744_v33 = vadd.f32 1.0, %v740_v31  ;;  %v745_v34 = vadd.f32 1.0, %v741_v32  ;;  %v804_v24 = vmul.f32 %v800_v9, %v736_v29  ;;  %vm729_vm3 = vcmp.ge.f32.partialorder %v9769_v26, 0.0 }
  0x55   :  { %9379 = vrcp.f32 %v742_v27  ;;  %v806_v62 = vmul.f32 1.442695, %v802_v56  ;;  %v808_v63 = vmul.f32 1.442695, %v803_v57  ;;  %v13421_v57 = vmov -1.0  }
  0x56   :  { %9381 = vrcp.f32 %v743_v28  ;;  %v810_v32 = vmul.f32 1.442695, %v804_v24  ;;  %v720_v25 = vmul.f32 0.5, %v9758_v21  ;;  %v721_v24 = vmul.f32 0.5, %v9763_v22 }
  0x57   :  { %9383 = vrcp.f32 %v744_v33 }
  0x58   :  { %9385 = vrcp.f32 %v745_v34 }
  0x59   :  { %9387 = vpow2.f32 %v806_v62 }
  0x5a   :  { %9389 = vpow2.f32 %v808_v63 }
  0x5b   :  { %9391 = vpow2.f32 %v810_v32 }
  0x5f   :  { %v9380_v35 = vpop.eup %9379 }
  0x60   :  { %v9382_v36 = vpop.eup %9381  ;;  %v750_v37 = vmul.f32 %v9380_v35, %v742_v27  ;;  %v805_v27 = vmul.f32 %v801_v10, %v737_v30 }
  0x61   :  { %v751_v38 = vmul.f32 %v9382_v36, %v743_v28  ;;  %v9384_v40 = vpop.eup %9383 }
  0x62   :  { %v754_v39 = vsub.f32 2.0, %v750_v37  ;;  %v9386_v42 = vpop.eup %9385  ;;  %v752_v44 = vmul.f32 %v9384_v40, %v744_v33 }
  0x63   :  { %v755_v41 = vsub.f32 2.0, %v751_v38  ;;  %v753_v46 = vmul.f32 %v9386_v42, %v745_v34 }
  0x64   :  { %205 = vperm.xlu1 %9362, %v9733_v14   ;;  %v758_v43 = vmul.f32 %v9380_v35, %v754_v39  ;;  %v756_v48 = vsub.f32 2.0, %v752_v44  ;;  %v812_v35 = vmul.f32 1.442695, %v805_v27 }
  0x65   :  { %v759_v45 = vmul.f32 %v9382_v36, %v755_v41  ;;  %v757_v52 = vsub.f32 2.0, %v753_v46 }
  0x66   :  { %v762_v47 = vmul.f32 1.0614054, %v758_v43  ;;  %v760_v54 = vmul.f32 %v9384_v40, %v756_v48  ;;  %9393 = vpow2.f32 %v812_v35 }
  0x67   :  { %197 = vperm.xlu0 %9361, %v9733_v14   ;;  %v763_v49 = vmul.f32 1.0614054, %v759_v45  ;;  %v761_v58 = vmul.f32 %v9386_v42, %v757_v52 }
  0x68   :  { %v766_v53 = vadd.f32 -1.4531521, %v762_v47  ;;  %v764_v60 = vmul.f32 1.0614054, %v760_v54  ;;  %v9388_v47 = vpop.eup %9387 }
  0x69   :  { %v767_v55 = vadd.f32 -1.4531521, %v763_v49  ;;  %v765_v5 = vmul.f32 1.0614054, %v761_v58  ;;  %v9390_v49 = vpop.eup %9389 }
  0x6a   :  { %v770_v59 = vmul.f32 %v766_v53, %v758_v43  ;;  %v768_v7 = vadd.f32 -1.4531521, %v764_v60 }
  0x6b   :  { %v771_v61 = vmul.f32 %v767_v55, %v759_v45  ;;  %v769_v12 = vadd.f32 -1.4531521, %v765_v5 }
  0x6c   :  { %v774_v6 = vadd.f32 1.4214138, %v770_v59  ;;  %v772_v23 = vmul.f32 %v768_v7, %v760_v54  ;;  %v730_v59 = vsel %vm726_vm0, 1.0, %v13421_v57  ;;  %v718_v7 = vmul.f32 0.5, %v9740_v15  ;;  %v712_v15 = vld [vmem:[%s13418_s6] sm:$0xff] }
  0x6d   :  { %v775_v11 = vadd.f32 1.4214138, %v771_v61  ;;  %v773_v20 = vmul.f32 %v769_v12, %v761_v58 }
  0x6e   :  { %v778_v13 = vmul.f32 %v774_v6, %v758_v43  ;;  %v776_v31 = vadd.f32 1.4214138, %v772_v23 }
  0x6f   :  { %v779_v19 = vmul.f32 %v775_v11, %v759_v45  ;;  %v777_v34 = vadd.f32 1.4214138, %v773_v20 }
  0x70   :  { %v782_v28 = vadd.f32 -0.28449672, %v778_v13  ;;  %v780_v37 = vmul.f32 %v776_v31, %v760_v54 }
  0x71   :  { %v783_v33 = vadd.f32 -0.28449672, %v779_v19  ;;  %v781_v39 = vmul.f32 %v777_v34, %v761_v58  ;;  %v713_v19 = vld [vmem:[%s13418_s6 + $0x8] sm:$0xff] }
  0x72   :  { %v786_v36 = vmul.f32 %v782_v28, %v758_v43  ;;  %v784_v41 = vadd.f32 -0.28449672, %v780_v37  ;;  %v845_v28 = vsel %vm843_vm4, %v712_v15, 0  ;;  %v848_v31 = vsel %vm843_vm4, %v713_v19, 0 }
  0x73   :  { %v787_v38 = vmul.f32 %v783_v33, %v759_v45  ;;  %v785_v44 = vadd.f32 -0.28449672, %v781_v39  ;;  %v9791_v33 = vand.u32 4294901760, %v845_v28  ;;  %v9793_v34 = vand.u32 4294901760, %v848_v31 }
  0x74   :  { %v790_v40 = vadd.f32 0.2548296, %v786_v36  ;;  %v788_v46 = vmul.f32 %v784_v41, %v760_v54  ;;  %v8035_v19 = vld [vmem:[%s13414_s2 + $0x22] ss:$8 sm:$0xf] }
  0x75   :  { %v791_v42 = vadd.f32 0.2548296, %v787_v38  ;;  %v789_v48 = vmul.f32 %v785_v44, %v761_v58  ;;  %v9802_v38 = vsub.f32 %v845_v28, %v9791_v33  ;;  %v9805_v39 = vsub.f32 %v848_v31, %v9793_v34 }
  0x76   :  { %v794_v29 = vmul.f32 %v790_v40, %v758_v43  ;;  %v792_v51 = vadd.f32 0.2548296, %v788_v46  ;;  %v731_v43 = vsel %vm727_vm1, 1.0, %v13421_v57 }
  0x77   :  { %v795_v30 = vmul.f32 %v791_v42, %v759_v45  ;;  %v793_v53 = vadd.f32 0.2548296, %v789_v48  ;;  %v9392_v45 = vpop.eup %9391  ;;  %v931_v46 = vand.u32 4294901760, %v9805_v39 }
  0x78   :  { %v814_v50 = vmul.f32 %v9388_v47, %v794_v29  ;;  %v796_v56 = vmul.f32 %v792_v51, %v760_v54  ;;  %v9394_v63 = vpop.eup %9393  ;;  %v732_v54 = vsel %vm728_vm2, 1.0, %v13421_v57  ;;  %v921_v29 = vand.u32 4294901760, %v9802_v38 }
  0x79   :  { %v815_v52 = vmul.f32 %v9390_v49, %v795_v30  ;;  %v797_v61 = vmul.f32 %v793_v53, %v761_v58  ;;  %v733_v58 = vsel %vm729_vm3, 1.0, %v13421_v57  ;;  %vm2943_vm2 = vcmask 130048  }
  0x7a   :  { %v818_v55 = vsub.f32 1.0, %v814_v50  ;;  %v816_v6 = vmul.f32 %v9392_v45, %v796_v56  ;;  %v922_v49 = vsub.f32 %v9802_v38, %v921_v29  ;;  %v932_v50 = vsub.f32 %v9805_v39, %v931_v46 }
  0x7b   :  { %v819_v60 = vsub.f32 1.0, %v815_v52  ;;  %v817_v10 = vmul.f32 %v9394_v63, %v797_v61 }
  0x7c   :  { %v822_v62 = vmul.f32 %v818_v55, %v730_v59  ;;  %v820_v12 = vsub.f32 1.0, %v816_v6  ;;  %v122_v6 = vlaneseq }
  0x7d   :  { %v823_v5 = vmul.f32 %v819_v60, %v731_v43  ;;  %v821_v23 = vsub.f32 1.0, %v817_v10  ;;  %v923_v60 = vand.u32 4294901760, %v922_v49 }
  0x7e   :  { %v826_v9 = vadd.f32 1.0, %v822_v62  ;;  %v824_v26 = vmul.f32 %v820_v12, %v732_v54  ;;  %v933_v62 = vand.u32 4294901760, %v932_v50 }
  0x7f   :  { %v827_v18 = vadd.f32 1.0, %v823_v5  ;;  %v825_v27 = vmul.f32 %v821_v23, %v733_v58  ;;  %8192 = vmatprep.mubr.f32.mxu0 %v923_v60  ;;  %v123_v23 = vshrl.u32 %v122_v6, 7 }
  0x80   :  { %v830_v11 = vmul.f32 %v826_v9, %v718_v7  ;;  %v828_v32 = vadd.f32 1.0, %v824_v26 }
  0x81   :  { %v831_v13 = vmul.f32 %v827_v18, %v719_v17  ;;  %v829_v21 = vadd.f32 1.0, %v825_v27  ;;  %v9852_v27 = vsub.s32 0, %v123_v23  ;;  %v9854_v28 = vsub.s32 1, %v123_v23 }
  0x82   :  { %v851_v16 = vand.u32 4294901760, %v830_v11  ;;  %v832_v37 = vmul.f32 %v828_v32, %v720_v25  ;;  %v9856_v31 = vsub.s32 2, %v123_v23  ;;  %v9858_v32 = vsub.s32 3, %v123_v23 }
  0x83   :  { %v854_v20 = vand.u32 4294901760, %v831_v13  ;;  %v833_v41 = vmul.f32 %v829_v21, %v721_v24  ;;  %13786 = vst [vmem:[#allocation16_spill] sm:$0xff] %v9852_v27  ;;  %13787 = vst [vmem:[#allocation17_spill] sm:$0xff] %v9854_v28 }
  0x84   :  { %v9795_v35 = vsub.f32 %v830_v11, %v851_v16  ;;  %v857_v44 = vand.u32 4294901760, %v832_v37  ;;  %13788 = vst [vmem:[#allocation18_spill] sm:$0xff] %v9856_v31  ;;  %13789 = vst [vmem:[#allocation19_spill] sm:$0xff] %v9858_v32 }
  0x85   :  { %v9797_v36 = vpack.c.bf16 %v854_v20, %v851_v16  ;;  %v9799_v22 = vsub.f32 %v831_v13, %v854_v20  ;;  %v860_v30 = vand.u32 4294901760, %v833_v41 }
  0x86   :  { %v942_v40 = vand.u32 4294901760, %v9795_v35  ;;  %v9825_v52 = vsub.f32 %v832_v37, %v857_v44 }
  0x87   :  { %8419 = vmatprep.subr.bf16.mxu0 %v9797_v36  ;;  %v949_v42 = vand.u32 4294901760, %v9799_v22  ;;  %v9827_v55 = vpack.c.bf16 %v860_v30, %v857_v44  ;;  %v9829_v59 = vsub.f32 %v833_v41, %v860_v30  ;;  %v8434_v15 = vpack.c.bf16 %v9799_v22, %v9795_v35  ;;  %v8034_v41 = vld [vmem:[%s13414_s2 + $0x21] ss:$8 sm:$0xf] }
  0x88   :  { %8421 = vmatpush3.bf16.msra.mxu0 %v9797_v36  ;;  %v943_v47 = vsub.f32 %v9795_v35, %v942_v40  ;;  %v956_v61 = vand.u32 4294901760, %v9825_v52  ;;  %v9866_v44 = vrot.slane %v8035_v19, %v9852_v27  ;;  %v9872_v30 = vrot.slane %v8035_v19, %v9856_v31 }
  0x89   :  { %v950_v48 = vsub.f32 %v9799_v22, %v949_v42  ;;  %8423 = vmatprep.subr.bf16.mxu0 %v9827_v55  ;;  %v963_v5 = vand.u32 4294901760, %v9829_v59  ;;  %v8438_v37 = vpack.c.bf16 %v9829_v59, %v9825_v52  ;;  %v9880_v49 = vrot.slane %v8034_v41, %v9852_v27 }
  0x8a   :  { %v944_v51 = vand.u32 4294901760, %v943_v47  ;;  %v957_v18 = vsub.f32 %v9825_v52, %v956_v61  ;;  %13790 = vst [vmem:[#allocation20_spill] sm:$0xff] %v9866_v44  ;;  %v9869_v47 = vrot.slane %v8035_v19, %v9854_v28  ;;  %13792 = vst [vmem:[#allocation22_spill] sm:$0xff] %v9872_v30  ;;  %v9883_v50 = vrot.slane %v8034_v41, %v9854_v28 }
  0x8b   :  { %v951_v56 = vand.u32 4294901760, %v950_v48  ;;  %v964_v54 = vsub.f32 %v9829_v59, %v963_v5  ;;  %v9875_v48 = vrot.slane %v8035_v19, %v9858_v32  ;;  %13794 = vst [vmem:[#allocation24_spill] sm:$0xff] %v9880_v49 }
  0x8c   :  { %8425 = vmatpush3.bf16.msra.mxu0 %v9827_v55  ;;  %v958_v12 = vand.u32 4294901760, %v957_v18  ;;  %13791 = vst [vmem:[#allocation21_spill] sm:$0xff] %v9869_v47  ;;  %13795 = vst [vmem:[#allocation25_spill] sm:$0xff] %v9883_v50 }
  0x8d   :  { %v8426_v63 = vpack.c.bf16 %v951_v56, %v944_v51  ;;  %v965_v13 = vand.u32 4294901760, %v964_v54  ;;  %13793 = vst [vmem:[#allocation23_spill] sm:$0xff] %v9875_v48  ;;  %v9886_v51 = vrot.slane %v8034_v41, %v9856_v31 }
  0x8f   :  { %8427 = vmatprep.subr.bf16.mxu0 %v8426_v63  ;;  %8193 = vmatmul.mubr.f32.vlgmr.msra.gmra.mrb[0].mxu0 %v933_v62  ;;  %v8430_v26 = vpack.c.bf16 %v965_v13, %v958_v12  ;;  %13796 = vst [vmem:[#allocation26_spill] sm:$0xff] %v9886_v51  ;;  %v8450_v12 = vpack.c.bf16 %v949_v42, %v942_v40 }
  0x90   :  { %8429 = vmatpush3.bf16.msra.mxu0 %v8426_v63  ;;  %8203 = vmatprep.mubr.f32.mxu0 %v9791_v33 }
  0x91   :  { %8431 = vmatprep.subr.bf16.mxu0 %v8430_v26 }
  0x94   :  { %8433 = vmatpush3.bf16.msra.mxu0 %v8430_v26 }
  0x95   :  { %8435 = vmatprep.subr.bf16.mxu0 %v8434_v15 }
  0x97   :  { %8204 = vmatmul.mubr.f32.vlgmr.msra.gmra.mrb[0].mxu0 %v9793_v34 }
  0x98   :  { %8437 = vmatpush3.bf16.msra.mxu0 %v8434_v15  ;;  %8214 = vmatprep.mubr.f32.mxu0 %v9802_v38 }
  0x99   :  { %8439 = vmatprep.subr.bf16.mxu0 %v8438_v37 }
  0x9c   :  { %8441 = vmatpush3.bf16.msra.mxu0 %v8438_v37 }
  0x9d   :  { %8443 = vmatprep.subr.bf16.mxu0 %v9797_v36 }
  0x9f   :  { %8215 = vmatmul.mubr.f32.vlgmr.msra.gmra.mrb[0].mxu0 %v9805_v39 }
  0xa0   :  { %8445 = vmatpush3.bf16.msra.mxu0 %v9797_v36  ;;  %8225 = vmatprep.mubr.f32.mxu0 %v921_v29 }
  0xa1   :  { %8447 = vmatprep.subr.bf16.mxu0 %v9827_v55 }
  0xa4   :  { %8449 = vmatpush3.bf16.msra.mxu0 %v9827_v55 }
  0xa5   :  { %8451 = vmatprep.subr.bf16.mxu0 %v8450_v12 }
  0xa7   :  { %8226 = vmatmul.mubr.f32.vlgmr.msra.gmra.mrb[0].mxu0 %v931_v46 }
  0xa8   :  { %8453 = vmatpush3.bf16.msra.mxu0 %v8450_v12  ;;  %8236 = vmatprep.mubr.f32.mxu0 %v9791_v33 }
  0xda   :  { %v95_v53 = vpop.xlane.xlu0 %94 }
  0xdb   :  { %v9831_v43 = vmul.f32 0.00390625, %v95_v53  ;;  %v9889_v53 = vrot.slane %v8034_v41, %v9858_v32  ;;  %v8454_v41 = vpack.c.bf16 %v963_v5, %v956_v61 }
  0xdc   :  { %v100_v45 = vpop.xlane.xlu1 %99 }
  0xdd   :  { %v102_v7 = vmul.f32 0.00390625, %v100_v45  ;;  %v103_v17 = vmul.f32 %v9831_v43, %v9831_v43  ;;  %13797 = vst [vmem:[#allocation27_spill] sm:$0xff] %v9889_v53  ;;  %v142_v63 = vmul.f32 %v9880_v49, %v9831_v43  ;;  %8455 = vmatprep.subr.bf16.mxu0 %v8454_v41 }
  0xde   :  { %v109_v9 = vpop.xlane.xlu0 %108  ;;  %8457 = vmatpush3.bf16.msra.mxu0 %v8454_v41 }
  0xdf   :  { %v115_v10 = vmul.f32 0.00390625, %v109_v9  ;;  %v104_v11 = vsub.f32 %v102_v7, %v103_v17  ;;  %v143_v7 = vmul.f32 %v9883_v50, %v9831_v43  ;;  %v144_v17 = vmul.f32 %v9886_v51, %v9831_v43  ;;  %8459 = vmatprep.subr.bf16.mxu0 %v9797_v36 }
  0xe0   :  { %v114_v58 = vpop.xlane.xlu1 %113  ;;  %v145_v9 = vmul.f32 %v9889_v53, %v9831_v43 }
  0xe1   :  { %v105_v16 = vadd.f32 1e-05, %v104_v11  ;;  %v116_v25 = vmul.f32 0.00390625, %v114_v58  ;;  %v117_v24 = vmul.f32 %v115_v10, %v115_v10  ;;  %v167_v56 = vmul.f32 %v9866_v44, %v115_v10  ;;  %8237 = vmatmul.mubr.f32.vlgmr.msra.gmra.mrb[0].mxu0 %v9793_v34 }
  0xe2   :  { %v168_v60 = vmul.f32 %v9869_v47, %v115_v10  ;;  %v169_v45 = vmul.f32 %v9872_v30, %v115_v10  ;;  %v170_v62 = vmul.f32 %v9875_v48, %v115_v10  ;;  %8461 = vmatpush3.bf16.msra.mxu0 %v9797_v36  ;;  %8247 = vmatprep.mubr.f32.mxu0 %v9791_v33 }
  0xe3   :  { %v118_v20 = vsub.f32 %v116_v25, %v117_v24  ;;  %9395 = vrsqrt.f32 %v105_v16  ;;  %v171_v54 = vadd.f32 %v167_v56, %v142_v63  ;;  %8463 = vmatprep.subr.bf16.mxu0 %v9827_v55 }
  0xe4   :  { %v172_v11 = vadd.f32 %v168_v60, %v143_v7  ;;  %v173_v58 = vadd.f32 %v169_v45, %v144_v17  ;;  %v174_v10 = vadd.f32 %v170_v62, %v145_v9 }
  0xe5   :  { %v119_v21 = vadd.f32 1e-05, %v118_v20  ;;  %v187_v40 = vsub.f32 %v9710_v2, %v171_v54 }
  0xe6   :  { %v188_v42 = vsub.f32 %v9712_v3, %v172_v11  ;;  %v189_v29 = vsub.f32 %v9714_v4, %v173_v58  ;;  %v190_v24 = vsub.f32 %v9722_v8, %v174_v10  ;;  %v198_v37 = vpop.permute.xlu0 %197  ;;  %v206_v4 = vpop.permute.xlu1 %205  ;;  %8465 = vmatpush3.bf16.msra.mxu0 %v9827_v55 }
  0xe7   :  { %9397 = vrsqrt.f32 %v119_v21 }
  0xe9   :  { %8248 = vmatmul.mubr.f32.vlgmr.msra.gmra.mrb[0].mxu0 %v9793_v34 }
  0xed   :  { %v9396_v18 = vpop.eup %9395 }
  0xee   :  { %v175_v13 = vmul.f32 %v9396_v18, %v9880_v49  ;;  %v176_v23 = vmul.f32 %v9396_v18, %v9883_v50  ;;  %v177_v15 = vmul.f32 %v9396_v18, %v9886_v51  ;;  %v178_v16 = vmul.f32 %v9396_v18, %v9889_v53 }
  0xf1   :  { %v9398_v43 = vpop.eup %9397 }
  0xf2   :  { %v179_v25 = vmul.f32 %v9398_v43, %v9866_v44  ;;  %v180_v38 = vmul.f32 %v9398_v43, %v9869_v47  ;;  %v181_v35 = vmul.f32 %v9398_v43, %v9872_v30  ;;  %v182_v22 = vmul.f32 %v9398_v43, %v9875_v48 }
  0xf4   :  { %v183_v26 = vadd.f32 %v179_v25, %v175_v13  ;;  %v184_v19 = vadd.f32 %v180_v38, %v176_v23  ;;  %v185_v20 = vadd.f32 %v181_v35, %v177_v15  ;;  %v186_v21 = vadd.f32 %v182_v22, %v178_v16 }
  0xf6   :  { %v191_v2 = vmul.f32 %v187_v40, %v183_v26  ;;  %v192_v56 = vmul.f32 %v188_v42, %v184_v19  ;;  %v193_v3 = vmul.f32 %v189_v29, %v185_v20  ;;  %v194_v60 = vmul.f32 %v190_v24, %v186_v21 }
  0xf8   :  { %v200_v8 = vmul.f32 %v198_v37, %v191_v2  ;;  %v201_v45 = vmul.f32 %v198_v37, %v192_v56  ;;  %v202_v62 = vmul.f32 %v198_v37, %v193_v3  ;;  %v203_v63 = vmul.f32 %v198_v37, %v194_v60 }
  0xfa   :  { %v9933_v52 = vadd.f32 %v206_v4, %v200_v8  ;;  %v9935_v59 = vadd.f32 %v206_v4, %v201_v45  ;;  %v9937_v61 = vadd.f32 %v206_v4, %v202_v62  ;;  %v9939_v5 = vadd.f32 %v206_v4, %v203_v63 }
  0xfc   :  { %v9942_v39 = vmul.f32 0.70710677, %v9933_v52  ;;  %v9945_v46 = vmul.f32 0.70710677, %v9935_v59  ;;  %v9948_v7 = vmul.f32 0.70710677, %v9937_v61 }
  0xfd   :  { %v9952_v17 = vmul.f32 0.70710677, %v9939_v5 }
  0xfe   :  { %v228_v9 = vand.u32 2147483647, %v9942_v39  ;;  %v229_v18 = vand.u32 2147483647, %v9945_v46  ;;  %v230_v54 = vand.u32 2147483647, %v9948_v7 }
  0xff   :  { %v231_v11 = vand.u32 2147483647, %v9952_v17  ;;  %vm220_vm5 = vcmp.ge.f32.partialorder %v9942_v39, 0.0  ;;  %vm221_vm6 = vcmp.ge.f32.partialorder %v9945_v46, 0.0  ;;  %vm223_vm7 = vcmp.ge.f32.partialorder %v9952_v17, 0.0 }
 0x100   :  { %v232_v58 = vmul.f32 0.3275911, %v228_v9  ;;  %v233_v10 = vmul.f32 0.3275911, %v229_v18  ;;  %v234_v12 = vmul.f32 0.3275911, %v230_v54 }
 0x101   :  { %v235_v43 = vmul.f32 0.3275911, %v231_v11  ;;  %v292_v22 = vsub.f32 0.0, %v228_v9  ;;  %v293_v24 = vsub.f32 0.0, %v229_v18  ;;  %v295_v21 = vsub.f32 0.0, %v231_v11 }
 0x102   :  { %v236_v13 = vadd.f32 1.0, %v232_v58  ;;  %v237_v23 = vadd.f32 1.0, %v233_v10  ;;  %v238_v15 = vadd.f32 1.0, %v234_v12  ;;  %v294_v3 = vsub.f32 0.0, %v230_v54 }
 0x103   :  { %v239_v36 = vadd.f32 1.0, %v235_v43  ;;  %v296_v34 = vmul.f32 %v292_v22, %v228_v9  ;;  %v297_v60 = vmul.f32 %v293_v24, %v229_v18  ;;  %v299_v63 = vmul.f32 %v295_v21, %v231_v11 }
 0x104   :  { %9399 = vrcp.f32 %v236_v13  ;;  %v212_v46 = vmul.f32 0.5, %v9933_v52  ;;  %vm222_vm8 = vcmp.ge.f32.partialorder %v9948_v7, 0.0 }
 0x105   :  { %9401 = vrcp.f32 %v237_v23  ;;  %v300_v12 = vmul.f32 1.442695, %v296_v34  ;;  %v226_v52 = vsel %vm222_vm8, 1.0, %v13421_v57 }
 0x106   :  { %9403 = vrcp.f32 %v238_v15 }
 0x107   :  { %9405 = vrcp.f32 %v239_v36 }
 0x108   :  { %9407 = vpow2.f32 %v300_v12 }
 0x10e   :  { %v9400_v33 = vpop.eup %9399 }
 0x10f   :  { %v9402_v16 = vpop.eup %9401  ;;  %v244_v25 = vmul.f32 %v9400_v33, %v236_v13 }
 0x110   :  { %v9404_v38 = vpop.eup %9403  ;;  %v245_v35 = vmul.f32 %v9402_v16, %v237_v23  ;;  %v298_v23 = vmul.f32 %v294_v3, %v230_v54 }
 0x111   :  { %v9406_v40 = vpop.eup %9405  ;;  %v246_v42 = vmul.f32 %v9404_v38, %v238_v15  ;;  %v248_v29 = vsub.f32 2.0, %v244_v25  ;;  %v302_v15 = vmul.f32 1.442695, %v297_v60  ;;  %v306_v25 = vmul.f32 1.442695, %v299_v63 }
 0x112   :  { %v247_v55 = vmul.f32 %v9406_v40, %v239_v36  ;;  %v249_v26 = vsub.f32 2.0, %v245_v35 }
 0x113   :  { %v250_v19 = vsub.f32 2.0, %v246_v42  ;;  %v252_v20 = vmul.f32 %v9400_v33, %v248_v29  ;;  %9409 = vpow2.f32 %v302_v15 }
 0x114   :  { %v251_v37 = vsub.f32 2.0, %v247_v55  ;;  %v253_v41 = vmul.f32 %v9402_v16, %v249_v26  ;;  %9411 = vpow2.f32 %v306_v25 }
 0x115   :  { %v254_v2 = vmul.f32 %v9404_v38, %v250_v19  ;;  %v256_v56 = vmul.f32 1.0614054, %v252_v20 }
 0x116   :  { %v255_v4 = vmul.f32 %v9406_v40, %v251_v37  ;;  %v257_v8 = vmul.f32 1.0614054, %v253_v41  ;;  %v304_v40 = vmul.f32 1.442695, %v298_v23 }
 0x117   :  { %v258_v45 = vmul.f32 1.0614054, %v254_v2  ;;  %v260_v62 = vadd.f32 -1.4531521, %v256_v56 }
 0x118   :  { %v259_v58 = vmul.f32 1.0614054, %v255_v4  ;;  %v261_v10 = vadd.f32 -1.4531521, %v257_v8  ;;  %9413 = vpow2.f32 %v304_v40 }
 0x119   :  { %v262_v43 = vadd.f32 -1.4531521, %v258_v45  ;;  %v264_v13 = vmul.f32 %v260_v62, %v252_v20  ;;  %v9408_v62 = vpop.eup %9407 }
 0x11a   :  { %v263_v36 = vadd.f32 -1.4531521, %v259_v58  ;;  %v265_v33 = vmul.f32 %v261_v10, %v253_v41 }
 0x11b   :  { %v266_v16 = vmul.f32 %v262_v43, %v254_v2  ;;  %v268_v9 = vadd.f32 1.4214138, %v264_v13 }
 0x11c   :  { %v267_v38 = vmul.f32 %v263_v36, %v255_v4  ;;  %v269_v35 = vadd.f32 1.4214138, %v265_v33  ;;  %v224_v33 = vsel %vm220_vm5, 1.0, %v13421_v57 }
 0x11d   :  { %v270_v18 = vadd.f32 1.4214138, %v266_v16  ;;  %v272_v22 = vmul.f32 %v268_v9, %v252_v20  ;;  %v9410_v10 = vpop.eup %9409 }
 0x11e   :  { %v271_v11 = vadd.f32 1.4214138, %v267_v38  ;;  %v273_v42 = vmul.f32 %v269_v35, %v253_v41  ;;  %v9412_v15 = vpop.eup %9411 }
 0x11f   :  { %v274_v29 = vmul.f32 %v270_v18, %v254_v2  ;;  %v276_v24 = vadd.f32 -0.28449672, %v272_v22  ;;  %v227_v22 = vsel %vm223_vm7, 1.0, %v13421_v57 }
 0x120   :  { %v275_v55 = vmul.f32 %v271_v11, %v255_v4  ;;  %v277_v54 = vadd.f32 -0.28449672, %v273_v42 }
 0x121   :  { %v278_v26 = vadd.f32 -0.28449672, %v274_v29  ;;  %v280_v19 = vmul.f32 %v276_v24, %v252_v20  ;;  %v215_v24 = vmul.f32 0.5, %v9939_v5  ;;  %v10014_v5 = vld [vmem:[%s13415_s3 + $0x8] sm:$0xff] }
 0x122   :  { %v279_v21 = vadd.f32 -0.28449672, %v275_v55  ;;  %v281_v37 = vmul.f32 %v277_v54, %v253_v41  ;;  %v9414_v25 = vpop.eup %9413  ;;  %v214_v54 = vmul.f32 0.5, %v9937_v61  ;;  %v9599_v61 = vmov 3   ;;  %13798 = vst [vmem:[#allocation28_spill] sm:$0xff] %v10014_v5 }
 0x123   :  { %v282_v34 = vmul.f32 %v278_v26, %v254_v2  ;;  %v284_v56 = vadd.f32 0.2548296, %v280_v19  ;;  %9364 = vset.pattern.permute.xlu0 %v9599_v61  ;;  %9363 = vset.pattern.permute.xlu1 %v9599_v61  ;;  %v13431_v19 = vmov 0.0   ;;  %v10135_v61 = vld [vmem:[%s13414_s2 + $0x2] ss:$8 sm:$0xf] }
 0x124   :  { %v283_v3 = vmul.f32 %v279_v21, %v255_v4  ;;  %v285_v60 = vadd.f32 0.2548296, %v281_v37  ;;  %1563 = vmatprep.mubr.f32.mxu1 %v13431_v19  ;;  %2285 = vmatprep.mubr.f32.mxu0 %v13431_v19  ;;  %v8039_v21 = vld [vmem:[%s13414_s2 + $0x4] ss:$8 sm:$0xf] }
 0x125   :  { %v286_v8 = vadd.f32 0.2548296, %v282_v34  ;;  %v288_v45 = vmul.f32 %v284_v56, %v252_v20  ;;  %v225_v20 = vsel %vm221_vm6, 1.0, %v13421_v57  ;;  %v515_v37 = vrot.slane %v8039_v21, %v9854_v28 }
 0x126   :  { %v287_v63 = vadd.f32 0.2548296, %v283_v3  ;;  %v289_v58 = vmul.f32 %v285_v60, %v253_v41  ;;  %v511_v34 = vrot.slane %v8039_v21, %v9852_v27  ;;  %v523_v60 = vrot.slane %v8039_v21, %v9858_v32 }
 0x127   :  { %v308_v12 = vmul.f32 %v9408_v62, %v288_v45  ;;  %v290_v43 = vmul.f32 %v286_v8, %v254_v2  ;;  %v519_v62 = vrot.slane %v8039_v21, %v9856_v31 }
 0x128   :  { %v291_v13 = vmul.f32 %v287_v63, %v255_v4  ;;  %v309_v23 = vmul.f32 %v9410_v10, %v289_v58  ;;  %v213_v4 = vmul.f32 0.5, %v9935_v59 }
 0x129   :  { %v312_v36 = vsub.f32 1.0, %v308_v12  ;;  %v310_v41 = vmul.f32 %v9414_v25, %v290_v43 }
 0x12a   :  { %v311_v16 = vmul.f32 %v9412_v15, %v291_v13  ;;  %v313_v9 = vsub.f32 1.0, %v309_v23  ;;  %v10057_v13 = vld [vmem:[%s13414_s2] ss:$8 sm:$0xf] }
 0x12b   :  { %v316_v38 = vmul.f32 %v312_v36, %v224_v33  ;;  %v314_v11 = vsub.f32 1.0, %v310_v41  ;;  %v10065_v23 = vld [vmem:[%s13414_s2 + $0x1] ss:$8 sm:$0xf] }
 0x12c   :  { %v315_v39 = vsub.f32 1.0, %v311_v16  ;;  %v317_v35 = vmul.f32 %v313_v9, %v225_v20  ;;  %v352_v16 = vrot.slane %v10057_v13, %v9854_v28 }
 0x12d   :  { %v320_v2 = vadd.f32 1.0, %v316_v38  ;;  %v318_v59 = vmul.f32 %v314_v11, %v226_v52  ;;  %v396_v38 = vrot.slane %v10065_v23, %v9854_v28 }
 0x12e   :  { %v321_v18 = vadd.f32 1.0, %v317_v35  ;;  %v319_v42 = vmul.f32 %v315_v39, %v227_v22 }
 0x12f   :  { %v9972_v40 = vmul.f32 %v320_v2, %v212_v46  ;;  %v322_v7 = vadd.f32 1.0, %v318_v59 }
 0x130   :  { %v325_v29 = vmul.f32 %v321_v18, %v213_v4  ;;  %v323_v17 = vadd.f32 1.0, %v319_v42  ;;  %v1420_v18 = vld [vmem:[#allocation6] sm:$0xff] }
 0x131   :  { %328 = vrot.lane.b32.xlu1 %v9972_v40, %s9592_s27  ;;  %v326_v26 = vmul.f32 %v322_v7, %v214_v54  ;;  %v10037_v3 = vmul.f32 %v511_v34, %v9972_v40  ;;  %v1476_v52 = vsel %vm1474_vm11, %v1420_v18, 0  ;;  %v348_v7 = vrot.slane %v10057_v13, %v9852_v27  ;;  %v10179_v18 = vld [vmem:[%s13414_s2 + $0x5] ss:$8 sm:$0xf] }
 0x132   :  { %419 = vrot.lane.b32.xlu0 %v325_v29, %s9593_s29  ;;  %v327_v55 = vmul.f32 %v323_v17, %v215_v24  ;;  %v10034_v56 = vmul.f32 %v515_v37, %v325_v29  ;;  %v392_v34 = vrot.slane %v10065_v23, %v9852_v27 }
 0x133   :  { %v13433_v58 = vand.u32 4294901760, %v10037_v3 }
 0x134   :  { %v13434_v63 = vand.u32 4294901760, %v10034_v56  ;;  %v10048_v10 = vmul.f32 %v523_v60, %v327_v55  ;;  %v10148_v60 = vld [vmem:[%s13414_s2 + $0x3] ss:$8 sm:$0xf] }
 0x135   :  { %330 = vrot.lane.b32.xlu1 %v325_v29, %s9592_s27  ;;  %v10075_v36 = vsub.f32 %v10037_v3, %v13433_v58 }
 0x136   :  { %463 = vrot.lane.b32.xlu0 %v325_v29, %s9594_s30  ;;  %13800 = vst [vmem:[#allocation30_spill] sm:$0xff] %v10048_v10  ;;  %v10070_v15 = vsub.f32 %v10034_v56, %v13434_v63  ;;  %v13429_v33 = vand.u32 4294901760, %v10048_v10 }
 0x137   :  { %13803 = vst [vmem:[#allocation33_spill] sm:$0xff] %v10075_v36  ;;  %v13423_v35 = vand.u32 4294901760, %v10075_v36 }
 0x138   :  { %13802 = vst [vmem:[#allocation32_spill] sm:$0xff] %v10070_v15  ;;  %v13424_v39 = vand.u32 4294901760, %v10070_v15  ;;  %v10094_v46 = vsub.f32 %v10048_v10, %v13429_v33  ;;  %v13829_v10 = vrot.slane %v10179_v18, %v9852_v27 }
 0x139   :  { %373 = vrot.lane.b32.xlu1 %v9972_v40, %s9587_s20  ;;  %v10124_v17 = vsub.f32 %v10075_v36, %v13423_v35 }
 0x13a   :  { %467 = vrot.lane.b32.xlu0 %v327_v55, %s9594_s30  ;;  %13804 = vst [vmem:[#allocation34_spill] sm:$0xff] %v10094_v46  ;;  %v10119_v59 = vsub.f32 %v10070_v15, %v13424_v39  ;;  %v13430_v24 = vand.u32 4294901760, %v10094_v46 }
 0x13c   :  { %v10168_v35 = vsub.f32 %v10094_v46, %v13430_v24  ;;  %v484_v24 = vrot.slane %v10148_v60, %v9854_v28 }
 0x13d   :  { %375 = vrot.lane.b32.xlu1 %v325_v29, %s9587_s20 }
 0x13e   :  { %540 = vrot.lane.b32.xlu0 %v326_v26, %s9595_s4  ;;  %13808 = vst [vmem:[#allocation38_spill] sm:$0xff] %v10168_v35 }
 0x141   :  { %334 = vrot.lane.b32.xlu1 %v327_v55, %s9592_s27 }
 0x142   :  { %582 = vrot.lane.b32.xlu0 %v325_v29, %s9596_s28 }
 0x145   :  { %379 = vrot.lane.b32.xlu1 %v327_v55, %s9587_s20 }
 0x146   :  { %626 = vrot.lane.b32.xlu0 %v325_v29, %s9597_s9 }
 0x149   :  { %417 = vrot.lane.b32.xlu1 %v9972_v40, %s9593_s29 }
 0x14a   :  { %580 = vrot.lane.b32.xlu0 %v9972_v40, %s9596_s28 }
 0x14d   :  { %461 = vrot.lane.b32.xlu1 %v9972_v40, %s9594_s30 }
 0x14e   :  { %670 = vrot.lane.b32.xlu0 %v325_v29, %s9598_s10 }
 0x151   :  { %423 = vrot.lane.b32.xlu1 %v327_v55, %s9593_s29 }
 0x152   :  { %668 = vrot.lane.b32.xlu0 %v9972_v40, %s9598_s10 }
 0x155   :  { %538 = vrot.lane.b32.xlu1 %v325_v29, %s9595_s4  ;;  %v10113_v29 = vld [vmem:[%s13414_s2 + $0x6] ss:$8 sm:$0xf] }
 0x156   :  { %377 = vrot.lane.b32.xlu0 %v326_v26, %s9587_s20 }
 0x159   :  { %536 = vrot.lane.b32.xlu1 %v9972_v40, %s9595_s4 }
 0x15a   :  { %465 = vrot.lane.b32.xlu0 %v326_v26, %s9594_s30 }
 0x15d   :  { %584 = vrot.lane.b32.xlu1 %v326_v26, %s9596_s28 }
 0x15e   :  { %586 = vrot.lane.b32.xlu0 %v327_v55, %s9596_s28 }
 0x161   :  { %628 = vrot.lane.b32.xlu1 %v326_v26, %s9597_s9 }
 0x162   :  { %674 = vrot.lane.b32.xlu0 %v327_v55, %s9598_s10 }
 0x165   :  { %624 = vrot.lane.b32.xlu1 %v9972_v40, %s9597_s9 }
 0x166   :  { %840 = vperm.xlu0 %9364, %v10014_v5  }
 0x169   :  { %672 = vrot.lane.b32.xlu1 %v326_v26, %s9598_s10 }
 0x16a   :  { %9369 = vset.pattern.permute.xlu0 %v13427_v1  ;;  %v440_v1 = vrot.slane %v10135_v61, %v9854_v28 }
 0x16d   :  { %332 = vrot.lane.b32.xlu1 %v326_v26, %s9592_s27 }
 0x171   :  { %421 = vrot.lane.b32.xlu1 %v326_v26, %s9593_s29 }
 0x175   :  { %542 = vrot.lane.b32.xlu1 %v327_v55, %s9595_s4 }
 0x179   :  { %630 = vrot.lane.b32.xlu1 %v327_v55, %s9597_s9 }
 0x17d   :  { %835 = vperm.xlu1 %9363, %v9733_v14   ;;  %v10043_v14 = vand.u32 127, %v122_v6  ;;  %v10060_v6 = vmul.f32 %v519_v62, %v326_v26  ;;  %v1421_v62 = vld [vmem:[#allocation6 + $0x8] sm:$0xff] }
 0x17f   :  { %13799 = vst [vmem:[#allocation29_spill] sm:$0xff] %v10043_v14  ;;  %vm338_vm9 = vcmp.lt.s32.totalorder %v10043_v14, 17  ;;  %13801 = vst [vmem:[#allocation31_spill] sm:$0xff] %v10060_v6  ;;  %vm381_vm10 = vcmp.lt.s32.totalorder %v10043_v14, 16  ;;  %v13428_v41 = vand.u32 4294901760, %v10060_v6  ;;  %vm588_vm12 = vcmp.lt.s32.totalorder %v10043_v14, 113 }
 0x180   :  { %vm425_vm13 = vcmp.lt.s32.totalorder %v10043_v14, 15  ;;  %vm469_vm14 = vcmp.lt.s32.totalorder %v10043_v14, 1  ;;  %vm676_vm15 = vcmp.lt.s32.totalorder %v10043_v14, 111  ;;  %vm544_vm0 = vcmp.lt.s32.totalorder %v10043_v14, 127 }
 0x181   :  { %9365 = vset.pattern.permute.xlu1 %v13425_v0  ;;  %v10108_v42 = vsub.f32 %v10060_v6, %v13428_v41  ;;  %v1479_v41 = vsel %vm1474_vm11, %v1421_v62, 0  ;;  %vm632_vm1 = vcmp.lt.s32.totalorder %v10043_v14, 112 }
 0x182   :  { %v10206_v19 = vand.u32 4294901760, %v1479_v41 }
 0x183   :  { %13805 = vst [vmem:[#allocation35_spill] sm:$0xff] %v10108_v42 }
 0x184   :  { %13810 = vst [vmem:[#allocation40_spill] sm:$0xff] %v10206_v19  ;;  %v10249_v49 = vsub.f32 %v1479_v41, %v10206_v19 }
 0x186   :  { %13814 = vst [vmem:[#allocation44_spill] sm:$0xff] %v10249_v49 }
 0x1a3   :  { %v329_v8 = vpop.permute.xlu1 %328 }
 0x1a4   :  { %v10040_v45 = vpop.permute.xlu0 %419 }
 0x1a7   :  { %v10050_v12 = vpop.permute.xlu1 %330 }
 0x1a8   :  { %v10052_v43 = vpop.permute.xlu0 %463  ;;  %v341_v25 = vsel %vm338_vm9, %v329_v8, %v10050_v12 }
 0x1a9   :  { %v10096_v2 = vmul.f32 %v352_v16, %v341_v25  ;;  %v599_v25 = vrot.slane %v10113_v29, %v9852_v27 }
 0x1ab   :  { %v374_v9 = vpop.permute.xlu1 %373  ;;  %v1481_v54 = vand.u32 4294901760, %v10096_v2 }
 0x1ac   :  { %v10083_v20 = vpop.permute.xlu0 %467 }
 0x1ad   :  { %v10242_v30 = vsub.f32 %v10096_v2, %v1481_v54 }
 0x1af   :  { %v10098_v4 = vpop.permute.xlu1 %375  ;;  %13813 = vst [vmem:[#allocation43_spill] sm:$0xff] %v10242_v30 }
 0x1b0   :  { %v10100_v22 = vpop.permute.xlu0 %540  ;;  %v384_v40 = vsel %vm381_vm10, %v374_v9, %v10098_v4 }
 0x1b1   :  { %v410_v11 = vmul.f32 %v396_v38, %v384_v40  ;;  %v10159_v38 = vand.u32 4294901760, %v1476_v52  ;;  %v436_v40 = vrot.slane %v10135_v61, %v9852_v27 }
 0x1b3   :  { %v10129_v55 = vpop.permute.xlu1 %334  ;;  %v1485_v26 = vand.u32 4294901760, %v410_v11  ;;  %13807 = vst [vmem:[#allocation37_spill] sm:$0xff] %v10159_v38  ;;  %v10198_v58 = vsub.f32 %v1476_v52, %v10159_v38 }
 0x1b4   :  { %v10137_v21 = vpop.permute.xlu0 %582  ;;  %v342_v37 = vsel %vm338_vm9, %v10129_v55, %v329_v8  ;;  %v10157_v8 = vld [vmem:[%s13414_s2 + $0x20] ss:$8 sm:$0xf] }
 0x1b5   :  { %v10150_v16 = vpack.c.bf16 %v1485_v26, %v1481_v54  ;;  %v365_v39 = vmul.f32 %v348_v7, %v342_v37  ;;  %v480_v37 = vrot.slane %v10148_v60, %v9852_v27  ;;  %13809 = vst [vmem:[#allocation39_spill] sm:$0xff] %v10198_v58  ;;  %v10217_v63 = vsub.f32 %v410_v11, %v1485_v26 }
 0x1b6   :  { %v10239_v26 = vand.u32 4294901760, %v10198_v58 }
 0x1b7   :  { %13806 = vst [vmem:[#allocation36_spill] sm:$0xff] %v10150_v16  ;;  %8467 = vmatprep.subr.bf16.mxu1 %v10150_v16  ;;  %v10171_v0 = vpop.permute.xlu1 %379  ;;  %v13817_v47 = vand.u32 4294901760, %v10217_v63 }
 0x1b8   :  { %v10182_v33 = vpop.permute.xlu0 %626  ;;  %v385_v7 = vsel %vm381_vm10, %v10171_v0, %v374_v9  ;;  %v10215_v9 = vld [vmem:[%s13414_s2 + $0x7] ss:$8 sm:$0xf]  ;;  %13812 = vst [vmem:[#allocation42_spill] sm:$0xff] %v10239_v26 }
 0x1b9   :  { %v409_v57 = vmul.f32 %v392_v34, %v385_v7  ;;  %v1483_v7 = vand.u32 4294901760, %v365_v39 }
 0x1bb   :  { %v418_v34 = vpop.permute.xlu1 %417  ;;  %v1487_v48 = vand.u32 4294901760, %v409_v57 }
 0x1bc   :  { %v10219_v51 = vpop.permute.xlu0 %580  ;;  %v428_v53 = vsel %vm425_vm13, %v418_v34, %v10040_v45 }
 0x1bd   :  { %v591_v52 = vsel %vm588_vm12, %v10219_v51, %v10137_v21  ;;  %v10232_v50 = vpack.c.bf16 %v1487_v48, %v1483_v7  ;;  %v454_v44 = vmul.f32 %v440_v1, %v428_v53  ;;  %v10275_v54 = vsub.f32 %v409_v57, %v1487_v48 }
 0x1be   :  { %v10258_v62 = vmul.f32 %v599_v25, %v591_v52  ;;  %v1567_v52 = vsub.f32 %v10198_v58, %v10239_v26 }
 0x1bf   :  { %13811 = vst [vmem:[#allocation41_spill] sm:$0xff] %v10232_v50  ;;  %8469 = vmatpush1.bf16.msra.mxu1 %v10232_v50  ;;  %v462_v5 = vpop.permute.xlu1 %461  ;;  %v13464_v50 = vand.u32 4294901760, %v10242_v30  ;;  %v1489_v41 = vand.u32 4294901760, %v454_v44  ;;  %v13824_v15 = vand.u32 4294901760, %v10275_v54 }
 0x1c0   :  { %v10260_v46 = vpop.permute.xlu0 %670  ;;  %v472_v1 = vsel %vm469_vm14, %v462_v5, %v10052_v43  ;;  %v473_v53 = vsel %vm469_vm14, %v10083_v20, %v462_v5  ;;  %v10281_v5 = vand.u32 4294901760, %v10249_v49 }
 0x1c1   :  { %v498_v11 = vmul.f32 %v484_v24, %v472_v1  ;;  %v10283_v24 = vsub.f32 %v365_v39, %v1483_v7  ;;  %v497_v1 = vmul.f32 %v480_v37, %v473_v53  ;;  %v1601_v39 = vsub.f32 %v10217_v63, %v13817_v47 }
 0x1c2   :  { %13815 = vst [vmem:[#allocation45_spill] sm:$0xff] %v10281_v5  ;;  %v10300_v53 = vand.u32 4294901760, %v1567_v52  ;;  %v1589_v58 = vsub.f32 %v10242_v30, %v13464_v50  ;;  %v1578_v47 = vsub.f32 %v10249_v49, %v10281_v5  ;;  %v13819_v50 = vand.u32 4294901760, %v10258_v62 }
 0x1c3   :  { %13816 = vst [vmem:[#allocation46_spill] sm:$0xff] %v10283_v24  ;;  %v10285_v2 = vpop.permute.xlu1 %423  ;;  %v1493_v25 = vand.u32 4294901760, %v498_v11  ;;  %v10331_v36 = vsub.f32 %v454_v44, %v1489_v41  ;;  %v1607_v38 = vsub.f32 %v10275_v54, %v13824_v15  ;;  %v13826_v44 = vrot.slane %v10157_v8, %v9852_v27 }
 0x1c4   :  { %v10288_v26 = vpop.permute.xlu0 %668  ;;  %v429_v57 = vsel %vm425_vm13, %v10285_v2, %v418_v34  ;;  %v10319_v34 = vsub.f32 %v10258_v62, %v13819_v50  ;;  %v13822_v50 = vrot.slane %v10179_v18, %v9854_v28  ;;  %v1590_v42 = vand.u32 4294901760, %v1589_v58 }
 0x1c5   :  { %v453_v37 = vmul.f32 %v436_v40, %v429_v57  ;;  %v10298_v7 = vpack.c.bf16 %v1493_v25, %v1489_v41  ;;  %v1495_v57 = vand.u32 4294901760, %v497_v1  ;;  %v679_v48 = vsel %vm676_vm15, %v10288_v26, %v10260_v46  ;;  %13821 = vst [vmem:[#allocation49_spill] sm:$0xff] %v10331_v36 }
 0x1c6   :  { %13820 = vst [vmem:[#allocation48_spill] sm:$0xff] %v10319_v34  ;;  %v10344_v6 = vand.u32 4294901760, %v1578_v47  ;;  %v13828_v15 = vand.u32 4294901760, %v10283_v24  ;;  %v13830_v47 = vand.u32 4294901760, %v10034_v56 }
 0x1c7   :  { %13818 = vst [vmem:[#allocation47_spill] sm:$0xff] %v10298_v7  ;;  %8471 = vmatprep.subr.bf16.mxu1 %v10298_v7  ;;  %v539_v40 = vpop.permute.xlu1 %538  ;;  %v1491_v52 = vand.u32 4294901760, %v453_v37  ;;  %v1602_v7 = vand.u32 4294901760, %v1601_v39 }
 0x1c8   :  { %v378_v5 = vpop.permute.xlu0 %377  ;;  %v546_v49 = vsel %vm544_vm0, %v539_v40, %v10100_v22  ;;  %13825 = vst [vmem:[#allocation51_spill] sm:$0xff] %v10344_v6  ;;  %v1595_v39 = vsub.f32 %v10283_v24, %v13828_v15 }
 0x1c9   :  { %v383_v16 = vsel %vm381_vm10, %v10098_v4, %v378_v5  ;;  %v573_v35 = vmul.f32 %v13822_v50, %v546_v49  ;;  %v10336_v19 = vpack.c.bf16 %v1495_v57, %v1491_v52  ;;  %v704_v4 = vmul.f32 %v13826_v44, %v679_v48 }
 0x1ca   :  { %v13827_v49 = vrot.slane %v10065_v23, %v9856_v31  ;;  %v10364_v44 = vpack.c.bf16 %v1602_v7, %v1590_v42  ;;  %v10379_v42 = vsub.f32 %v498_v11, %v1493_v25  ;;  %v10381_v7 = vsub.f32 %v497_v1, %v1495_v57 }
 0x1cb   :  { %13823 = vst [vmem:[#allocation50_spill] sm:$0xff] %v10336_v19  ;;  %8473 = vmatpush1.bf16.msra.mxu1 %v10336_v19  ;;  %v10355_v58 = vpop.permute.xlu1 %536  ;;  %v1501_v50 = vand.u32 4294901760, %v573_v35  ;;  %v10408_v30 = vsub.f32 %v453_v37, %v1491_v52  ;;  %v13842_v52 = vrot.slane %v10148_v60, %v9858_v32 }
 0x1cc   :  { %v10352_v41 = vmul.f32 %v13827_v49, %v383_v16  ;;  %v547_v48 = vsel %vm544_vm0, %v10355_v58, %v539_v40  ;;  %v382_v49 = vsel %vm381_vm10, %v378_v5, %v10171_v0  ;;  %v466_v19 = vpop.permute.xlu0 %465  ;;  %v13486_v40 = vand.u32 4294901760, %v10331_v36  ;;  %13832 = vst [vmem:[#allocation53_spill] sm:$0xff] %v10379_v42  ;;  %13833 = vst [vmem:[#allocation54_spill] sm:$0xff] %v10381_v7 }
 0x1cd   :  { %v572_v15 = vmul.f32 %v13829_v10, %v547_v48  ;;  %v10376_v6 = vpack.c.bf16 %v1501_v50, %v13830_v47  ;;  %v1608_v16 = vand.u32 4294901760, %v1607_v38  ;;  %v10385_v0 = vand.u32 4294901760, %v704_v4  ;;  %13836 = vst [vmem:[#allocation55_spill] sm:$0xff] %v10408_v30 }
 0x1ce   :  { %v1596_v47 = vand.u32 4294901760, %v1595_v39  ;;  %v13834_v48 = vand.u32 4294901760, %v10319_v34  ;;  %v13835_v38 = vrot.slane %v10065_v23, %v9858_v32  ;;  %v470_v1 = vsel %vm469_vm14, %v466_v19, %v10083_v20 }
 0x1cf   :  { %13831 = vst [vmem:[#allocation52_spill] sm:$0xff] %v10376_v6  ;;  %8475 = vmatprep.subr.bf16.mxu1 %v10376_v6  ;;  %v585_v10 = vpop.permute.xlu1 %584  ;;  %v1503_v56 = vand.u32 4294901760, %v572_v15  ;;  %v471_v39 = vsel %vm469_vm14, %v10052_v43, %v466_v19  ;;  %v10417_v23 = vsub.f32 %v10331_v36, %v13486_v40  ;;  %v13839_v20 = vrot.slane %v10113_v29, %v9854_v28 }
 0x1d0   :  { %v10392_v11 = vsub.f32 %v10319_v34, %v13834_v48  ;;  %v10397_v25 = vmul.f32 %v13835_v38, %v382_v49  ;;  %v590_v57 = vsel %vm588_vm12, %v10137_v21, %v585_v10  ;;  %v13837_v48 = vand.u32 4294901760, %v10037_v3 }
 0x1d1   :  { %v617_v49 = vmul.f32 %v13839_v20, %v590_v57  ;;  %v10422_v21 = vpack.c.bf16 %v1608_v16, %v1596_v47  ;;  %v10427_v43 = vsub.f32 %v704_v4, %v10385_v0  ;;  %v13840_v3 = vand.u32 4294901760, %v10352_v41  ;;  %v587_v57 = vpop.permute.xlu0 %586 }
 0x1d2   :  { %v10412_v5 = vpack.c.bf16 %v1503_v56, %v13837_v48  ;;  %v10437_v48 = vmul.f32 %v13842_v52, %v470_v1  ;;  %v13843_v20 = vrot.slane %v10148_v60, %v9856_v31  ;;  %v10455_v40 = vsub.f32 %v573_v35, %v1501_v50 }
 0x1d3   :  { %v10432_v37 = vsub.f32 %v10352_v41, %v13840_v3  ;;  %v10439_v16 = vpop.permute.xlu1 %628  ;;  %v13844_v19 = vrot.slane %v10215_v9, %v9854_v28  ;;  %v1614_v4 = vand.u32 4294901760, %v10417_v23  ;;  %v10462_v60 = vsub.f32 %v572_v15, %v1503_v56 }
 0x1d4   :  { %13838 = vst [vmem:[#allocation56_spill] sm:$0xff] %v10412_v5  ;;  %8477 = vmatpush1.bf16.msra.mxu1 %v10412_v5  ;;  %v10448_v3 = vmul.f32 %v13843_v20, %v471_v39  ;;  %v634_v1 = vsel %vm632_vm1, %v10182_v33, %v10439_v16  ;;  %v1505_v39 = vand.u32 4294901760, %v617_v49  ;;  %v13845_v20 = vand.u32 4294901760, %v10379_v42 }
 0x1d5   :  { %13841 = vst [vmem:[#allocation57_spill] sm:$0xff] %v10432_v37  ;;  %v661_v47 = vmul.f32 %v13844_v19, %v634_v1  ;;  %v13846_v6 = vand.u32 4294901760, %v10381_v7  ;;  %v13847_v15 = vand.u32 4294901760, %v10397_v25  ;;  %v10488_v19 = vpop.f32.mrb[0].mxu0  ;;  %v675_v52 = vpop.permute.xlu0 %674  ;;  %v13849_v38 = vrot.slane %v10215_v9, %v9852_v27 }
 0x1d6   :  { %v1625_v5 = vsub.f32 %v10379_v42, %v13845_v20  ;;  %13848 = vst [vmem:[#allocation58_spill] sm:$0xff] %v10488_v19  ;;  %v13851_v20 = vand.u32 4294901760, %v10408_v30  ;;  %v10499_v36 = vpop.f32.mrb[1].mxu0  ;;  %v10501_v42 = vsub.f32 %v617_v49, %v1505_v39  ;;  %v13855_v27 = vand.u32 4294901760, %v10432_v37 }
 0x1d7   :  { %v1631_v35 = vsub.f32 %v10381_v7, %v13846_v6  ;;  %v10473_v23 = vpop.permute.xlu1 %624  ;;  %v1509_v1 = vand.u32 4294901760, %v661_v47  ;;  %v10478_v56 = vsub.f32 %v10397_v25, %v13847_v15  ;;  %v592_v6 = vsel %vm588_vm12, %v587_v57, %v10219_v51  ;;  %13852 = vst [vmem:[#allocation60_spill] sm:$0xff] %v10499_v36 }
 0x1d8   :  { %v635_v50 = vsel %vm632_vm1, %v10473_v23, %v10182_v33  ;;  %v1619_v7 = vsub.f32 %v10408_v30, %v13851_v20  ;;  %13853 = vst [vmem:[#allocation61_spill] sm:$0xff] %v10501_v42  ;;  %v1626_v19 = vand.u32 4294901760, %v1625_v5  ;;  %v589_v51 = vsel %vm588_vm12, %v585_v10, %v587_v57 }
 0x1d9   :  { %v660_v34 = vmul.f32 %v13849_v38, %v635_v50  ;;  %v10493_v15 = vpack.c.bf16 %v1509_v1, %v1505_v39  ;;  %v10503_v33 = vsub.f32 %v661_v47, %v1509_v1  ;;  %v10509_v38 = vsub.f32 %v10432_v37, %v13855_v27 }
 0x1da   :  { %v13856_v50 = vand.u32 4294901760, %v10437_v48  ;;  %v13857_v5 = vand.u32 4294901760, %v10448_v3  ;;  %v13858_v27 = vrot.slane %v10113_v29, %v9858_v32  ;;  %v13859_v57 = vrot.slane %v10157_v8, %v9854_v28 }
 0x1db   :  { %13850 = vst [vmem:[#allocation59_spill] sm:$0xff] %v10493_v15  ;;  %13854 = vst [vmem:[#allocation62_spill] sm:$0xff] %v10503_v33  ;;  %v673_v49 = vpop.permute.xlu1 %672  ;;  %8479 = vmatprep.subr.bf16.mxu1 %v10493_v15  ;;  %v1511_v47 = vand.u32 4294901760, %v660_v34  ;;  %v1620_v37 = vand.u32 4294901760, %v1619_v7  ;;  %v13511_v28 = vand.u32 4294901760, %v10503_v33 }
 0x1dc   :  { %v10514_v20 = vsub.f32 %v10437_v48, %v13856_v50  ;;  %v10522_v39 = vsub.f32 %v10448_v3, %v13857_v5  ;;  %v10527_v1 = vmul.f32 %v13858_v27, %v592_v6  ;;  %v680_v50 = vsel %vm676_vm15, %v675_v52, %v10288_v26 }
 0x1dd   :  { %v678_v10 = vsel %vm676_vm15, %v10260_v46, %v673_v49  ;;  %v13860_v5 = vand.u32 4294901760, %v10258_v62  ;;  %v13861_v6 = vand.u32 4294901760, %v10455_v40  ;;  %v10545_v36 = vsub.f32 %v660_v34, %v1511_v47 }
 0x1de   :  { %v705_v24 = vmul.f32 %v13859_v57, %v678_v10  ;;  %v13862_v26 = vand.u32 4294901760, %v10462_v60  ;;  %v13512_v46 = vand.u32 4294901760, %v10501_v42  ;;  %v13863_v62 = vrot.slane %v10113_v29, %v9856_v31 }
 0x1df   :  { %v10540_v15 = vpack.c.bf16 %v1511_v47, %v13860_v5  ;;  %v1649_v27 = vsub.f32 %v10455_v40, %v13861_v6  ;;  %v333_v57 = vpop.permute.xlu1 %332  ;;  %v8486_v34 = vpack.c.bf16 %v1626_v19, %v1614_v4  ;;  %v1632_v47 = vand.u32 4294901760, %v1631_v35 }
 0x1e0   :  { %v1655_v30 = vsub.f32 %v10462_v60, %v13862_v26  ;;  %v10555_v10 = vmul.f32 %v13863_v62, %v589_v51  ;;  %v10557_v7 = vand.u32 4294901760, %v705_v24  ;;  %v13864_v6 = vrot.slane %v10157_v8, %v9858_v32 }
 0x1e1   :  { %8481 = vmatpush1.bf16.msra.mxu1 %v10540_v15  ;;  %v339_v29 = vsel %vm338_vm9, %v333_v57, %v10129_v55  ;;  %v340_v51 = vsel %vm338_vm9, %v10050_v12, %v333_v57  ;;  %v13865_v62 = vrot.slane %v10057_v13, %v9856_v31  ;;  %v13866_v35 = vrot.slane %v10057_v13, %v9858_v32 }
 0x1e2   :  { %v10564_v26 = vmul.f32 %v13864_v6, %v680_v50  ;;  %1514 = vmatprep.subr.mxu1 %v10557_v7  ;;  %v8488_v50 = vpack.c.bf16 %v1632_v47, %v1620_v37  ;;  %v1650_v6 = vand.u32 4294901760, %v1649_v27  ;;  %v1656_v5 = vand.u32 4294901760, %v1655_v30 }
 0x1e3   :  { %v367_v4 = vmul.f32 %v13865_v62, %v340_v51  ;;  %v368_v19 = vmul.f32 %v13866_v35, %v339_v29  ;;  %v1661_v55 = vsub.f32 %v10501_v42, %v13512_v46  ;;  %v1673_v12 = vsub.f32 %v10503_v33, %v13511_v28  ;;  %v422_v29 = vpop.permute.xlu1 %421 }
 0x1e4   :  { %v10588_v51 = vsel %vm676_vm15, %v673_v49, %v675_v52  ;;  %v13867_v30 = vand.u32 4294901760, %v10427_v43  ;;  %v10598_v62 = vsub.f32 %v705_v24, %v10557_v7  ;;  %v426_v52 = vsel %vm425_vm13, %v422_v29, %v10285_v2 }
 0x1e5   :  { %v2205_v13 = vand.u32 4294901760, %v367_v4  ;;  %1516 = vmatpush1.msra.mxu1 %v10385_v0  ;;  %v2203_v37 = vand.u32 4294901760, %v368_v19  ;;  %v427_v49 = vsel %vm425_vm13, %v10040_v45, %v422_v29  ;;  %v13868_v35 = vrot.slane %v10135_v61, %v9856_v31 }
 0x1e6   :  { %v10594_v27 = vsub.f32 %v10427_v43, %v13867_v30  ;;  %8483 = vmatprep.subr.bf16.mxu1 %v10364_v44  ;;  %1569 = vmatmul.mubr.f32.vlgmr.msra.gmra.mrb[0].mxu1 %v10300_v53  ;;  %v13869_v24 = vrot.slane %v10135_v61, %v9858_v32  ;;  %v13870_v2 = vand.u32 4294901760, %v10397_v25  ;;  %v13871_v45 = vand.u32 4294901760, %v10119_v59 }
 0x1e7   :  { %v455_v30 = vmul.f32 %v13868_v35, %v427_v49  ;;  %8485 = vmatpush1.bf16.msra.mxu1 %v10422_v21  ;;  %v13872_v44 = vand.u32 4294901760, %v10352_v41  ;;  %v13873_v49 = vand.u32 4294901760, %v10124_v17  ;;  %v1674_v57 = vand.u32 4294901760, %v1673_v12  ;;  %v543_v41 = vpop.permute.xlu1 %542  ;;  %v13876_v12 = vld [vmem:[#allocation51_spill] sm:$0xff] }
 0x1e8   :  { %v456_v28 = vmul.f32 %v13869_v24, %v426_v52  ;;  %v10617_v46 = vpack.c.bf16 %v13870_v2, %v2203_v37  ;;  %v8490_v29 = vpack.c.bf16 %v1650_v6, %v13871_v45  ;;  %8487 = vmatprep.subr.bf16.mxu1 %v8486_v34  ;;  %v13874_v61 = vand.u32 4294901760, %v10545_v36 }
 0x1e9   :  { %v10623_v47 = vpack.c.bf16 %v13872_v44, %v2205_v13  ;;  %v8492_v35 = vpack.c.bf16 %v1656_v5, %v13873_v49  ;;  %v13875_v52 = vmov 0.0   ;;  %v10631_v25 = vsub.f32 %v367_v4, %v2205_v13 }
 0x1ea   :  { %v1679_v21 = vsub.f32 %v10545_v36, %v13874_v61  ;;  %1574 = vmatprep.mubr.f32.mxu1 %v13875_v52  ;;  %v2213_v24 = vand.u32 4294901760, %v455_v30  ;;  %8563 = vmatprep.subr.bf16.mxu0 %v10617_v46  ;;  %v10634_v59 = vsub.f32 %v368_v19, %v2203_v37  ;;  %v2211_v34 = vand.u32 4294901760, %v456_v28 }
 0x1eb   :  { %v545_v17 = vsel %vm544_vm0, %v10100_v22, %v543_v41  ;;  %v548_v5 = vsel %vm544_vm0, %v543_v41, %v10355_v58  ;;  %8565 = vmatpush1.bf16.msra.mxu0 %v10623_v47  ;;  %v1662_v6 = vand.u32 4294901760, %v1661_v55  ;;  %v13513_v4 = vand.u32 4294901760, %v10598_v62  ;;  %1580 = vmatmul.mubr.f32.gmra.mrb[2].mxu1 %v13876_v12 }
 0x1ec   :  { %v13877_v19 = vrot.slane %v10179_v18, %v9856_v31  ;;  %v13878_v37 = vrot.slane %v10179_v18, %v9858_v32  ;;  %8489 = vmatpush1.bf16.msra.mxu1 %v8488_v50  ;;  %v13879_v22 = vand.u32 4294901760, %v10437_v48  ;;  %v13520_v58 = vand.u32 4294901760, %v10478_v56  ;;  %1740 = vmatprep.mubr.f32.mxu1 %v13875_v52  ;;  %v631_v48 = vpop.permute.xlu1 %630 }
 0x1ed   :  { %8491 = vmatprep.subr.bf16.mxu1 %v8490_v29  ;;  %v10656_v55 = vsub.f32 %v456_v28, %v2211_v34  ;;  %v13880_v44 = vand.u32 4294901760, %v10448_v3  ;;  %v8494_v61 = vpack.c.bf16 %v1674_v57, %v1662_v6  ;;  %v1680_v41 = vand.u32 4294901760, %v1679_v21 }
 0x1ee   :  { %v574_v13 = vmul.f32 %v13877_v19, %v545_v17  ;;  %v575_v2 = vmul.f32 %v13878_v37, %v548_v5  ;;  %v10653_v45 = vpack.c.bf16 %v13879_v22, %v2211_v34  ;;  %v13515_v18 = vand.u32 4294901760, %v10631_v25  ;;  %v13887_v37 = vld [vmem:[#allocation31_spill] sm:$0xff] }
 0x1ef   :  { %v10660_v49 = vpack.c.bf16 %v13880_v44, %v2213_v24  ;;  %v13521_v5 = vand.u32 4294901760, %v10634_v59  ;;  %v10666_v29 = vsub.f32 %v455_v30, %v2213_v24  ;;  %v633_v28 = vsel %vm632_vm1, %v10439_v16, %v631_v48  ;;  %v13884_v16 = vld [vmem:[#allocation30_spill] sm:$0xff] }
 0x1f0   :  { %v2225_v50 = vand.u32 4294901760, %v574_v13  ;;  %8567 = vmatprep.subr.bf16.mxu0 %v10653_v45  ;;  %v2223_v17 = vand.u32 4294901760, %v575_v2  ;;  %v636_v3 = vsel %vm632_vm1, %v631_v48, %v10473_v23  ;;  %v1685_v57 = vsub.f32 %v10598_v62, %v13513_v4  ;;  %8493 = vmatpush1.bf16.msra.mxu1 %v8492_v35 }
 0x1f1   :  { %13881 = vst [vmem:[#allocation51_spill] sm:$0xff] %v10660_v49  ;;  %8569 = vmatpush1.bf16.msra.mxu0 %v10660_v49  ;;  %v13882_v21 = vrot.slane %v10215_v9, %v9856_v31  ;;  %v13883_v30 = vrot.slane %v10215_v9, %v9858_v32  ;;  %v13885_v6 = vand.u32 4294901760, %v13884_v16  ;;  %v13514_v23 = vand.u32 4294901760, %v10656_v55  ;;  %8495 = vmatprep.subr.bf16.mxu1 %v8494_v61 }
 0x1f2   :  { %v13888_v22 = vand.u32 4294901760, %v13887_v37  ;;  %v13890_v48 = vand.u32 4294901760, %v10392_v11  ;;  %v2323_v9 = vsub.f32 %v10478_v56, %v13520_v58  ;;  %v13518_v35 = vand.u32 4294901760, %v10514_v20 }
 0x1f3   :  { %v662_v34 = vmul.f32 %v13882_v21, %v633_v28  ;;  %v663_v24 = vmul.f32 %v13883_v30, %v636_v3  ;;  %v10686_v19 = vpack.c.bf16 %v2223_v17, %v13885_v6  ;;  %v10700_v3 = vsub.f32 %v575_v2, %v2223_v17 }
 0x1f4   :  { %v10691_v44 = vpack.c.bf16 %v2225_v50, %v13888_v22  ;;  %v8496_v4 = vpack.c.bf16 %v1680_v41, %v13890_v48  ;;  %v2311_v61 = vsub.f32 %v10634_v59, %v13521_v5  ;;  %v13516_v30 = vand.u32 4294901760, %v10666_v29 }
 0x1f5   :  { %13886 = vst [vmem:[#allocation30_spill] sm:$0xff] %v10686_v19  ;;  %v2233_v28 = vand.u32 4294901760, %v662_v34  ;;  %8571 = vmatprep.subr.bf16.mxu0 %v10686_v19  ;;  %v2231_v21 = vand.u32 4294901760, %v663_v24  ;;  %v10706_v11 = vsub.f32 %v574_v13, %v2225_v50  ;;  %v1686_v41 = vand.u32 4294901760, %v1685_v57 }
 0x1f6   :  { %13889 = vst [vmem:[#allocation31_spill] sm:$0xff] %v10691_v44  ;;  %8573 = vmatpush1.bf16.msra.mxu0 %v10691_v44  ;;  %v2317_v16 = vsub.f32 %v10631_v25, %v13515_v18  ;;  %8497 = vmatpush1.bf16.msra.mxu1 %v8496_v4  ;;  %v13891_v2 = vand.u32 4294901760, %v10527_v1  ;;  %v13893_v37 = vand.u32 4294901760, %v10555_v10  ;;  %v2335_v13 = vsub.f32 %v10656_v55, %v13514_v23 }
 0x1f7   :  { %v10716_v6 = vsub.f32 %v663_v24, %v2231_v21  ;;  %v13519_v50 = vand.u32 4294901760, %v10522_v39  ;;  %v10732_v48 = vand.u32 4294901760, %v10564_v26  ;;  %v13897_v24 = vrot.slane %v10157_v8, %v9856_v31  ;;  %1687 = vmatprep.subr.mxu1 %v1686_v41 }
 0x1f8   :  { %v10714_v17 = vpack.c.bf16 %v2231_v21, %v13891_v2  ;;  %v10720_v22 = vpack.c.bf16 %v2233_v28, %v13893_v37  ;;  %v13895_v57 = vmov %v13891_v2  ;;  %v1692_v2 = vand.u32 4294901760, %v10594_v27 }
 0x1f9   :  { %v10729_v4 = vsub.f32 %v10527_v1, %v13895_v57  ;;  %13896 = vst [vmem:[#allocation65_spill] sm:$0xff] %v10732_v48  ;;  %v706_v21 = vmul.f32 %v13897_v24, %v10588_v51  ;;  %v2312_v37 = vand.u32 4294901760, %v2311_v61  ;;  %v2347_v23 = vsub.f32 %v10514_v20, %v13518_v35  ;;  %v13905_v24 = vld [vmem:[#allocation53_spill] sm:$0xff] }
 0x1fa   :  { %13892 = vst [vmem:[#allocation63_spill] sm:$0xff] %v10714_v17  ;;  %13894 = vst [vmem:[#allocation64_spill] sm:$0xff] %v10720_v22  ;;  %8575 = vmatprep.subr.bf16.mxu0 %v10714_v17  ;;  %v13517_v1 = vand.u32 4294901760, %v10700_v3  ;;  %v10745_v18 = vsub.f32 %v662_v34, %v2233_v28  ;;  %v2318_v8 = vand.u32 4294901760, %v2317_v16  ;;  %v2341_v51 = vsub.f32 %v10666_v29, %v13516_v30  ;;  %v13902_v30 = vld [vmem:[#allocation37_spill] sm:$0xff] }
 0x1fb   :  { %8577 = vmatpush1.bf16.msra.mxu0 %v10720_v22  ;;  %1693 = vmatpush1.msra.mxu1 %v1692_v2  ;;  %v2324_v27 = vand.u32 4294901760, %v2323_v9  ;;  %v2336_v61 = vand.u32 4294901760, %v2335_v13  ;;  %v2353_v34 = vsub.f32 %v10522_v39, %v13519_v50  ;;  %v13898_v28 = vand.u32 4294901760, %v10555_v10  ;;  %v13900_v9 = vld [vmem:[#allocation43_spill] sm:$0xff]  ;;  %v13903_v50 = vld [vmem:[#allocation46_spill] sm:$0xff]  ;;  %v13906_v57 = vld [vmem:[#allocation49_spill] sm:$0xff] }
 0x1fc   :  { %2236 = vmatprep.subr.mxu0 %v10732_v48  ;;  %v2371_v41 = vsub.f32 %v10700_v3, %v13517_v1  ;;  %v10764_v2 = vand.u32 4294901760, %v706_v21  ;;  %v13901_v13 = vpack.c.bf16 %v10217_v63, %v13900_v9  ;;  %1742 = vmatmul.mubr.f32.vlgmr.msra.gmra.mrb[0].mxu1 %v13902_v30  ;;  %v2330_v1 = vand.u32 4294901760, %v10509_v38  ;;  %v13915_v22 = vld [vmem:[#allocation40_spill] sm:$0xff] }
 0x1fd   :  { %v10762_v16 = vsub.f32 %v10555_v10, %v13898_v28  ;;  %v10773_v35 = vsub.f32 %v10564_v26, %v10732_v48  ;;  %v13904_v58 = vpack.c.bf16 %v10275_v54, %v13903_v50  ;;  %v8578_v10 = vpack.c.bf16 %v2324_v27, %v2312_v37  ;;  %1747 = vmatprep.mubr.f32.mxu1 %v13875_v52  ;;  %v13910_v37 = vld [vmem:[#allocation54_spill] sm:$0xff] }
 0x1fe   :  { %13899 = vst [vmem:[#allocation66_spill] sm:$0xff] %v10764_v2  ;;  %8499 = vmatprep.subr.bf16.mxu1 %v13901_v13  ;;  %v2348_v28 = vand.u32 4294901760, %v2347_v23  ;;  %v13907_v14 = vpack.c.bf16 %v13905_v24, %v13906_v57  ;;  %v8580_v38 = vpack.c.bf16 %v2330_v1, %v2318_v8  ;;  %v2342_v26 = vand.u32 4294901760, %v2341_v51  ;;  %v13909_v23 = vld [vmem:[#allocation55_spill] sm:$0xff]  ;;  %v13912_v1 = vld [vmem:[#allocation32_spill] sm:$0xff] }
 0x1ff   :  { %8501 = vmatpush1.bf16.msra.mxu1 %v13904_v58  ;;  %2238 = vmatpush1.msra.mxu0 %v10764_v2  ;;  %v13908_v31 = vand.u32 4294901760, %v10706_v11  ;;  %v8504_v27 = vpack.c.bf16 %v13910_v37, %v13909_v23  ;;  %v2372_v13 = vand.u32 4294901760, %v2371_v41  ;;  %v13911_v32 = vand.u32 4294901760, %v10716_v6 }
 0x200   :  { %8503 = vmatprep.subr.bf16.mxu1 %v13907_v14  ;;  %8579 = vmatprep.subr.bf16.mxu0 %v8578_v10  ;;  %v8582_v5 = vpack.c.bf16 %v2348_v28, %v2336_v61  ;;  %v8506_v8 = vpack.c.bf16 %v10455_v40, %v13912_v1  ;;  %v2354_v51 = vand.u32 4294901760, %v2353_v34  ;;  %v13916_v61 = vld [vmem:[#allocation38_spill] sm:$0xff]  ;;  %v13917_v28 = vand.u32 4294901760, %v10729_v4 }
 0x201   :  { %v2377_v58 = vsub.f32 %v10706_v11, %v13908_v31  ;;  %2291 = vmatmul.mubr.f32.vlgmr.msra.gmra.mrb[2].mxu0 %v10300_v53  ;;  %v2395_v14 = vsub.f32 %v10716_v6, %v13911_v32  ;;  %v13913_v31 = vld [vmem:[#allocation35_spill] sm:$0xff]  ;;  %1749 = vmatmul.mubr.f32.gmra.mrb[2].mxu1 %v13915_v22  ;;  %v2360_v41 = vand.u32 4294901760, %v13916_v61  ;;  %v13918_v17 = vand.u32 4294901760, %v10745_v18 }
 0x202   :  { %8581 = vmatpush1.bf16.msra.mxu0 %v8580_v38  ;;  %v13914_v10 = vand.u32 4294901760, %v13913_v31  ;;  %v2383_v32 = vsub.f32 %v10729_v4, %v13917_v28  ;;  %v10806_v38 = vsub.f32 %v706_v21, %v10764_v2  ;;  %v8584_v48 = vpack.c.bf16 %v2354_v51, %v2342_v26  ;;  %2296 = vmatprep.mubr.f32.mxu0 %v13875_v52  ;;  %v13922_v2 = vld [vmem:[#allocation58_spill] sm:$0xff] }
 0x203   :  { %8505 = vmatpush1.bf16.msra.mxu1 %v8504_v27  ;;  %8583 = vmatprep.subr.bf16.mxu0 %v8582_v5  ;;  %v2378_v34 = vand.u32 4294901760, %v2377_v58  ;;  %v13919_v27 = vld [vmem:[#allocation33_spill] sm:$0xff]  ;;  %v8586_v61 = vpack.c.bf16 %v2372_v13, %v2360_v41  ;;  %v2396_v44 = vand.u32 4294901760, %v2395_v14  ;;  %v13545_v19 = vand.u32 4294901760, %v10773_v35  ;;  %v836_v13 = vpop.permute.xlu1 %835  ;;  %v13921_v41 = vld [vmem:[#allocation48_spill] sm:$0xff] }
 0x204   :  { %v2365_v53 = vsub.f32 %v13913_v31, %v13914_v10  ;;  %8507 = vmatprep.subr.bf16.mxu1 %v8506_v8  ;;  %v2401_v10 = vsub.f32 %v10745_v18, %v13918_v17  ;;  %v8508_v5 = vpack.c.bf16 %v10462_v60, %v13919_v27  ;;  %1855 = vmatprep.mubr.f32.mxu1 %v13875_v52  ;;  %v13920_v17 = vand.u32 4294901760, %v10762_v16  ;;  %v841_v8 = vpop.permute.xlu0 %840 }
 0x205   :  { %2302 = vmatmul.mubr.f32.gmra.mrb[4].mxu0 %v13876_v12  ;;  %v8510_v21 = vpack.c.bf16 %v10503_v33, %v10501_v42  ;;  %v2384_v14 = vand.u32 4294901760, %v2383_v32  ;;  %v8512_v12 = vpack.c.bf16 %v10545_v36, %v13921_v41  ;;  %v13544_v28 = vand.u32 4294901760, %v10806_v38  ;;  %v13923_v42 = vld [vmem:[#allocation60_spill] sm:$0xff] }
 0x206   :  { %8585 = vmatpush1.bf16.msra.mxu0 %v8584_v48  ;;  %v2366_v26 = vand.u32 4294901760, %v2365_v53  ;;  %v2389_v58 = vsub.f32 %v10762_v16, %v13920_v17  ;;  %2462 = vmatprep.mubr.f32.mxu0 %v13875_v52  ;;  %v2402_v48 = vand.u32 4294901760, %v2401_v10  ;;  %v2407_v17 = vsub.f32 %v10773_v35, %v13545_v19 }
 0x207   :  { %8509 = vmatpush1.bf16.msra.mxu1 %v8508_v5  ;;  %8587 = vmatprep.subr.bf16.mxu0 %v8586_v61  ;;  %v8590_v53 = vpack.c.bf16 %v2396_v44, %v2384_v14  ;;  %v9186_v33 = vadd.f32 %v13922_v2, %v841_v8  ;;  %v9187_v49 = vadd.f32 %v13923_v42, %v836_v13  ;;  %v13924_v2 = vld [vmem:[#allocation36_spill] sm:$0xff]  ;;  %v13925_v42 = vld [vmem:[#allocation39_spill] sm:$0xff]  ;;  %v13926_v61 = vld [vmem:[#allocation41_spill] sm:$0xff] }
 0x208   :  { %8511 = vmatprep.subr.bf16.mxu1 %v8510_v21  ;;  %v8588_v51 = vpack.c.bf16 %v2378_v34, %v2366_v26  ;;  %v2390_v5 = vand.u32 4294901760, %v2389_v58  ;;  %v2413_v34 = vsub.f32 %v10806_v38, %v13544_v28  ;;  %v2408_v44 = vand.u32 4294901760, %v2407_v17  ;;  %v13927_v26 = vld [vmem:[#allocation47_spill] sm:$0xff]  ;;  %v13928_v58 = vld [vmem:[#allocation57_spill] sm:$0xff]  ;;  %v13929_v14 = vld [vmem:[#allocation44_spill] sm:$0xff] }
 0x209   :  { %1385 = vperm.xlu1 %9365, %v9186_v33   ;;  %1397 = vperm.xlu0 %9369, %v9187_v49   ;;  %v8594_v21 = vpack.c.bf16 %v10478_v56, %v10634_v59  ;;  %v8596_v8 = vpack.c.bf16 %v13928_v58, %v10631_v25  ;;  %v8598_v13 = vpack.c.bf16 %v10514_v20, %v10656_v55  ;;  %v13942_v28 = vld [vmem:[#allocation42_spill] sm:$0xff] }
 0x20a   :  { %8589 = vmatpush1.bf16.msra.mxu0 %v8588_v51  ;;  %v8592_v32 = vpack.c.bf16 %v2402_v48, %v2390_v5  ;;  %v2414_v10 = vand.u32 4294901760, %v2413_v34  ;;  %v13930_v51 = vld [vmem:[#allocation50_spill] sm:$0xff]  ;;  %v8600_v48 = vpack.c.bf16 %v10522_v39, %v10666_v29  ;;  %v13933_v5 = vld [vmem:[#allocation56_spill] sm:$0xff]  ;;  %v8604_v34 = vpack.c.bf16 %v10706_v11, %v13913_v31 }
 0x20b   :  { %8513 = vmatpush1.bf16.msra.mxu1 %v8512_v12  ;;  %8591 = vmatprep.subr.bf16.mxu0 %v8590_v53  ;;  %v13931_v12 = vld [vmem:[#allocation52_spill] sm:$0xff]  ;;  %v13932_v53 = vld [vmem:[#allocation34_spill] sm:$0xff] }
 0x20c   :  { %1805 = vmatprep.subr.mxu1 %v10598_v62  ;;  %v8602_v17 = vpack.c.bf16 %v10700_v3, %v13932_v53 }
 0x20e   :  { %8593 = vmatpush1.bf16.msra.mxu0 %v8592_v32  ;;  %v13934_v32 = vld [vmem:[#allocation59_spill] sm:$0xff] }
 0x20f   :  { %1808 = vmatpush1.msra.mxu1 %v10427_v43  ;;  %2409 = vmatprep.subr.mxu0 %v2408_v44  ;;  %v13935_v44 = vmov 1  }
 0x210   :  { %8515 = vmatprep.subr.bf16.mxu1 %v13924_v2  ;;  %1858 = vmatmul.mubr.f32.vlgmr.msra.gmra.mrb[0].mxu1 %v13925_v42 }
 0x211   :  { %8517 = vmatpush1.bf16.msra.mxu1 %v13926_v61  ;;  %1863 = vmatprep.mubr.f32.mxu1 %v13875_v52 }
 0x212   :  { %8519 = vmatprep.subr.bf16.mxu1 %v13927_v26  ;;  %2415 = vmatpush1.msra.mxu0 %v2414_v10  ;;  %v8606_v10 = vpack.c.bf16 %v10716_v6, %v10729_v4 }
 0x213   :  { %8595 = vmatprep.subr.bf16.mxu0 %v8594_v21  ;;  %2464 = vmatmul.mubr.f32.vlgmr.msra.gmra.mrb[2].mxu0 %v13902_v30  ;;  %v9601_v21 = vmov 2  }
 0x214   :  { %8597 = vmatpush1.bf16.msra.mxu0 %v8596_v8  ;;  %1866 = vmatmul.mubr.f32.gmra.mrb[2].mxu1 %v13929_v14  ;;  %v13936_v8 = vld [vmem:[#allocation28_spill] sm:$0xff] }
 0x215   :  { %8521 = vmatpush1.bf16.msra.mxu1 %v13930_v51  ;;  %8599 = vmatprep.subr.bf16.mxu0 %v8598_v13  ;;  %v8608_v13 = vpack.c.bf16 %v10745_v18, %v10762_v16 }
 0x216   :  { %8523 = vmatprep.subr.bf16.mxu1 %v13931_v12  ;;  %2469 = vmatprep.mubr.f32.mxu0 %v13875_v52 }
 0x217   :  { %1954 = vmatprep.mubr.f32.mxu1 %v13875_v52  ;;  %2471 = vmatmul.mubr.f32.gmra.mrb[4].mxu0 %v13915_v22 }
 0x218   :  { %8601 = vmatpush1.bf16.msra.mxu0 %v8600_v48  ;;  %2577 = vmatprep.mubr.f32.mxu0 %v13875_v52  ;;  %v13937_v48 = vmov 0  }
 0x219   :  { %8525 = vmatpush1.bf16.msra.mxu1 %v13933_v5  ;;  %8603 = vmatprep.subr.bf16.mxu0 %v8602_v17  ;;  %v13938_v17 = vand.u32 4294901760, %v13900_v9  ;;  %v13944_v9 = vand.u32 4294901760, %v13905_v24 }
 0x21a   :  { %8527 = vmatprep.subr.bf16.mxu1 %v13934_v32  ;;  %9366 = vset.pattern.permute.xlu1 %v13935_v44 }
 0x21b   :  { %1401 = vperm.xlu1 %9366, %v9186_v33   ;;  %9370 = vset.pattern.permute.xlu0 %v9601_v21  ;;  %v13939_v33 = vand.u32 4294901760, %v10217_v63  ;;  %v13945_v63 = vand.u32 4294901760, %v13909_v23  ;;  %v13951_v23 = vand.u32 4294901760, %v10462_v60  ;;  %v13958_v60 = vand.u32 4294901760, %v13921_v41  ;;  %v13963_v41 = vld [vmem:[#allocation64_spill] sm:$0xff] }
 0x21c   :  { %8605 = vmatpush1.bf16.msra.mxu0 %v8604_v34  ;;  %1463 = vperm.xlu0 %9370, %v13936_v8   ;;  %v13940_v34 = vand.u32 4294901760, %v13903_v50  ;;  %v13947_v50 = vand.u32 4294901760, %v13912_v1  ;;  %v13952_v1 = vld [vmem:[#allocation51_spill] sm:$0xff] }
 0x21d   :  { %8529 = vmatpush1.bf16.msra.mxu1 %v10540_v15  ;;  %8607 = vmatprep.subr.bf16.mxu0 %v8606_v10  ;;  %v8530_v44 = vpack.c.bf16 %v13939_v33, %v13938_v17  ;;  %v13941_v10 = vand.u32 4294901760, %v10275_v54  ;;  %v13946_v54 = vand.u32 4294901760, %v13910_v37  ;;  %v13949_v17 = vld [vmem:[#allocation45_spill] sm:$0xff]  ;;  %v13955_v33 = vld [vmem:[#allocation62_spill] sm:$0xff] }
 0x21e   :  { %1905 = vmatprep.subr.mxu1 %v10557_v7 }
 0x21f   :  { %9367 = vset.pattern.permute.xlu1 %v13937_v48  ;;  %v8532_v8 = vpack.c.bf16 %v13941_v10, %v13940_v34  ;;  %v13957_v10 = vld [vmem:[#allocation30_spill] sm:$0xff] }
 0x220   :  { %8609 = vmatpush1.bf16.msra.mxu0 %v8608_v13  ;;  %1380 = vperm.xlu1 %9367, %v9187_v49   ;;  %v13943_v13 = vand.u32 4294901760, %v13906_v57  ;;  %v8536_v49 = vpack.c.bf16 %v13946_v54, %v13945_v63  ;;  %v13948_v57 = vand.u32 4294901760, %v10455_v40  ;;  %v13953_v40 = vld [vmem:[#allocation61_spill] sm:$0xff]  ;;  %v13966_v54 = vand.u32 4294901760, %v10634_v59 }
 0x221   :  { %1907 = vmatpush1.msra.mxu1 %v10385_v0  ;;  %2527 = vmatprep.subr.mxu0 %v10773_v35  ;;  %v13965_v63 = vld [vmem:[#allocation65_spill] sm:$0xff]  ;;  %v13972_v59 = vand.u32 4294901760, %v10514_v20  ;;  %v13976_v20 = vand.u32 4294901760, %v10700_v3  ;;  %v13980_v3 = vand.u32 4294901760, %v10716_v6 }
 0x222   :  { %8531 = vmatprep.subr.bf16.mxu1 %v8530_v44  ;;  %1958 = vmatmul.mubr.f32.vlgmr.msra.gmra.mrb[0].mxu1 %v13942_v28  ;;  %v8534_v19 = vpack.c.bf16 %v13944_v9, %v13943_v13  ;;  %v8538_v24 = vpack.c.bf16 %v13948_v57, %v13947_v50  ;;  %v13956_v44 = vand.u32 4294901760, %v13955_v33  ;;  %v13960_v13 = vld [vmem:[#allocation31_spill] sm:$0xff]  ;;  %v13970_v57 = vand.u32 4294901760, %v13928_v58 }
 0x223   :  { %8533 = vmatpush1.bf16.msra.mxu1 %v8532_v8  ;;  %1963 = vmatprep.mubr.f32.mxu1 %v13875_v52  ;;  %v13961_v9 = vld [vmem:[#allocation63_spill] sm:$0xff] }
 0x224   :  { %8535 = vmatprep.subr.bf16.mxu1 %v8534_v19  ;;  %2530 = vmatpush1.msra.mxu0 %v10806_v38  ;;  %v13950_v19 = vand.u32 4294901760, %v13919_v27  ;;  %v13959_v27 = vand.u32 4294901760, %v10545_v36  ;;  %v13964_v36 = vand.u32 4294901760, %v10427_v43  ;;  %v13969_v43 = vand.u32 4294901760, %v10631_v25 }
 0x225   :  { %8611 = vmatprep.subr.bf16.mxu0 %v10617_v46  ;;  %2580 = vmatmul.mubr.f32.vlgmr.msra.gmra.mrb[2].mxu0 %v13925_v42  ;;  %v13954_v42 = vand.u32 4294901760, %v13953_v40  ;;  %v13973_v25 = vand.u32 4294901760, %v10666_v29  ;;  %v13977_v29 = vand.u32 4294901760, %v13913_v31  ;;  %v13981_v31 = vand.u32 4294901760, %v10762_v16  ;;  %v13987_v16 = vld [vmem:[#allocation21_spill] sm:$0xff] }
 0x226   :  { %8613 = vmatpush1.bf16.msra.mxu0 %v10623_v47  ;;  %1967 = vmatmul.mubr.f32.gmra.mrb[2].mxu1 %v13949_v17  ;;  %v8540_v37 = vpack.c.bf16 %v13951_v23, %v13950_v19  ;;  %v8544_v8 = vpack.c.bf16 %v13959_v27, %v13958_v60 }
 0x227   :  { %8537 = vmatpush1.bf16.msra.mxu1 %v8536_v49  ;;  %8615 = vmatprep.subr.bf16.mxu0 %v10653_v45  ;;  %v8542_v34 = vpack.c.bf16 %v13956_v44, %v13954_v42  ;;  %v13967_v49 = vand.u32 4294901760, %v10478_v56 }
 0x228   :  { %8539 = vmatprep.subr.bf16.mxu1 %v8538_v24  ;;  %2585 = vmatprep.mubr.f32.mxu0 %v13875_v52 }
 0x229   :  { %2091 = vmatprep.mubr.f32.mxu1 %v13875_v52  ;;  %2588 = vmatmul.mubr.f32.gmra.mrb[4].mxu0 %v13929_v14  ;;  %v10923_v14 = vld [vmem:[%s13415_s3] sm:$0xff]  ;;  %v8626_v50 = vpack.c.bf16 %v13967_v49, %v13966_v54 }
 0x22a   :  { %8617 = vmatpush1.bf16.msra.mxu0 %v13952_v1  ;;  %2676 = vmatprep.mubr.f32.mxu0 %v13875_v52 }
 0x22b   :  { %8541 = vmatpush1.bf16.msra.mxu1 %v8540_v37  ;;  %8619 = vmatprep.subr.bf16.mxu0 %v13957_v10 }
 0x22c   :  { %8543 = vmatprep.subr.bf16.mxu1 %v8542_v34  ;;  %9368 = vset.pattern.permute.xlu1 %v9601_v21  ;;  %v13962_v21 = vand.u32 4294901760, %v10598_v62  ;;  %v13968_v62 = vld [vmem:[#allocation66_spill] sm:$0xff] }
 0x22d   :  { %1459 = vperm.xlu1 %9368, %v10923_v14   ;;  %9371 = vset.pattern.permute.xlu0 %v13937_v48 }
 0x22e   :  { %8621 = vmatpush1.bf16.msra.mxu0 %v13960_v13 }
 0x22f   :  { %8545 = vmatpush1.bf16.msra.mxu1 %v8544_v8  ;;  %8623 = vmatprep.subr.bf16.mxu0 %v13961_v9 }
 0x230   :  { %2040 = vmatprep.subr.mxu1 %v13962_v21 }
 0x232   :  { %8625 = vmatpush1.bf16.msra.mxu0 %v13963_v41 }
 0x233   :  { %2044 = vmatpush1.msra.mxu1 %v13964_v36  ;;  %2627 = vmatprep.subr.mxu0 %v13965_v63 }
 0x234   :  { %8547 = vmatprep.subr.bf16.mxu1 %v13924_v2  ;;  %2093 = vmatmul.mubr.f32.vlgmr.msra.gmra.mrb[0].mxu1 %v13902_v30  ;;  %v8628_v2 = vpack.c.bf16 %v13970_v57, %v13969_v43 }
 0x235   :  { %8549 = vmatpush1.bf16.msra.mxu1 %v13926_v61  ;;  %2098 = vmatprep.mubr.f32.mxu1 %v13875_v52  ;;  %v13971_v61 = vand.u32 4294901760, %v10656_v55  ;;  %v13975_v55 = vand.u32 4294901760, %v13932_v53 }
 0x236   :  { %8551 = vmatprep.subr.bf16.mxu1 %v13927_v26  ;;  %2629 = vmatpush1.msra.mxu0 %v13968_v62  ;;  %v13974_v26 = vand.u32 4294901760, %v10522_v39  ;;  %v13978_v39 = vand.u32 4294901760, %v10706_v11  ;;  %v13982_v11 = vand.u32 4294901760, %v10745_v18 }
 0x237   :  { %8627 = vmatprep.subr.bf16.mxu0 %v8626_v50  ;;  %2680 = vmatmul.mubr.f32.vlgmr.msra.gmra.mrb[2].mxu0 %v13942_v28  ;;  %v8630_v56 = vpack.c.bf16 %v13972_v59, %v13971_v61  ;;  %v8634_v28 = vpack.c.bf16 %v13976_v20, %v13975_v55  ;;  %v13990_v59 = vld [vmem:[#allocation26_spill] sm:$0xff]  ;;  %v13992_v55 = vld [vmem:[#allocation27_spill] sm:$0xff] }
 0x238   :  { %8629 = vmatpush1.bf16.msra.mxu0 %v8628_v2  ;;  %2100 = vmatmul.mubr.f32.gmra.mrb[2].mxu1 %v13915_v22  ;;  %v8632_v58 = vpack.c.bf16 %v13974_v26, %v13973_v25  ;;  %v13989_v2 = vld [vmem:[#allocation22_spill] sm:$0xff]  ;;  %v13991_v26 = vld [vmem:[#allocation23_spill] sm:$0xff] }
 0x239   :  { %8553 = vmatpush1.bf16.msra.mxu1 %v13930_v51  ;;  %8631 = vmatprep.subr.bf16.mxu0 %v8630_v56  ;;  %v8636_v51 = vpack.c.bf16 %v13978_v39, %v13977_v29 }
 0x23a   :  { %8555 = vmatprep.subr.bf16.mxu1 %v13931_v12  ;;  %2188 = vmatprep.mubr.f32.mxu1 %v13875_v52  ;;  %v13979_v12 = vand.u32 4294901760, %v10729_v4  ;;  %v13983_v4 = vand.u32 4294901760, %v10773_v35  ;;  %v13986_v35 = vld [vmem:[#allocation24_spill] sm:$0xff] }
 0x23b   :  { %2685 = vmatprep.mubr.f32.mxu0 %v13875_v52 }
 0x23c   :  { %8633 = vmatpush1.bf16.msra.mxu0 %v8632_v58  ;;  %v8638_v53 = vpack.c.bf16 %v13980_v3, %v13979_v12 }
 0x23d   :  { %8557 = vmatpush1.bf16.msra.mxu1 %v13933_v5  ;;  %8635 = vmatprep.subr.bf16.mxu0 %v8634_v28  ;;  %v8640_v5 = vpack.c.bf16 %v13982_v11, %v13981_v31 }
 0x23e   :  { %8559 = vmatprep.subr.bf16.mxu1 %v13934_v32  ;;  %2689 = vmatmul.mubr.f32.gmra.mrb[4].mxu0 %v13949_v17  ;;  %v13988_v32 = vld [vmem:[#allocation25_spill] sm:$0xff] }
 0x23f   :  { %2813 = vmatprep.mubr.f32.mxu0 %v13875_v52 }
 0x240   :  { %8637 = vmatpush1.bf16.msra.mxu0 %v8636_v51 }
 0x241   :  { %8561 = vmatpush1.bf16.msra.mxu1 %v10540_v15  ;;  %8639 = vmatprep.subr.bf16.mxu0 %v8638_v53  ;;  %v13984_v15 = vand.u32 4294901760, %v10806_v38 }
 0x242   :  { %2139 = vmatprep.subr.mxu1 %v10557_v7 }
 0x244   :  { %8641 = vmatpush1.bf16.msra.mxu0 %v8640_v5 }
 0x245   :  { %2141 = vmatpush1.msra.mxu1 %v10385_v0  ;;  %2762 = vmatprep.subr.mxu0 %v13983_v4 }
 0x246   :  { %2190 = vmatmul.mubr.f32.vlgmr.msra.gmra.mrb[0].mxu1 %v13902_v30 }
 0x247   :  { %2195 = vmatprep.mubr.f32.mxu1 %v13875_v52 }
 0x248   :  { %2766 = vmatpush1.msra.mxu0 %v13984_v15 }
 0x249   :  { %8643 = vmatprep.subr.bf16.mxu0 %v10617_v46  ;;  %2815 = vmatmul.mubr.f32.vlgmr.msra.gmra.mrb[2].mxu0 %v13902_v30 }
 0x24a   :  { %2197 = vmatmul.mubr.f32.gmra.mrb[2].mxu1 %v13915_v22  ;;  %8645 = vmatpush1.bf16.msra.mxu0 %v10623_v47 }
 0x24b   :  { %8647 = vmatprep.subr.bf16.mxu0 %v10653_v45  ;;  %2820 = vmatprep.mubr.f32.mxu0 %v13875_v52  ;;  %v13985_v45 = vld [vmem:[#allocation20_spill] sm:$0xff] }
 0x24d   :  { %2822 = vmatmul.mubr.f32.gmra.mrb[4].mxu0 %v13915_v22 }
 0x24e   :  { %8649 = vmatpush1.bf16.msra.mxu0 %v13952_v1  ;;  %2910 = vmatprep.mubr.f32.mxu0 %v13875_v52 }
 0x24f   :  { %8651 = vmatprep.subr.bf16.mxu0 %v13957_v10 }
 0x252   :  { %8653 = vmatpush1.bf16.msra.mxu0 %v13960_v13 }
 0x253   :  { %8655 = vmatprep.subr.bf16.mxu0 %v13961_v9 }
 0x256   :  { %8657 = vmatpush1.bf16.msra.mxu0 %v13963_v41 }
 0x257   :  { %2861 = vmatprep.subr.mxu0 %v13965_v63 }
 0x25a   :  { %2863 = vmatpush1.msra.mxu0 %v13968_v62 }
 0x25b   :  { %2912 = vmatmul.mubr.f32.vlgmr.msra.gmra.mrb[2].mxu0 %v13902_v30 }
 0x25c   :  { %2917 = vmatprep.mubr.f32.mxu0 %v13875_v52 }
 0x25f   :  { %2919 = vmatmul.mubr.f32.gmra.mrb[4].mxu0 %v13915_v22 }
 0x288   :  { %v1386_v0 = vpop.permute.xlu1 %1385  ;;  %v1398_v7 = vpop.permute.xlu0 %1397 }
 0x289   :  { %v1404_v18 = vmul.f32 %v1398_v7, %v13985_v45  ;;  %v1405_v38 = vmul.f32 %v1398_v7, %v13987_v16  ;;  %v1392_v19 = vmul.f32 %v1386_v0, %v13986_v35  ;;  %v1393_v22 = vmul.f32 %v1386_v0, %v13988_v32 }
 0x28a   :  { %v1406_v61 = vmul.f32 %v1398_v7, %v13989_v2  ;;  %v1407_v58 = vmul.f32 %v1398_v7, %v13991_v26  ;;  %v1394_v29 = vmul.f32 %v1386_v0, %v13990_v59  ;;  %v1395_v12 = vmul.f32 %v1386_v0, %v13992_v55 }
 0x29a   :  { %v1402_v46 = vpop.permute.xlu1 %1401 }
 0x29b   :  { %v1408_v30 = vmul.f32 %v1402_v46, %v13985_v45  ;;  %v1409_v37 = vmul.f32 %v1402_v46, %v13987_v16  ;;  %v1464_v42 = vpop.permute.xlu0 %1463  ;;  %v1410_v39 = vmul.f32 %v1402_v46, %v13989_v2  ;;  %v1411_v3 = vmul.f32 %v1402_v46, %v13991_v26 }
 0x29d   :  { %v1416_v40 = vadd.f32 %v1408_v30, %v1392_v19  ;;  %v1417_v34 = vadd.f32 %v1409_v37, %v1393_v22  ;;  %v1418_v31 = vadd.f32 %v1410_v39, %v1394_v29  ;;  %v1419_v4 = vadd.f32 %v1411_v3, %v1395_v12 }
 0x29f   :  { %v1381_v47 = vpop.permute.xlu1 %1380  ;;  %v1470_v8 = vadd.f32 %v1464_v42, %v1416_v40  ;;  %v1471_v9 = vadd.f32 %v1464_v42, %v1417_v34  ;;  %v2925_v40 = vld [vmem:[#allocation9] sm:$0xff] }
 0x2a0   :  { %v1388_v6 = vmul.f32 %v1381_v47, %v13986_v35  ;;  %v1389_v24 = vmul.f32 %v1381_v47, %v13988_v32  ;;  %v1390_v56 = vmul.f32 %v1381_v47, %v13990_v59  ;;  %v1391_v20 = vmul.f32 %v1381_v47, %v13992_v55 }
 0x2a2   :  { %v1412_v17 = vadd.f32 %v1404_v18, %v1388_v6  ;;  %v1413_v23 = vadd.f32 %v1405_v38, %v1389_v24  ;;  %v1414_v28 = vadd.f32 %v1406_v61, %v1390_v56  ;;  %v1415_v51 = vadd.f32 %v1407_v58, %v1391_v20 }
 0x2a3   :  { %v1472_v18 = vadd.f32 %v1464_v42, %v1418_v31  ;;  %v1473_v38 = vadd.f32 %v1464_v42, %v1419_v4  ;;  %v2945_v42 = vsel %vm2943_vm2, %v2925_v40, 0 }
 0x2ac   :  { %v1460_v52 = vpop.permute.xlu1 %1459 }
 0x2ad   :  { %v1466_v1 = vadd.f32 %v1460_v52, %v1412_v17  ;;  %v1467_v44 = vadd.f32 %v1460_v52, %v1413_v23  ;;  %v1468_v53 = vadd.f32 %v1460_v52, %v1414_v28  ;;  %v1469_v5 = vadd.f32 %v1460_v52, %v1415_v51 }
 0x319   :  { %v2191_v33 = vpop.f32.mrb[0].mxu1 }
 0x31a   :  { %v11018_v10 = vadd.f32 %v2191_v33, %v1466_v1  ;;  %v2193_v60 = vpop.f32.mrb[1].mxu1  ;;  %v11066_v33 = vand.u32 4294901760, %v2945_v42 }
 0x31b   :  { %v11020_v27 = vadd.f32 %v2193_v60, %v1467_v44 }
 0x31c   :  { %v2933_v41 = vmul.f32 %v11018_v10, %v11018_v10  ;;  %v11069_v44 = vsub.f32 %v2945_v42, %v11066_v33 }
 0x31d   :  { %v2198_v13 = vpop.f32.mrb[2].mxu1  ;;  %v2927_v21 = vadd.f32 %v11020_v27, %v11018_v10  ;;  %v2934_v36 = vmul.f32 %v11020_v27, %v11020_v27 }
 0x31e   :  { %v11028_v63 = vadd.f32 %v2198_v13, %v1470_v8  ;;  %v2200_v54 = vpop.f32.mrb[3].mxu1  ;;  %v11072_v34 = vand.u32 4294901760, %v11069_v44  ;;  %v2926_v13 = vld [vmem:[#allocation9 + $0x8] sm:$0xff] }
 0x31f   :  { %v11030_v49 = vadd.f32 %v2200_v54, %v1471_v9  ;;  %2928 = vadd.xlane.f32.xlu1 %v2927_v21  ;;  %v2937_v62 = vadd.f32 %v2934_v36, %v2933_v41  ;;  %v2948_v9 = vsel %vm2943_vm2, %v2926_v13, 0 }
 0x320   :  { %v2935_v43 = vmul.f32 %v11028_v63, %v11028_v63  ;;  %v3020_v60 = vsub.f32 %v11069_v44, %v11072_v34  ;;  %v11080_v21 = vand.u32 4294901760, %v2948_v9 }
 0x321   :  { %v2930_v50 = vadd.f32 %v11030_v49, %v11028_v63  ;;  %v2936_v57 = vmul.f32 %v11030_v49, %v11030_v49 }
 0x322   :  { %v11076_v8 = vand.u32 4294901760, %v3020_v60  ;;  %v11083_v41 = vsub.f32 %v2948_v9, %v11080_v21 }
 0x323   :  { %2931 = vadd.xlane.f32.xlu0 %v2930_v50  ;;  %2938 = vadd.xlane.f32.xlu1 %v2937_v62  ;;  %v2940_v25 = vadd.f32 %v2936_v57, %v2935_v43 }
 0x324   :  { %8254 = vmatprep.mubr.f32.mxu1 %v11076_v8  ;;  %8338 = vmatprep.mubr.f32.mxu0 %v11076_v8  ;;  %v11086_v50 = vand.u32 4294901760, %v11083_v41 }
 0x326   :  { %v3030_v56 = vsub.f32 %v11083_v41, %v11086_v50 }
 0x327   :  { %2941 = vadd.xlane.f32.xlu0 %v2940_v25 }
 0x328   :  { %v11093_v29 = vand.u32 4294901760, %v3030_v56 }
 0x32e   :  { %v2913_v11 = vpop.f32.mrb[2].mxu0 }
 0x32f   :  { %v11046_v15 = vadd.f32 %v2913_v11, %v1468_v53  ;;  %v2915_v7 = vpop.f32.mrb[3].mxu0 }
 0x330   :  { %v11048_v47 = vadd.f32 %v2915_v7, %v1469_v5 }
 0x331   :  { %v3968_v0 = vmul.f32 %v11046_v15, %v11046_v15 }
 0x332   :  { %v2920_v6 = vpop.f32.mrb[4].mxu0  ;;  %v3962_v24 = vadd.f32 %v11048_v47, %v11046_v15  ;;  %v3969_v46 = vmul.f32 %v11048_v47, %v11048_v47 }
 0x333   :  { %v11056_v17 = vadd.f32 %v2920_v6, %v1472_v18  ;;  %v2922_v19 = vpop.f32.mrb[5].mxu0 }
 0x334   :  { %v11058_v30 = vadd.f32 %v2922_v19, %v1473_v38  ;;  %3963 = vadd.xlane.f32.xlu1 %v3962_v24  ;;  %v3972_v23 = vadd.f32 %v3969_v46, %v3968_v0 }
 0x335   :  { %v3970_v22 = vmul.f32 %v11056_v17, %v11056_v17 }
 0x336   :  { %v3965_v52 = vadd.f32 %v11058_v30, %v11056_v17  ;;  %v3971_v37 = vmul.f32 %v11058_v30, %v11058_v30 }
 0x338   :  { %3966 = vadd.xlane.f32.xlu0 %v3965_v52  ;;  %3973 = vadd.xlane.f32.xlu1 %v3972_v23  ;;  %v3975_v1 = vadd.f32 %v3971_v37, %v3970_v22 }
 0x33c   :  { %3976 = vadd.xlane.f32.xlu0 %v3975_v1 }
 0x3ac   :  { %v2929_v36 = vpop.xlane.xlu1 %2928 }
 0x3ad   :  { %v2951_v54 = vand.u32 4294901760, %v2929_v36 }
 0x3af   :  { %v3039_v62 = vsub.f32 %v2929_v36, %v2951_v54 }
 0x3b0   :  { %v2932_v43 = vpop.xlane.xlu0 %2931  ;;  %v2939_v53 = vpop.xlane.xlu1 %2938 }
 0x3b1   :  { %v3040_v57 = vand.u32 4294901760, %v3039_v62  ;;  %v2954_v61 = vand.u32 4294901760, %v2932_v43  ;;  %v3453_v40 = vand.u32 4294901760, %v2939_v53 }
 0x3b3   :  { %v11090_v25 = vpack.c.bf16 %v2954_v61, %v2951_v54  ;;  %v3046_v58 = vsub.f32 %v2932_v43, %v2954_v61  ;;  %v3041_v20 = vsub.f32 %v3039_v62, %v3040_v57  ;;  %v3541_v9 = vsub.f32 %v2939_v53, %v3453_v40 }
 0x3b4   :  { %v2942_v11 = vpop.xlane.xlu0 %2941 }
 0x3b5   :  { %v3047_v28 = vand.u32 4294901760, %v3046_v58  ;;  %8659 = vmatprep.subr.bf16.mxu1 %v11090_v25  ;;  %v3042_v51 = vand.u32 4294901760, %v3041_v20  ;;  %v8666_v31 = vpack.c.bf16 %v3046_v58, %v3039_v62  ;;  %v3456_v22 = vand.u32 4294901760, %v2942_v11 }
 0x3b6   :  { %8661 = vmatpush3.bf16.msra.mxu1 %v11090_v25  ;;  %v3542_v54 = vand.u32 4294901760, %v3541_v9 }
 0x3b7   :  { %v3048_v39 = vsub.f32 %v3046_v58, %v3047_v28  ;;  %v8674_v46 = vpack.c.bf16 %v3047_v28, %v3040_v57  ;;  %v3548_v60 = vsub.f32 %v2942_v11, %v3456_v22  ;;  %v8682_v62 = vpack.c.bf16 %v3456_v22, %v3453_v40 }
 0x3b8   :  { %v3543_v57 = vsub.f32 %v3541_v9, %v3542_v54 }
 0x3b9   :  { %8255 = vmatmul.mubr.f32.vlgmr.msra.gmra.mrb[4].mxu1 %v11093_v29  ;;  %v3049_v12 = vand.u32 4294901760, %v3048_v39  ;;  %v3549_v36 = vand.u32 4294901760, %v3548_v60 }
 0x3ba   :  { %8261 = vmatprep.mubr.f32.mxu1 %v11066_v33  ;;  %v3544_v58 = vand.u32 4294901760, %v3543_v57 }
 0x3bb   :  { %v8662_v3 = vpack.c.bf16 %v3049_v12, %v3042_v51  ;;  %v3550_v43 = vsub.f32 %v3548_v60, %v3549_v36  ;;  %v8698_v28 = vpack.c.bf16 %v3549_v36, %v3542_v54 }
 0x3bd   :  { %8663 = vmatprep.subr.bf16.mxu1 %v8662_v3  ;;  %v3551_v61 = vand.u32 4294901760, %v3550_v43 }
 0x3be   :  { %8665 = vmatpush3.bf16.msra.mxu1 %v8662_v3 }
 0x3bf   :  { %8667 = vmatprep.subr.bf16.mxu1 %v8666_v31  ;;  %v8686_v20 = vpack.c.bf16 %v3551_v61, %v3544_v58  ;;  %v9456_v61 = vld [vmem:[%s13415_s3 + $0x8] sm:$0xff] }
 0x3c1   :  { %8262 = vmatmul.mubr.f32.vlgmr.msra.gmra.mrb[4].mxu1 %v11080_v21  ;;  %v3964_v5 = vpop.xlane.xlu1 %3963 }
 0x3c2   :  { %v3979_v4 = vand.u32 4294901760, %v3964_v5  ;;  %8669 = vmatpush3.bf16.msra.mxu1 %v8666_v31  ;;  %8268 = vmatprep.mubr.f32.mxu1 %v11069_v44 }
 0x3c3   :  { %8671 = vmatprep.subr.bf16.mxu1 %v11090_v25 }
 0x3c4   :  { %v4067_v7 = vsub.f32 %v3964_v5, %v3979_v4 }
 0x3c5   :  { %v3967_v18 = vpop.xlane.xlu0 %3966  ;;  %v3974_v51 = vpop.xlane.xlu1 %3973 }
 0x3c6   :  { %v4068_v6 = vand.u32 4294901760, %v4067_v7  ;;  %v3982_v38 = vand.u32 4294901760, %v3967_v18  ;;  %v4481_v3 = vand.u32 4294901760, %v3974_v51 }
 0x3c8   :  { %v11101_v24 = vpack.c.bf16 %v3982_v38, %v3979_v4  ;;  %v4074_v0 = vsub.f32 %v3967_v18, %v3982_v38  ;;  %v4069_v19 = vsub.f32 %v4067_v7, %v4068_v6  ;;  %v4569_v31 = vsub.f32 %v3974_v51, %v4481_v3 }
 0x3c9   :  { %8269 = vmatmul.mubr.f32.vlgmr.msra.gmra.mrb[4].mxu1 %v11083_v41  ;;  %v3977_v39 = vpop.xlane.xlu0 %3976 }
 0x3ca   :  { %v4075_v52 = vand.u32 4294901760, %v4074_v0  ;;  %8673 = vmatpush3.bf16.msra.mxu1 %v11090_v25  ;;  %8707 = vmatprep.subr.bf16.mxu0 %v11101_v24  ;;  %v4070_v37 = vand.u32 4294901760, %v4069_v19  ;;  %v8714_v13 = vpack.c.bf16 %v4074_v0, %v4067_v7  ;;  %v4484_v12 = vand.u32 4294901760, %v3977_v39 }
 0x3cb   :  { %8675 = vmatprep.subr.bf16.mxu1 %v8674_v46  ;;  %8709 = vmatpush3.bf16.msra.mxu0 %v11101_v24  ;;  %v4570_v5 = vand.u32 4294901760, %v4569_v31 }
 0x3cc   :  { %v4076_v23 = vsub.f32 %v4074_v0, %v4075_v52  ;;  %8275 = vmatprep.mubr.f32.mxu1 %v11072_v34  ;;  %v8722_v56 = vpack.c.bf16 %v4075_v52, %v4068_v6  ;;  %v4576_v53 = vsub.f32 %v3977_v39, %v4484_v12  ;;  %v8730_v4 = vpack.c.bf16 %v4484_v12, %v4481_v3 }
 0x3cd   :  { %v4571_v18 = vsub.f32 %v4569_v31, %v4570_v5 }
 0x3ce   :  { %8339 = vmatmul.mubr.f32.vlgmr.msra.gmra.mrb[6].mxu0 %v11093_v29  ;;  %v4077_v1 = vand.u32 4294901760, %v4076_v23  ;;  %v4577_v11 = vand.u32 4294901760, %v4576_v53  ;;  %v8738_v0 = vpack.c.bf16 %v4576_v53, %v4569_v31 }
 0x3cf   :  { %8345 = vmatprep.mubr.f32.mxu0 %v11066_v33  ;;  %v4572_v38 = vand.u32 4294901760, %v4571_v18 }
 0x3d0   :  { %v8710_v42 = vpack.c.bf16 %v4077_v1, %v4070_v37  ;;  %v4578_v7 = vsub.f32 %v4576_v53, %v4577_v11 }
 0x3d1   :  { %8276 = vmatmul.mubr.f32.vlgmr.msra.gmra.mrb[4].mxu1 %v11086_v50 }
 0x3d2   :  { %8677 = vmatpush3.bf16.msra.mxu1 %v8674_v46  ;;  %8711 = vmatprep.subr.bf16.mxu0 %v8710_v42  ;;  %v4579_v6 = vand.u32 4294901760, %v4578_v7  ;;  %v8746_v46 = vpack.c.bf16 %v4577_v11, %v4570_v5 }
 0x3d3   :  { %8679 = vmatprep.subr.bf16.mxu1 %v11090_v25  ;;  %8713 = vmatpush3.bf16.msra.mxu0 %v8710_v42 }
 0x3d4   :  { %8715 = vmatprep.subr.bf16.mxu0 %v8714_v13  ;;  %8282 = vmatprep.mubr.f32.mxu1 %v11066_v33 }
 0x3d6   :  { %8346 = vmatmul.mubr.f32.vlgmr.msra.gmra.mrb[6].mxu0 %v11080_v21 }
 0x3d7   :  { %8717 = vmatpush3.bf16.msra.mxu0 %v8714_v13  ;;  %8352 = vmatprep.mubr.f32.mxu0 %v11069_v44 }
 0x3d8   :  { %8719 = vmatprep.subr.bf16.mxu0 %v11101_v24 }
 0x3d9   :  { %8283 = vmatmul.mubr.f32.vlgmr.msra.gmra.mrb[4].mxu1 %v11080_v21 }
 0x3da   :  { %8681 = vmatpush3.bf16.msra.mxu1 %v11090_v25  ;;  %8289 = vmatprep.mubr.f32.mxu1 %v11066_v33  ;;  %v8690_v25 = vpack.c.bf16 %v3548_v60, %v3541_v9 }
 0x3db   :  { %8683 = vmatprep.subr.bf16.mxu1 %v8682_v62 }
 0x3de   :  { %8353 = vmatmul.mubr.f32.vlgmr.msra.gmra.mrb[6].mxu0 %v11083_v41 }
 0x3df   :  { %8721 = vmatpush3.bf16.msra.mxu0 %v11101_v24  ;;  %8359 = vmatprep.mubr.f32.mxu0 %v11072_v34 }
 0x3e0   :  { %8723 = vmatprep.subr.bf16.mxu0 %v8722_v56 }
 0x3e1   :  { %8290 = vmatmul.mubr.f32.vlgmr.msra.gmra.mrb[4].mxu1 %v11080_v21 }
 0x3e2   :  { %8685 = vmatpush3.bf16.msra.mxu1 %v8682_v62  ;;  %8296 = vmatprep.mubr.f32.mxu1 %v11076_v8 }
 0x3e3   :  { %8687 = vmatprep.subr.bf16.mxu1 %v8686_v20 }
 0x3e5   :  { %8297 = vmatmul.mubr.f32.vlgmr.msra.gmra.mrb[6].mxu1 %v11093_v29 }
 0x3e6   :  { %8689 = vmatpush3.bf16.msra.mxu1 %v8686_v20  ;;  %8360 = vmatmul.mubr.f32.vlgmr.msra.gmra.mrb[6].mxu0 %v11086_v50 }
 0x3e7   :  { %8691 = vmatprep.subr.bf16.mxu1 %v8690_v25  ;;  %8725 = vmatpush3.bf16.msra.mxu0 %v8722_v56 }
 0x3e8   :  { %8727 = vmatprep.subr.bf16.mxu0 %v11101_v24  ;;  %8303 = vmatprep.mubr.f32.mxu1 %v11066_v33 }
 0x3e9   :  { %8366 = vmatprep.mubr.f32.mxu0 %v11066_v33 }
 0x3ed   :  { %8304 = vmatmul.mubr.f32.vlgmr.msra.gmra.mrb[6].mxu1 %v11080_v21 }
 0x3ee   :  { %8693 = vmatpush3.bf16.msra.mxu1 %v8690_v25  ;;  %8367 = vmatmul.mubr.f32.vlgmr.msra.gmra.mrb[6].mxu0 %v11080_v21 }
 0x3ef   :  { %8695 = vmatprep.subr.bf16.mxu1 %v8682_v62  ;;  %8729 = vmatpush3.bf16.msra.mxu0 %v11101_v24  ;;  %v8734_v24 = vpack.c.bf16 %v4579_v6, %v4572_v38 }
 0x3f0   :  { %8310 = vmatprep.mubr.f32.mxu1 %v11069_v44  ;;  %8373 = vmatprep.mubr.f32.mxu0 %v11066_v33 }
 0x3f5   :  { %8311 = vmatmul.mubr.f32.vlgmr.msra.gmra.mrb[6].mxu1 %v11083_v41 }
 0x3f6   :  { %8697 = vmatpush3.bf16.msra.mxu1 %v8682_v62  ;;  %8374 = vmatmul.mubr.f32.vlgmr.msra.gmra.mrb[6].mxu0 %v11080_v21 }
 0x3f7   :  { %8699 = vmatprep.subr.bf16.mxu1 %v8698_v28  ;;  %8317 = vmatprep.mubr.f32.mxu1 %v11072_v34 }
 0x3fd   :  { %8318 = vmatmul.mubr.f32.vlgmr.msra.gmra.mrb[6].mxu1 %v11086_v50 }
 0x3fe   :  { %8701 = vmatpush3.bf16.msra.mxu1 %v8698_v28  ;;  %8324 = vmatprep.mubr.f32.mxu1 %v11066_v33 }
 0x3ff   :  { %8703 = vmatprep.subr.bf16.mxu1 %v8682_v62 }
 0x405   :  { %8325 = vmatmul.mubr.f32.vlgmr.msra.gmra.mrb[6].mxu1 %v11080_v21 }
 0x406   :  { %8705 = vmatpush3.bf16.msra.mxu1 %v8682_v62  ;;  %8331 = vmatprep.mubr.f32.mxu1 %v11066_v33 }
 0x407   :  { %8731 = vmatprep.subr.bf16.mxu1 %v8730_v4 }
 0x40d   :  { %8332 = vmatmul.mubr.f32.vlgmr.msra.gmra.mrb[6].mxu1 %v11080_v21 }
 0x40e   :  { %8733 = vmatpush3.bf16.msra.mxu1 %v8730_v4  ;;  %8380 = vmatprep.mubr.f32.mxu1 %v11076_v8 }
 0x40f   :  { %8735 = vmatprep.subr.bf16.mxu1 %v8734_v24 }
 0x411   :  { %8381 = vmatmul.mubr.f32.vlgmr.msra.gmra.mrb[8].mxu1 %v11093_v29 }
 0x412   :  { %8737 = vmatpush3.bf16.msra.mxu1 %v8734_v24  ;;  %8387 = vmatprep.mubr.f32.mxu1 %v11066_v33 }
 0x413   :  { %8739 = vmatprep.subr.bf16.mxu1 %v8738_v0 }
 0x419   :  { %8388 = vmatmul.mubr.f32.vlgmr.msra.gmra.mrb[8].mxu1 %v11080_v21 }
 0x41a   :  { %8741 = vmatpush3.bf16.msra.mxu1 %v8738_v0  ;;  %8394 = vmatprep.mubr.f32.mxu1 %v11069_v44  ;;  %v9602_v44 = vmov 4  }
 0x41b   :  { %8743 = vmatprep.subr.bf16.mxu1 %v8730_v4  ;;  %9372 = vset.pattern.permute.xlu1 %v9602_v44 }
 0x41c   :  { %5095 = vperm.xlu1 %9372, %v10923_v14  }
 0x420   :  { %9373 = vset.pattern.permute.xlu1 %v13937_v48 }
 0x421   :  { %8395 = vmatmul.mubr.f32.vlgmr.msra.gmra.mrb[8].mxu1 %v11083_v41  ;;  %v9603_v41 = vmov 5  }
 0x422   :  { %8745 = vmatpush3.bf16.msra.mxu1 %v8730_v4  ;;  %8401 = vmatprep.mubr.f32.mxu1 %v11072_v34 }
 0x423   :  { %8747 = vmatprep.subr.bf16.mxu1 %v8746_v46 }
 0x429   :  { %8402 = vmatmul.mubr.f32.vlgmr.msra.gmra.mrb[8].mxu1 %v11086_v50 }
 0x42a   :  { %8749 = vmatpush3.bf16.msra.mxu1 %v8746_v46  ;;  %8408 = vmatprep.mubr.f32.mxu1 %v11066_v33 }
 0x42b   :  { %8751 = vmatprep.subr.bf16.mxu1 %v8730_v4 }
 0x431   :  { %8409 = vmatmul.mubr.f32.vlgmr.msra.gmra.mrb[8].mxu1 %v11080_v21 }
 0x432   :  { %8753 = vmatpush3.bf16.msra.mxu1 %v8730_v4  ;;  %8415 = vmatprep.mubr.f32.mxu1 %v11066_v33 }
 0x439   :  { %8416 = vmatmul.mubr.f32.vlgmr.msra.gmra.mrb[8].mxu1 %v11080_v21 }
 0x49b   :  { %v5096_v56 = vpop.permute.xlu1 %5095 }
 0x4b4   :  { %v8291_v34 = vpop.f32.mrb[4].mxu1 }
 0x4b5   :  { %4997 = vperm.xlu0 %9371, %v8291_v34   ;;  %v3442_v8 = vpop.f32.mrb[5].mxu1  ;;  %v3955_v33 = vmul.f32 %v8291_v34, %v8291_v34 }
 0x4b6   :  { %v3954_v19 = vmul.f32 %v3442_v8, %v3442_v8 }
 0x4b9   :  { %9375 = vset.pattern.permute.xlu0 %v9603_v41 }
 0x4ba   :  { %5111 = vperm.xlu0 %9375, %v10923_v14  }
 0x4c9   :  { %v8375_v50 = vpop.f32.mrb[6].mxu0 }
 0x4ca   :  { %5015 = vperm.xlu1 %9373, %v8375_v50   ;;  %v4470_v29 = vpop.f32.mrb[7].mxu0  ;;  %v4983_v14 = vmul.f32 %v8375_v50, %v8375_v50 }
 0x4cb   :  { %v4982_v42 = vmul.f32 %v4470_v29, %v4470_v29 }
 0x4ce   :  { %4992 = vperm.xlu1 %9373, %v3442_v8  }
 0x4d2   :  { %5010 = vperm.xlu1 %9373, %v4470_v29  }
 0x4e0   :  { %v8333_v52 = vpop.f32.mrb[6].mxu1 }
 0x4e1   :  { %v3957_v23 = vsub.f32 %v8333_v52, %v3955_v33  ;;  %v3944_v22 = vpop.f32.mrb[7].mxu1 }
 0x4e2   :  { %v3956_v21 = vsub.f32 %v3944_v22, %v3954_v19 }
 0x4e3   :  { %v3959_v37 = vadd.f32 1e-05, %v3957_v23 }
 0x4e4   :  { %v3958_v48 = vadd.f32 1e-05, %v3956_v21 }
 0x4e5   :  { %9415 = vrsqrt.f32 %v3959_v37 }
 0x4e6   :  { %9417 = vrsqrt.f32 %v3958_v48 }
 0x4ef   :  { %v9416_v1 = vpop.eup %9415 }
 0x4f0   :  { %5041 = vperm.xlu1 %9373, %v9416_v1   ;;  %v9418_v40 = vpop.eup %9417 }
 0x4f4   :  { %5036 = vperm.xlu1 %9373, %v9418_v40  }
 0x50c   :  { %v8417_v60 = vpop.f32.mrb[8].mxu1 }
 0x50d   :  { %v4985_v13 = vsub.f32 %v8417_v60, %v4983_v14  ;;  %v4972_v9 = vpop.f32.mrb[9].mxu1 }
 0x50e   :  { %v4984_v36 = vsub.f32 %v4972_v9, %v4982_v42 }
 0x50f   :  { %v4987_v54 = vadd.f32 1e-05, %v4985_v13 }
 0x510   :  { %v4986_v62 = vadd.f32 1e-05, %v4984_v36 }
 0x511   :  { %9419 = vrsqrt.f32 %v4987_v54 }
 0x512   :  { %9421 = vrsqrt.f32 %v4986_v62 }
 0x51b   :  { %v9420_v43 = vpop.eup %9419 }
 0x51c   :  { %5059 = vperm.xlu1 %9373, %v9420_v43   ;;  %v9422_v57 = vpop.eup %9421 }
 0x520   :  { %5054 = vperm.xlu1 %9373, %v9422_v57  }
 0x524   :  { %9374 = vset.pattern.permute.xlu1 %v9602_v44 }
 0x525   :  { %5099 = vperm.xlu1 %9374, %v9456_v61  }
 0x529   :  { %9376 = vset.pattern.permute.xlu1 %v9603_v41 }
 0x52a   :  { %5115 = vperm.xlu1 %9376, %v9456_v61  }
 0x534   :  { %v4998_v51 = vpop.permute.xlu0 %4997 }
 0x535   :  { %v5004_v6 = vmul.f32 %v4998_v51, %v13986_v35  ;;  %v5005_v38 = vmul.f32 %v4998_v51, %v13988_v32  ;;  %v5006_v34 = vmul.f32 %v4998_v51, %v13990_v59  ;;  %v5007_v54 = vmul.f32 %v4998_v51, %v13992_v55 }
 0x549   :  { %v5016_v58 = vpop.permute.xlu1 %5015 }
 0x54a   :  { %v5022_v8 = vmul.f32 %v5016_v58, %v13985_v45  ;;  %v5023_v41 = vmul.f32 %v5016_v58, %v13987_v16  ;;  %v5024_v50 = vmul.f32 %v5016_v58, %v13989_v2  ;;  %v5025_v62 = vmul.f32 %v5016_v58, %v13991_v26 }
 0x54c   :  { %v5030_v43 = vadd.f32 %v5022_v8, %v5004_v6  ;;  %v5031_v57 = vadd.f32 %v5023_v41, %v5005_v38 }
 0x54d   :  { %v4993_v20 = vpop.permute.xlu1 %4992 }
 0x54e   :  { %v5000_v11 = vmul.f32 %v4993_v20, %v13986_v35  ;;  %v5001_v5 = vmul.f32 %v4993_v20, %v13988_v32  ;;  %v5002_v4 = vmul.f32 %v4993_v20, %v13990_v59  ;;  %v5003_v7 = vmul.f32 %v4993_v20, %v13992_v55 }
 0x551   :  { %v5011_v25 = vpop.permute.xlu1 %5010 }
 0x552   :  { %v5018_v12 = vmul.f32 %v5011_v25, %v13985_v45  ;;  %v5019_v3 = vmul.f32 %v5011_v25, %v13987_v16  ;;  %v5020_v53 = vmul.f32 %v5011_v25, %v13989_v2  ;;  %v5021_v31 = vmul.f32 %v5011_v25, %v13991_v26 }
 0x554   :  { %v5026_v24 = vadd.f32 %v5018_v12, %v5000_v11  ;;  %v5027_v0 = vadd.f32 %v5019_v3, %v5001_v5  ;;  %v5028_v46 = vadd.f32 %v5020_v53, %v5002_v4  ;;  %v5029_v44 = vadd.f32 %v5021_v31, %v5003_v7  ;;  %v5112_v12 = vpop.permute.xlu0 %5111 }
 0x556   :  { %v5078_v1 = vsub.f32 %v11018_v10, %v5026_v24  ;;  %v5079_v40 = vsub.f32 %v11020_v27, %v5027_v0  ;;  %v5080_v14 = vsub.f32 %v11046_v15, %v5028_v46  ;;  %v5081_v42 = vsub.f32 %v11048_v47, %v5029_v44 }
 0x557   :  { %v5082_v0 = vsub.f32 %v11028_v63, %v5030_v43 }
 0x56f   :  { %v11160_v28 = vpop.permute.xlu1 %5041 }
 0x570   :  { %v5048_v58 = vmul.f32 %v11160_v28, %v13986_v35  ;;  %v5049_v11 = vmul.f32 %v11160_v28, %v13988_v32  ;;  %v5050_v5 = vmul.f32 %v11160_v28, %v13990_v59 }
 0x573   :  { %v5037_v39 = vpop.permute.xlu1 %5036 }
 0x574   :  { %v5044_v29 = vmul.f32 %v5037_v39, %v13986_v35  ;;  %v5045_v33 = vmul.f32 %v5037_v39, %v13988_v32  ;;  %v5046_v19 = vmul.f32 %v5037_v39, %v13990_v59  ;;  %v5047_v52 = vmul.f32 %v5037_v39, %v13992_v55  ;;  %v11212_v59 = vld [vmem:[%s13414_s2 + $0x4] ss:$8 sm:$0xf] }
 0x575   :  { %v5032_v39 = vadd.f32 %v5024_v50, %v5006_v34  ;;  %v5051_v35 = vmul.f32 %v11160_v28, %v13992_v55  ;;  %v5083_v34 = vsub.f32 %v11030_v49, %v5031_v57 }
 0x577   :  { %v5084_v55 = vsub.f32 %v11056_v17, %v5032_v39 }
 0x59b   :  { %v5060_v18 = vpop.permute.xlu1 %5059 }
 0x59c   :  { %v5066_v27 = vmul.f32 %v5060_v18, %v13985_v45  ;;  %v5067_v15 = vmul.f32 %v5060_v18, %v13987_v16  ;;  %v5068_v47 = vmul.f32 %v5060_v18, %v13989_v2 }
 0x59e   :  { %v5074_v38 = vadd.f32 %v5066_v27, %v5048_v58  ;;  %v5075_v24 = vadd.f32 %v5067_v15, %v5049_v11  ;;  %v5076_v32 = vadd.f32 %v5068_v47, %v5050_v5 }
 0x59f   :  { %v5055_v23 = vpop.permute.xlu1 %5054 }
 0x5a0   :  { %v5062_v22 = vmul.f32 %v5055_v23, %v13985_v45  ;;  %v5063_v21 = vmul.f32 %v5055_v23, %v13987_v16  ;;  %v5064_v37 = vmul.f32 %v5055_v23, %v13989_v2  ;;  %v5065_v48 = vmul.f32 %v5055_v23, %v13991_v26 }
 0x5a1   :  { %v5069_v45 = vmul.f32 %v5060_v18, %v13991_v26  ;;  %v5090_v8 = vmul.f32 %v5082_v0, %v5074_v38  ;;  %v5091_v50 = vmul.f32 %v5083_v34, %v5075_v24  ;;  %v13996_v0 = vld [vmem:[#allocation16_spill] sm:$0xff]  ;;  %v13997_v34 = vld [vmem:[#allocation18_spill] sm:$0xff] }
 0x5a2   :  { %v5070_v60 = vadd.f32 %v5062_v22, %v5044_v29  ;;  %v5071_v13 = vadd.f32 %v5063_v21, %v5045_v33  ;;  %v5072_v9 = vadd.f32 %v5064_v37, %v5046_v19  ;;  %v5073_v36 = vadd.f32 %v5065_v48, %v5047_v52  ;;  %v13993_v19 = vld [vmem:[#allocation17_spill] sm:$0xff] }
 0x5a3   :  { %v5077_v26 = vadd.f32 %v5069_v45, %v5051_v35  ;;  %v5092_v29 = vmul.f32 %v5084_v55, %v5076_v32  ;;  %v11226_v52 = vrot.slane %v11212_v59, %v13993_v19 }
 0x5a4   :  { %v5086_v61 = vmul.f32 %v5078_v1, %v5070_v60  ;;  %v5087_v20 = vmul.f32 %v5079_v40, %v5071_v13  ;;  %v5088_v25 = vmul.f32 %v5080_v14, %v5072_v9  ;;  %v5089_v10 = vmul.f32 %v5081_v42, %v5073_v36  ;;  %v5100_v4 = vpop.permute.xlu1 %5099 }
 0x5a5   :  { %v5106_v22 = vmul.f32 %v5100_v4, %v5090_v8  ;;  %v5107_v17 = vmul.f32 %v5100_v4, %v5091_v50  ;;  %v5108_v37 = vmul.f32 %v5100_v4, %v5092_v29 }
 0x5a6   :  { %v5102_v3 = vmul.f32 %v5096_v56, %v5086_v61  ;;  %v5103_v53 = vmul.f32 %v5096_v56, %v5087_v20  ;;  %v5104_v31 = vmul.f32 %v5096_v56, %v5088_v25  ;;  %v5105_v51 = vmul.f32 %v5096_v56, %v5089_v10  ;;  %v13994_v10 = vld [vmem:[#allocation19_spill] sm:$0xff] }
 0x5a7   :  { %v5033_v56 = vadd.f32 %v5025_v62, %v5007_v54  ;;  %v11240_v39 = vrot.slane %v11212_v59, %v13994_v10 }
 0x5a8   :  { %v5118_v16 = vadd.f32 %v5112_v12, %v5102_v3  ;;  %v11200_v7 = vadd.f32 %v5112_v12, %v5103_v53  ;;  %v11202_v2 = vadd.f32 %v5112_v12, %v5104_v31  ;;  %v11204_v6 = vadd.f32 %v5112_v12, %v5105_v51 }
 0x5a9   :  { %v5085_v63 = vsub.f32 %v11058_v30, %v5033_v56  ;;  %v5116_v33 = vpop.permute.xlu1 %5115  ;;  %v13995_v56 = vmov -1.0  }
 0x5aa   :  { %v5134_v18 = vmul.f32 0.70710677, %v5118_v16  ;;  %v5135_v46 = vmul.f32 0.70710677, %v11200_v7  ;;  %v11216_v44 = vmul.f32 0.70710677, %v11202_v2  ;;  %v11230_v42 = vadd.f32 %v5116_v33, %v5106_v22 }
 0x5ab   :  { %v11221_v28 = vmul.f32 0.70710677, %v11204_v6  ;;  %v5093_v23 = vmul.f32 %v5085_v63, %v5077_v26  ;;  %v11232_v36 = vadd.f32 %v5116_v33, %v5107_v17  ;;  %v11234_v57 = vadd.f32 %v5116_v33, %v5108_v37 }
 0x5ac   :  { %v5158_v41 = vand.u32 2147483647, %v5134_v18  ;;  %v5159_v21 = vand.u32 2147483647, %v5135_v46  ;;  %v5160_v49 = vand.u32 2147483647, %v11216_v44 }
 0x5ad   :  { %v5161_v48 = vand.u32 2147483647, %v11221_v28  ;;  %v5109_v30 = vmul.f32 %v5100_v4, %v5093_v23  ;;  %vm5142_vm3 = vcmp.ge.f32.partialorder %v5134_v18, 0.0  ;;  %vm5143_vm4 = vcmp.ge.f32.partialorder %v5135_v46, 0.0 }
 0x5ae   :  { %v5166_v1 = vmul.f32 0.3275911, %v5158_v41  ;;  %v5167_v40 = vmul.f32 0.3275911, %v5159_v21  ;;  %v5168_v14 = vmul.f32 0.3275911, %v5160_v49  ;;  %v11284_v46 = vrot.slane %v11212_v59, %v13997_v34 }
 0x5af   :  { %v5169_v60 = vmul.f32 0.3275911, %v5161_v48  ;;  %v5286_v9 = vsub.f32 0.0, %v5158_v41  ;;  %v5287_v43 = vsub.f32 0.0, %v5159_v21  ;;  %v5288_v20 = vsub.f32 0.0, %v5160_v49 }
 0x5b0   :  { %v5174_v13 = vadd.f32 1.0, %v5166_v1  ;;  %v5175_v54 = vadd.f32 1.0, %v5167_v40  ;;  %v5176_v62 = vadd.f32 1.0, %v5168_v14  ;;  %v11236_v25 = vadd.f32 %v5116_v33, %v5109_v30 }
 0x5b1   :  { %v5177_v61 = vadd.f32 1.0, %v5169_v60  ;;  %v5289_v27 = vsub.f32 0.0, %v5161_v48  ;;  %v5294_v15 = vmul.f32 %v5286_v9, %v5158_v41  ;;  %v11243_v47 = vmul.f32 0.70710677, %v11230_v42 }
 0x5b2   :  { %9423 = vrcp.f32 %v5174_v13  ;;  %v5295_v12 = vmul.f32 %v5287_v43, %v5159_v21  ;;  %v11246_v3 = vmul.f32 0.70710677, %v11232_v36  ;;  %v11249_v53 = vmul.f32 0.70710677, %v11234_v57 }
 0x5b3   :  { %9425 = vrcp.f32 %v5175_v54  ;;  %v11251_v31 = vmul.f32 0.5, %v5118_v16  ;;  %v5296_v51 = vmul.f32 %v5288_v20, %v5160_v49  ;;  %v11254_v58 = vmul.f32 0.70710677, %v11236_v25 }
 0x5b4   :  { %9427 = vrcp.f32 %v5176_v62  ;;  %v5162_v11 = vand.u32 2147483647, %v11243_v47  ;;  %v11258_v5 = vmul.f32 0.5, %v11200_v7  ;;  %v11261_v45 = vmul.f32 0.5, %v11202_v2 }
 0x5b5   :  { %9429 = vrcp.f32 %v5177_v61  ;;  %v11264_v4 = vmul.f32 0.5, %v11204_v6  ;;  %vm5144_vm5 = vcmp.ge.f32.partialorder %v11216_v44, 0.0  ;;  %v11269_v16 = vsel %vm5142_vm3, 1.0, %v13995_v56 }
 0x5b6   :  { %v11273_v35 = vsel %vm5143_vm4, 1.0, %v13995_v56  ;;  %v5297_v38 = vmul.f32 %v5289_v27, %v5161_v48  ;;  %v5302_v24 = vmul.f32 1.442695, %v5294_v15  ;;  %v5304_v7 = vmul.f32 1.442695, %v5295_v12 }
 0x5b7   :  { %v5163_v32 = vand.u32 2147483647, %v11246_v3  ;;  %v5164_v2 = vand.u32 2147483647, %v11249_v53  ;;  %v11279_v6 = vrot.slane %v11212_v59, %v13996_v0  ;;  %v5306_v26 = vmul.f32 1.442695, %v5296_v51 }
 0x5b8   :  { %v5165_v18 = vand.u32 2147483647, %v11254_v58  ;;  %v5170_v44 = vmul.f32 0.3275911, %v5162_v11  ;;  %v11287_v55 = vsel %vm5144_vm5, 1.0, %v13995_v56  ;;  %v5290_v41 = vsub.f32 0.0, %v5162_v11 }
 0x5b9   :  { %v5171_v63 = vmul.f32 0.3275911, %v5163_v32  ;;  %v5172_v8 = vmul.f32 0.3275911, %v5164_v2  ;;  %vm5145_vm6 = vcmp.ge.f32.partialorder %v11221_v28, 0.0  ;;  %v5291_v22 = vsub.f32 0.0, %v5163_v32 }
 0x5ba   :  { %v5308_v29 = vmul.f32 1.442695, %v5297_v38  ;;  %v5173_v33 = vmul.f32 0.3275911, %v5165_v18  ;;  %v5178_v23 = vadd.f32 1.0, %v5170_v44  ;;  %v5292_v48 = vsub.f32 0.0, %v5164_v2 }
 0x5bb   :  { %v5179_v17 = vadd.f32 1.0, %v5171_v63  ;;  %v5180_v37 = vadd.f32 1.0, %v5172_v8  ;;  %v5293_v40 = vsub.f32 0.0, %v5165_v18  ;;  %v5298_v43 = vmul.f32 %v5290_v41, %v5162_v11 }
 0x5bc   :  { %v9424_v50 = vpop.eup %9423  ;;  %v11290_v30 = vadd.f32 1.0, %v5173_v33  ;;  %9431 = vrcp.f32 %v5178_v23  ;;  %v5299_v15 = vmul.f32 %v5291_v22, %v5163_v32  ;;  %v5300_v51 = vmul.f32 %v5292_v48, %v5164_v2 }
 0x5bd   :  { %v9426_v21 = vpop.eup %9425  ;;  %v5190_v49 = vmul.f32 %v9424_v50, %v5174_v13  ;;  %9433 = vrcp.f32 %v5179_v17  ;;  %v5301_v44 = vmul.f32 %v5293_v40, %v5165_v18  ;;  %vm5146_vm7 = vcmp.ge.f32.partialorder %v11243_v47, 0.0 }
 0x5be   :  { %v9428_v59 = vpop.eup %9427  ;;  %v5191_v1 = vmul.f32 %v9426_v21, %v5175_v54  ;;  %9435 = vrcp.f32 %v5180_v37  ;;  %v5312_v8 = vmul.f32 1.442695, %v5299_v15  ;;  %v11309_v22 = vsel %vm5145_vm6, 1.0, %v13995_v56 }
 0x5bf   :  { %v9430_v14 = vpop.eup %9429  ;;  %v5192_v60 = vmul.f32 %v9428_v59, %v5176_v62  ;;  %v5198_v9 = vsub.f32 2.0, %v5190_v49  ;;  %9437 = vrcp.f32 %v11290_v30  ;;  %v5316_v33 = vmul.f32 1.442695, %v5301_v44 }
 0x5c0   :  { %v5193_v20 = vmul.f32 %v9430_v14, %v5177_v61  ;;  %v5199_v27 = vsub.f32 2.0, %v5191_v1  ;;  %9439 = vpow2.f32 %v5302_v24  ;;  %v5310_v61 = vmul.f32 1.442695, %v5298_v43 }
 0x5c1   :  { %v5200_v12 = vsub.f32 2.0, %v5192_v60  ;;  %v11292_v13 = vmul.f32 %v9424_v50, %v5198_v9  ;;  %9441 = vpow2.f32 %v5304_v7  ;;  %v5314_v50 = vmul.f32 1.442695, %v5300_v51 }
 0x5c2   :  { %v5201_v54 = vsub.f32 2.0, %v5193_v20  ;;  %v11295_v38 = vmul.f32 %v9426_v21, %v5199_v27  ;;  %9443 = vpow2.f32 %v5306_v26  ;;  %v11316_v26 = vsel %vm5146_vm7, 1.0, %v13995_v56 }
 0x5c3   :  { %v11297_v63 = vmul.f32 %v9428_v59, %v5200_v12  ;;  %v5214_v62 = vmul.f32 1.0614054, %v11292_v13  ;;  %9445 = vpow2.f32 %v5308_v29  ;;  %vm5147_vm8 = vcmp.ge.f32.partialorder %v11246_v3, 0.0 }
 0x5c4   :  { %v11301_v11 = vmul.f32 %v9430_v14, %v5201_v54  ;;  %v5215_v32 = vmul.f32 1.0614054, %v11295_v38  ;;  %9447 = vpow2.f32 %v5310_v61  ;;  %vm5148_vm11 = vcmp.ge.f32.partialorder %v11249_v53, 0.0 }
 0x5c5   :  { %v5216_v2 = vmul.f32 1.0614054, %v11297_v63  ;;  %v5222_v41 = vadd.f32 -1.4531521, %v5214_v62  ;;  %9449 = vpow2.f32 %v5312_v8  ;;  %vm5149_vm2 = vcmp.ge.f32.partialorder %v11254_v58, 0.0 }
 0x5c6   :  { %v5217_v24 = vmul.f32 1.0614054, %v11301_v11  ;;  %v5223_v18 = vadd.f32 -1.4531521, %v5215_v32  ;;  %v9432_v7 = vpop.eup %9431  ;;  %9451 = vpow2.f32 %v5314_v50  ;;  %vm5984_vm3 = vcmask 195584  }
 0x5c7   :  { %v5224_v21 = vadd.f32 -1.4531521, %v5216_v2  ;;  %v5230_v49 = vmul.f32 %v5222_v41, %v11292_v13  ;;  %v9434_v29 = vpop.eup %9433  ;;  %v5194_v40 = vmul.f32 %v9432_v7, %v5178_v23  ;;  %9453 = vpow2.f32 %v5316_v33 }
 0x5c8   :  { %v5225_v48 = vadd.f32 -1.4531521, %v5217_v24  ;;  %v5231_v59 = vmul.f32 %v5223_v18, %v11295_v38  ;;  %v9436_v14 = vpop.eup %9435  ;;  %v5195_v43 = vmul.f32 %v9434_v29, %v5179_v17 }
 0x5c9   :  { %v5232_v1 = vmul.f32 %v5224_v21, %v11297_v63  ;;  %v5238_v28 = vadd.f32 1.4214138, %v5230_v49  ;;  %v9438_v20 = vpop.eup %9437  ;;  %v5196_v47 = vmul.f32 %v9436_v14, %v5180_v37  ;;  %v5202_v12 = vsub.f32 2.0, %v5194_v40 }
 0x5ca   :  { %v5233_v60 = vmul.f32 %v5225_v48, %v11301_v11  ;;  %v5239_v9 = vadd.f32 1.4214138, %v5231_v59  ;;  %v9440_v51 = vpop.eup %9439  ;;  %v5197_v62 = vmul.f32 %v9438_v20, %v11290_v30  ;;  %v5203_v23 = vsub.f32 2.0, %v5195_v43 }
 0x5cb   :  { %v5240_v27 = vadd.f32 1.4214138, %v5232_v1  ;;  %v5246_v15 = vmul.f32 %v5238_v28, %v11292_v13  ;;  %v5204_v8 = vsub.f32 2.0, %v5196_v47  ;;  %v11324_v2 = vmul.f32 %v9432_v7, %v5202_v12  ;;  %v9442_v17 = vpop.eup %9441 }
 0x5cc   :  { %v5241_v54 = vadd.f32 1.4214138, %v5233_v60  ;;  %v5247_v44 = vmul.f32 %v5239_v9, %v11295_v38  ;;  %v5205_v24 = vsub.f32 2.0, %v5197_v62  ;;  %v11327_v37 = vmul.f32 %v9434_v29, %v5203_v23  ;;  %v9444_v18 = vpop.eup %9443 }
 0x5cd   :  { %v5248_v61 = vmul.f32 %v5240_v27, %v11297_v63  ;;  %v5254_v32 = vadd.f32 -0.28449672, %v5246_v15  ;;  %v11330_v49 = vmul.f32 %v9436_v14, %v5204_v8  ;;  %v5218_v30 = vmul.f32 1.0614054, %v11324_v2  ;;  %v9446_v48 = vpop.eup %9445 }
 0x5ce   :  { %v5249_v41 = vmul.f32 %v5241_v54, %v11301_v11  ;;  %v5255_v50 = vadd.f32 -0.28449672, %v5247_v44  ;;  %v11334_v1 = vmul.f32 %v9438_v20, %v5205_v24  ;;  %v5219_v28 = vmul.f32 1.0614054, %v11327_v37  ;;  %v11337_v40 = vpop.eup %9447 }
 0x5cf   :  { %v5256_v33 = vadd.f32 -0.28449672, %v5248_v61  ;;  %v5262_v21 = vmul.f32 %v5254_v32, %v11292_v13  ;;  %v5220_v9 = vmul.f32 1.0614054, %v11330_v49  ;;  %v5226_v43 = vadd.f32 -1.4531521, %v5218_v30  ;;  %v11341_v14 = vpop.eup %9449 }
 0x5d0   :  { %v5257_v59 = vadd.f32 -0.28449672, %v5249_v41  ;;  %v5263_v7 = vmul.f32 %v5255_v50, %v11295_v38  ;;  %v5221_v47 = vmul.f32 1.0614054, %v11334_v1  ;;  %v5227_v12 = vadd.f32 -1.4531521, %v5219_v28  ;;  %v11345_v20 = vpop.eup %9451 }
 0x5d1   :  { %v5264_v29 = vmul.f32 %v5256_v33, %v11297_v63  ;;  %v5270_v60 = vadd.f32 0.2548296, %v5262_v21  ;;  %v5228_v62 = vadd.f32 -1.4531521, %v5220_v9  ;;  %v5234_v23 = vmul.f32 %v5226_v43, %v11324_v2  ;;  %v11349_v61 = vpop.eup %9453 }
 0x5d2   :  { %v5265_v27 = vmul.f32 %v5257_v59, %v11301_v11  ;;  %v5271_v15 = vadd.f32 0.2548296, %v5263_v7  ;;  %v5229_v41 = vadd.f32 -1.4531521, %v5221_v47  ;;  %v5235_v50 = vmul.f32 %v5227_v12, %v11327_v37 }
 0x5d3   :  { %v5272_v54 = vadd.f32 0.2548296, %v5264_v29  ;;  %v5278_v44 = vmul.f32 %v5270_v60, %v11292_v13  ;;  %v5236_v21 = vmul.f32 %v5228_v62, %v11330_v49  ;;  %v5242_v30 = vadd.f32 1.4214138, %v5234_v23 }
 0x5d4   :  { %v5273_v32 = vadd.f32 0.2548296, %v5265_v27  ;;  %v5279_v8 = vmul.f32 %v5271_v15, %v11295_v38  ;;  %v5237_v7 = vmul.f32 %v5229_v41, %v11334_v1  ;;  %v5243_v28 = vadd.f32 1.4214138, %v5235_v50 }
 0x5d5   :  { %v5280_v24 = vmul.f32 %v5272_v54, %v11297_v63  ;;  %v5318_v33 = vmul.f32 %v9440_v51, %v5278_v44  ;;  %v5244_v38 = vadd.f32 1.4214138, %v5236_v21  ;;  %v5250_v9 = vmul.f32 %v5242_v30, %v11324_v2 }
 0x5d6   :  { %v5281_v13 = vmul.f32 %v5273_v32, %v11301_v11  ;;  %v5319_v59 = vmul.f32 %v9442_v17, %v5279_v8  ;;  %v5245_v63 = vadd.f32 1.4214138, %v5237_v7  ;;  %v5251_v51 = vmul.f32 %v5243_v28, %v11327_v37 }
 0x5d7   :  { %v5320_v29 = vmul.f32 %v9444_v18, %v5280_v24  ;;  %v5326_v60 = vsub.f32 1.0, %v5318_v33  ;;  %v5252_v12 = vmul.f32 %v5244_v38, %v11330_v49  ;;  %v5258_v11 = vadd.f32 -0.28449672, %v5250_v9 }
 0x5d8   :  { %v5321_v43 = vmul.f32 %v9446_v48, %v5281_v13  ;;  %v5327_v27 = vsub.f32 1.0, %v5319_v59  ;;  %v5253_v18 = vmul.f32 %v5245_v63, %v11334_v1  ;;  %v5259_v44 = vadd.f32 -0.28449672, %v5251_v51 }
 0x5d9   :  { %v5328_v15 = vsub.f32 1.0, %v5320_v29  ;;  %v5334_v47 = vmul.f32 %v5326_v60, %v11269_v16  ;;  %v5260_v23 = vadd.f32 -0.28449672, %v5252_v12  ;;  %v5266_v32 = vmul.f32 %v5258_v11, %v11324_v2 }
 0x5da   :  { %v5329_v17 = vsub.f32 1.0, %v5321_v43  ;;  %v5335_v54 = vmul.f32 %v5327_v27, %v11273_v35  ;;  %v5261_v41 = vadd.f32 -0.28449672, %v5253_v18  ;;  %v5267_v50 = vmul.f32 %v5259_v44, %v11327_v37 }
 0x5db   :  { %v5336_v48 = vmul.f32 %v5328_v15, %v11287_v55  ;;  %v5342_v62 = vadd.f32 1.0, %v5334_v47  ;;  %v5268_v33 = vmul.f32 %v5260_v23, %v11330_v49  ;;  %v5274_v21 = vadd.f32 0.2548296, %v5266_v32 }
 0x5dc   :  { %v5337_v8 = vmul.f32 %v5329_v17, %v11309_v22  ;;  %v5343_v16 = vadd.f32 1.0, %v5335_v54  ;;  %v5269_v13 = vmul.f32 %v5261_v41, %v11334_v1  ;;  %v5275_v22 = vadd.f32 0.2548296, %v5267_v50 }
 0x5dd   :  { %v5344_v35 = vadd.f32 1.0, %v5336_v48  ;;  %v11371_v24 = vmul.f32 %v5342_v62, %v11251_v31  ;;  %v5276_v7 = vadd.f32 0.2548296, %v5268_v33  ;;  %v5282_v28 = vmul.f32 %v5274_v21, %v11324_v2 }
 0x5de   :  { %v5345_v55 = vadd.f32 1.0, %v5337_v8  ;;  %v11375_v30 = vmul.f32 %v5343_v16, %v11258_v5  ;;  %v5155_v5 = vsel %vm5147_vm8, 1.0, %v13995_v56  ;;  %v5277_v60 = vadd.f32 0.2548296, %v5269_v13 }
 0x5df   :  { %v11379_v59 = vmul.f32 %v5344_v35, %v11261_v45  ;;  %5358 = vrot.lane.b32.xlu1 %v11371_v24, %s9592_s27  ;;  %v11386_v31 = vmul.f32 %v11279_v6, %v11371_v24  ;;  %v5283_v45 = vmul.f32 %v5275_v22, %v11327_v37  ;;  %v5284_v38 = vmul.f32 %v5276_v7, %v11330_v49 }
 0x5e0   :  { %v11389_v29 = vmul.f32 %v5345_v55, %v11264_v4  ;;  %v5322_v2 = vmul.f32 %v11337_v40, %v5282_v28  ;;  %v11399_v9 = vmul.f32 %v11226_v52, %v11375_v30  ;;  %v5285_v4 = vmul.f32 %v5277_v60, %v11334_v1 }
 0x5e1   :  { %v6025_v43 = vand.u32 4294901760, %v11386_v31  ;;  %v5323_v27 = vmul.f32 %v11341_v14, %v5283_v45  ;;  %v11410_v37 = vmul.f32 %v11284_v46, %v11379_v59  ;;  %v5324_v49 = vmul.f32 %v11345_v20, %v5284_v38 }
 0x5e2   :  { %v11406_v3 = vmul.f32 %v11240_v39, %v11389_v29  ;;  %v5330_v40 = vsub.f32 1.0, %v5322_v2  ;;  %v6023_v63 = vand.u32 4294901760, %v11399_v9  ;;  %v5325_v14 = vmul.f32 %v11349_v61, %v5285_v4 }
 0x5e3   :  { %5362 = vrot.lane.b32.xlu1 %v11375_v30, %s9592_s27  ;;  %v11419_v1 = vsub.f32 %v11386_v31, %v6025_v43  ;;  %v5331_v51 = vsub.f32 1.0, %v5323_v27  ;;  %v7033_v47 = vand.u32 4294901760, %v11410_v37  ;;  %v5156_v20 = vsel %vm5148_vm11, 1.0, %v13995_v56 }
 0x5e4   :  { %v7031_v15 = vand.u32 4294901760, %v11406_v3  ;;  %v5332_v12 = vsub.f32 1.0, %v5324_v49  ;;  %v5338_v11 = vmul.f32 %v5330_v40, %v11316_v26  ;;  %v11431_v17 = vsub.f32 %v11399_v9, %v6023_v63 }
 0x5e5   :  { %13998 = vst [vmem:[#allocation43_spill] sm:$0xff] %v11419_v1  ;;  %v5333_v54 = vsub.f32 1.0, %v5325_v14  ;;  %v5339_v18 = vmul.f32 %v5331_v51, %v5155_v5  ;;  %v11441_v53 = vsub.f32 %v11410_v37, %v7033_v47  ;;  %v5130_v44 = vmul.f32 0.5, %v11230_v42 }
 0x5e6   :  { %13999 = vst [vmem:[#allocation37_spill] sm:$0xff] %v11431_v17  ;;  %v11436_v61 = vsub.f32 %v11406_v3, %v7031_v15  ;;  %v5157_v26 = vsel %vm5149_vm2, 1.0, %v13995_v56  ;;  %v5340_v48 = vmul.f32 %v5332_v12, %v5156_v20  ;;  %v5346_v62 = vadd.f32 1.0, %v5338_v11 }
 0x5e7   :  { %14001 = vst [vmem:[#allocation53_spill] sm:$0xff] %v11441_v53  ;;  %5366 = vrot.lane.b32.xlu1 %v11379_v59, %s9592_s27  ;;  %v5131_v23 = vmul.f32 0.5, %v11232_v36  ;;  %v5341_v32 = vmul.f32 %v5333_v54, %v5157_v26  ;;  %v5347_v8 = vadd.f32 1.0, %v5339_v18  ;;  %v5132_v16 = vmul.f32 0.5, %v11234_v57 }
 0x5e8   :  { %14000 = vst [vmem:[#allocation46_spill] sm:$0xff] %v11436_v61  ;;  %v5348_v41 = vadd.f32 1.0, %v5340_v48  ;;  %v11451_v50 = vmul.f32 %v5346_v62, %v5130_v44  ;;  %v5133_v42 = vmul.f32 0.5, %v11236_v25  ;;  %v6224_v55 = vand.u32 4294901760, %v11431_v17 }
 0x5e9   :  { %v5349_v35 = vadd.f32 1.0, %v5341_v32  ;;  %v11454_v33 = vmul.f32 %v5347_v8, %v5131_v23  ;;  %v6230_v13 = vand.u32 4294901760, %v11419_v1  ;;  %v7238_v7 = vand.u32 4294901760, %v11441_v53 }
 0x5ea   :  { %v11456_v58 = vmul.f32 %v5348_v41, %v5132_v16  ;;  %5360 = vrot.lane.b32.xlu0 %v11451_v50, %s9592_s27  ;;  %v11464_v36 = vmul.f32 %v11279_v6, %v11451_v50  ;;  %v7232_v5 = vand.u32 4294901760, %v11436_v61  ;;  %v6225_v45 = vsub.f32 %v11431_v17, %v6224_v55 }
 0x5eb   :  { %5370 = vrot.lane.b32.xlu1 %v11389_v29, %s9592_s27  ;;  %v11466_v57 = vmul.f32 %v5349_v35, %v5133_v42  ;;  %v11470_v25 = vmul.f32 %v11226_v52, %v11454_v33  ;;  %v6231_v38 = vsub.f32 %v11419_v1, %v6230_v13  ;;  %v7239_v49 = vsub.f32 %v11441_v53, %v7238_v7 }
 0x5ec   :  { %v6029_v56 = vand.u32 4294901760, %v11464_v36  ;;  %v11475_v21 = vmul.f32 %v11284_v46, %v11456_v58  ;;  %v7233_v54 = vsub.f32 %v11436_v61, %v7232_v5  ;;  %v6226_v62 = vand.u32 4294901760, %v6225_v45 }
 0x5ed   :  { %v6027_v22 = vand.u32 4294901760, %v11470_v25  ;;  %v11482_v6 = vmul.f32 %v11240_v39, %v11466_v57  ;;  %v6232_v44 = vand.u32 4294901760, %v6231_v38  ;;  %v7240_v16 = vand.u32 4294901760, %v7239_v49 }
 0x5ee   :  { %5364 = vrot.lane.b32.xlu0 %v11454_v33, %s9592_s27  ;;  %v7037_v52 = vand.u32 4294901760, %v11475_v21  ;;  %v11499_v39 = vsub.f32 %v11464_v36, %v6029_v56  ;;  %v7234_v38 = vand.u32 4294901760, %v7233_v54 }
 0x5ef   :  { %5420 = vrot.lane.b32.xlu1 %v11371_v24, %s9587_s20  ;;  %v11493_v46 = vsub.f32 %v11470_v25, %v6027_v22  ;;  %v7035_v28 = vand.u32 4294901760, %v11482_v6 }
 0x5f0   :  { %14003 = vst [vmem:[#allocation55_spill] sm:$0xff] %v11499_v39  ;;  %v11505_v60 = vsub.f32 %v11475_v21, %v7037_v52  ;;  %v6242_v27 = vand.u32 4294901760, %v11499_v39  ;;  %v11727_v9 = vpack.c.bf16 %v7037_v52, %v7033_v47 }
 0x5f1   :  { %14002 = vst [vmem:[#allocation49_spill] sm:$0xff] %v11493_v46  ;;  %v11512_v2 = vsub.f32 %v11482_v6, %v7035_v28  ;;  %v6236_v4 = vand.u32 4294901760, %v11493_v46 }
 0x5f2   :  { %14004 = vst [vmem:[#allocation54_spill] sm:$0xff] %v11505_v60  ;;  %5368 = vrot.lane.b32.xlu0 %v11456_v58, %s9592_s27  ;;  %v7250_v40 = vand.u32 4294901760, %v11505_v60  ;;  %v6243_v11 = vsub.f32 %v11499_v39, %v6242_v27  ;;  %14019 = vst [vmem:[#allocation44_spill] sm:$0xff] %v11727_v9 }
 0x5f3   :  { %14005 = vst [vmem:[#allocation32_spill] sm:$0xff] %v11512_v2  ;;  %5424 = vrot.lane.b32.xlu1 %v11375_v30, %s9587_s20  ;;  %v6237_v12 = vsub.f32 %v11493_v46, %v6236_v4  ;;  %v7244_v18 = vand.u32 4294901760, %v11512_v2 }
 0x5f4   :  { %v7251_v26 = vsub.f32 %v11505_v60, %v7250_v40  ;;  %v6244_v32 = vand.u32 4294901760, %v6243_v11  ;;  %v11550_v11 = vpack.c.bf16 %v6242_v27, %v6230_v13  ;;  %v11558_v49 = vpack.c.bf16 %v7250_v40, %v7238_v7 }
 0x5f5   :  { %v6238_v23 = vand.u32 4294901760, %v6237_v12  ;;  %v7245_v8 = vsub.f32 %v11512_v2, %v7244_v18  ;;  %v11548_v12 = vpack.c.bf16 %v6236_v4, %v6224_v55  ;;  %v11552_v51 = vpack.c.bf16 %v7244_v18, %v7232_v5  ;;  %v5382_v55 = vld [vmem:[%s13414_s2] ss:$8 sm:$0xf] }
 0x5f6   :  { %5372 = vrot.lane.b32.xlu0 %v11466_v57, %s9592_s27  ;;  %v7252_v41 = vand.u32 4294901760, %v7251_v26  ;;  %v11542_v35 = vpack.c.bf16 %v6244_v32, %v6232_v44  ;;  %14011 = vst [vmem:[#allocation58_spill] sm:$0xff] %v11550_v11  ;;  %14013 = vst [vmem:[#allocation36_spill] sm:$0xff] %v11558_v49  ;;  %v5391_v7 = vrot.slane %v5382_v55, %v13993_v19 }
 0x5f7   :  { %5428 = vrot.lane.b32.xlu1 %v11379_v59, %s9587_s20  ;;  %v11540_v42 = vpack.c.bf16 %v6238_v23, %v6226_v62  ;;  %v7246_v20 = vand.u32 4294901760, %v7245_v8  ;;  %14010 = vst [vmem:[#allocation48_spill] sm:$0xff] %v11548_v12  ;;  %14012 = vst [vmem:[#allocation60_spill] sm:$0xff] %v11552_v51  ;;  %v5395_v40 = vrot.slane %v5382_v55, %v13997_v34 }
 0x5f8   :  { %14007 = vst [vmem:[#allocation40_spill] sm:$0xff] %v11542_v35  ;;  %v11544_v48 = vpack.c.bf16 %v7252_v41, %v7240_v16  ;;  %v11665_v18 = vrot.slane %v5382_v55, %v13996_v0  ;;  %v8044_v16 = vld [vmem:[%s13414_s2 + $0x1] ss:$8 sm:$0xf] }
 0x5f9   :  { %14006 = vst [vmem:[#allocation35_spill] sm:$0xff] %v11540_v42  ;;  %v11546_v45 = vpack.c.bf16 %v7246_v20, %v7234_v38  ;;  %v11737_v31 = vrot.slane %v8044_v16, %v13997_v34  ;;  %v11746_v47 = vrot.slane %v8044_v16, %v13996_v0  ;;  %v11749_v36 = vrot.slane %v8044_v16, %v13994_v10 }
 0x5fa   :  { %14008 = vst [vmem:[#allocation38_spill] sm:$0xff] %v11544_v48  ;;  %5422 = vrot.lane.b32.xlu0 %v11451_v50, %s9587_s20 }
 0x5fb   :  { %14009 = vst [vmem:[#allocation33_spill] sm:$0xff] %v11546_v45  ;;  %5432 = vrot.lane.b32.xlu1 %v11389_v29, %s9587_s20 }
 0x5fe   :  { %5426 = vrot.lane.b32.xlu0 %v11454_v33, %s9587_s20 }
 0x5ff   :  { %5482 = vrot.lane.b32.xlu1 %v11371_v24, %s9593_s29 }
 0x602   :  { %5430 = vrot.lane.b32.xlu0 %v11456_v58, %s9587_s20 }
 0x603   :  { %5486 = vrot.lane.b32.xlu1 %v11375_v30, %s9593_s29 }
 0x606   :  { %5434 = vrot.lane.b32.xlu0 %v11466_v57, %s9587_s20 }
 0x607   :  { %5490 = vrot.lane.b32.xlu1 %v11379_v59, %s9593_s29 }
 0x60a   :  { %5484 = vrot.lane.b32.xlu0 %v11451_v50, %s9593_s29 }
 0x60b   :  { %5494 = vrot.lane.b32.xlu1 %v11389_v29, %s9593_s29 }
 0x60e   :  { %5488 = vrot.lane.b32.xlu0 %v11454_v33, %s9593_s29 }
 0x60f   :  { %5544 = vrot.lane.b32.xlu1 %v11371_v24, %s9594_s30 }
 0x612   :  { %5492 = vrot.lane.b32.xlu0 %v11456_v58, %s9593_s29 }
 0x613   :  { %5548 = vrot.lane.b32.xlu1 %v11375_v30, %s9594_s30 }
 0x616   :  { %5496 = vrot.lane.b32.xlu0 %v11466_v57, %s9593_s29 }
 0x617   :  { %5552 = vrot.lane.b32.xlu1 %v11379_v59, %s9594_s30 }
 0x61a   :  { %5546 = vrot.lane.b32.xlu0 %v11451_v50, %s9594_s30 }
 0x61b   :  { %5556 = vrot.lane.b32.xlu1 %v11389_v29, %s9594_s30 }
 0x61e   :  { %5550 = vrot.lane.b32.xlu0 %v11454_v33, %s9594_s30 }
 0x61f   :  { %5644 = vrot.lane.b32.xlu1 %v11371_v24, %s9595_s4 }
 0x622   :  { %5554 = vrot.lane.b32.xlu0 %v11456_v58, %s9594_s30 }
 0x623   :  { %5648 = vrot.lane.b32.xlu1 %v11375_v30, %s9595_s4 }
 0x626   :  { %5558 = vrot.lane.b32.xlu0 %v11466_v57, %s9594_s30 }
 0x627   :  { %5652 = vrot.lane.b32.xlu1 %v11379_v59, %s9595_s4 }
 0x62a   :  { %5646 = vrot.lane.b32.xlu0 %v11451_v50, %s9595_s4 }
 0x62b   :  { %5656 = vrot.lane.b32.xlu1 %v11389_v29, %s9595_s4 }
 0x62e   :  { %5650 = vrot.lane.b32.xlu0 %v11454_v33, %s9595_s4 }
 0x62f   :  { %5706 = vrot.lane.b32.xlu1 %v11371_v24, %s9596_s28 }
 0x632   :  { %5654 = vrot.lane.b32.xlu0 %v11456_v58, %s9595_s4 }
 0x633   :  { %5710 = vrot.lane.b32.xlu1 %v11375_v30, %s9596_s28 }
 0x636   :  { %5658 = vrot.lane.b32.xlu0 %v11466_v57, %s9595_s4 }
 0x637   :  { %5714 = vrot.lane.b32.xlu1 %v11379_v59, %s9596_s28 }
 0x63a   :  { %5708 = vrot.lane.b32.xlu0 %v11451_v50, %s9596_s28 }
 0x63b   :  { %5718 = vrot.lane.b32.xlu1 %v11389_v29, %s9596_s28 }
 0x63e   :  { %5712 = vrot.lane.b32.xlu0 %v11454_v33, %s9596_s28 }
 0x63f   :  { %5768 = vrot.lane.b32.xlu1 %v11371_v24, %s9597_s9 }
 0x642   :  { %5716 = vrot.lane.b32.xlu0 %v11456_v58, %s9596_s28 }
 0x643   :  { %5772 = vrot.lane.b32.xlu1 %v11375_v30, %s9597_s9 }
 0x646   :  { %5720 = vrot.lane.b32.xlu0 %v11466_v57, %s9596_s28 }
 0x647   :  { %5776 = vrot.lane.b32.xlu1 %v11379_v59, %s9597_s9 }
 0x64a   :  { %5770 = vrot.lane.b32.xlu0 %v11451_v50, %s9597_s9 }
 0x64b   :  { %5780 = vrot.lane.b32.xlu1 %v11389_v29, %s9597_s9 }
 0x64e   :  { %5774 = vrot.lane.b32.xlu0 %v11454_v33, %s9597_s9 }
 0x64f   :  { %5830 = vrot.lane.b32.xlu1 %v11371_v24, %s9598_s10 }
 0x651   :  { %v5359_v13 = vpop.permute.xlu1 %5358 }
 0x652   :  { %5778 = vrot.lane.b32.xlu0 %v11456_v58, %s9597_s9 }
 0x653   :  { %5834 = vrot.lane.b32.xlu1 %v11375_v30, %s9598_s10 }
 0x655   :  { %v5363_v5 = vpop.permute.xlu1 %5362 }
 0x656   :  { %v5378_v27 = vsel %vm338_vm9, %v5359_v13, %v5363_v5  ;;  %5782 = vrot.lane.b32.xlu0 %v11466_v57, %s9597_s9 }
 0x657   :  { %v11656_v24 = vmul.f32 %v5391_v7, %v5378_v27  ;;  %5838 = vrot.lane.b32.xlu1 %v11379_v59, %s9598_s10  ;;  %v11677_v59 = vrot.slane %v5382_v55, %v13994_v10  ;;  %v8045_v55 = vld [vmem:[%s13414_s2 + $0x2] ss:$8 sm:$0xf] }
 0x658   :  { %v5897_v27 = vld [vmem:[#allocation8 + $0x8] sm:$0xff] }
 0x659   :  { %v5991_v20 = vand.u32 4294901760, %v11656_v24  ;;  %v5367_v54 = vpop.permute.xlu1 %5366 }
 0x65a   :  { %v5376_v30 = vsel %vm338_vm9, %v5363_v5, %v5367_v54  ;;  %5832 = vrot.lane.b32.xlu0 %v11451_v50, %s9598_s10  ;;  %v11721_v5 = vpack.c.bf16 %v6029_v56, %v6025_v43  ;;  %v8046_v43 = vld [vmem:[%s13414_s2 + $0x3] ss:$8 sm:$0xf]  ;;  %v11752_v56 = vrot.slane %v8045_v55, %v13993_v19 }
 0x65b   :  { %v11670_v44 = vsub.f32 %v11656_v24, %v5991_v20  ;;  %v11672_v26 = vmul.f32 %v5395_v40, %v5376_v30  ;;  %5842 = vrot.lane.b32.xlu1 %v11389_v29, %s9598_s10  ;;  %v11770_v24 = vrot.slane %v8045_v55, %v13996_v0 }
 0x65c   :  { %v11679_v62 = vpop.permute.xlu0 %5360  ;;  %14018 = vst [vmem:[#allocation57_spill] sm:$0xff] %v11721_v5 }
 0x65d   :  { %v13546_v23 = vand.u32 4294901760, %v11672_v26  ;;  %v5371_v32 = vpop.permute.xlu1 %5370 }
 0x65e   :  { %v5374_v8 = vsel %vm338_vm9, %v5367_v54, %v5371_v32  ;;  %v5380_v50 = vsel %vm338_vm9, %v5371_v32, %v5359_v13  ;;  %5836 = vrot.lane.b32.xlu0 %v11454_v33, %s9598_s10  ;;  %v11709_v33 = vpack.c.bf16 %v6027_v22, %v6023_v63  ;;  %v11715_v13 = vpack.c.bf16 %v7035_v28, %v7031_v15 }
 0x65f   :  { %v11694_v29 = vsub.f32 %v11672_v26, %v13546_v23  ;;  %v11697_v41 = vmul.f32 %v11665_v18, %v5380_v50  ;;  %v11700_v38 = vmul.f32 %v11677_v59, %v5374_v8  ;;  %v11734_v15 = vrot.slane %v8044_v16, %v13993_v19  ;;  %v8048_v16 = vld [vmem:[%s13414_s2 + $0x5] ss:$8 sm:$0xf] }
 0x660   :  { %14016 = vst [vmem:[#allocation41_spill] sm:$0xff] %v11709_v33  ;;  %14017 = vst [vmem:[#allocation47_spill] sm:$0xff] %v11715_v13  ;;  %v5365_v63 = vpop.permute.xlu0 %5364  ;;  %v11767_v28 = vrot.slane %v8045_v55, %v13997_v34  ;;  %v11779_v8 = vrot.slane %v8046_v43, %v13997_v34  ;;  %v11782_v50 = vrot.slane %v8046_v43, %v13996_v0 }
 0x661   :  { %14015 = vst [vmem:[#allocation39_spill] sm:$0xff] %v11694_v29  ;;  %v13548_v25 = vand.u32 4294901760, %v11697_v41  ;;  %v13547_v3 = vand.u32 4294901760, %v11700_v38  ;;  %v11731_v22 = vpop.permute.xlu1 %5420  ;;  %v5379_v37 = vsel %vm338_vm9, %v11679_v62, %v5365_v63  ;;  %v11794_v23 = vrot.slane %v8046_v43, %v13994_v10 }
 0x662   :  { %v5409_v21 = vmul.f32 %v5391_v7, %v5379_v37  ;;  %5840 = vrot.lane.b32.xlu0 %v11456_v58, %s9598_s10  ;;  %v11773_v7 = vrot.slane %v8045_v55, %v13994_v10  ;;  %v11776_v58 = vrot.slane %v8046_v43, %v13993_v19  ;;  %v5986_v55 = vsel %vm5984_vm3, %v5897_v27, 0 }
 0x663   :  { %v11759_v6 = vsub.f32 %v11697_v41, %v13548_v25  ;;  %v11764_v52 = vsub.f32 %v11700_v38, %v13547_v3  ;;  %v11796_v3 = vand.u32 4294901760, %v5986_v55  ;;  %v11809_v11 = vrot.slane %v8048_v16, %v13996_v0 }
 0x664   :  { %v5995_v54 = vand.u32 4294901760, %v5409_v21  ;;  %v5369_v30 = vpop.permute.xlu0 %5368  ;;  %v11812_v43 = vrot.slane %v8048_v16, %v13993_v19  ;;  %v14028_v1 = vand.u32 4294901760, %v11697_v41 }
 0x665   :  { %14020 = vst [vmem:[#allocation50_spill] sm:$0xff] %v11764_v52  ;;  %v5425_v32 = vpop.permute.xlu1 %5424  ;;  %v5377_v37 = vsel %vm338_vm9, %v5365_v63, %v5369_v30  ;;  %14021 = vst [vmem:[#allocation52_spill] sm:$0xff] %v11796_v3 }
 0x666   :  { %v5440_v14 = vsel %vm381_vm10, %v11731_v22, %v5425_v32  ;;  %v11798_v25 = vsub.f32 %v5409_v21, %v5995_v54  ;;  %v5410_v49 = vmul.f32 %v5395_v40, %v5377_v37  ;;  %5844 = vrot.lane.b32.xlu0 %v11466_v57, %s9598_s10  ;;  %v11802_v51 = vpack.c.bf16 %v5995_v54, %v5991_v20 }
 0x667   :  { %v11806_v63 = vmul.f32 %v11734_v15, %v5440_v14  ;;  %v11815_v21 = vsub.f32 %v5986_v55, %v11796_v3  ;;  %v11819_v20 = vrot.slane %v8048_v16, %v13997_v34  ;;  %v11822_v14 = vrot.slane %v8048_v16, %v13994_v10 }
 0x668   :  { %14022 = vst [vmem:[#allocation34_spill] sm:$0xff] %v11802_v51  ;;  %v7005_v40 = vand.u32 4294901760, %v5410_v49  ;;  %v5373_v37 = vpop.permute.xlu0 %5372  ;;  %8755 = vmatprep.subr.bf16.mxu0 %v11802_v51  ;;  %v14025_v54 = vand.u32 4294901760, %v11670_v44 }
 0x669   :  { %14023 = vst [vmem:[#allocation56_spill] sm:$0xff] %v11815_v21  ;;  %v5429_v57 = vpop.permute.xlu1 %5428  ;;  %v5375_v27 = vsel %vm338_vm9, %v5369_v30, %v5373_v37  ;;  %v5381_v55 = vsel %vm338_vm9, %v5373_v37, %v11679_v62  ;;  %v13554_v12 = vand.u32 4294901760, %v11806_v63 }
 0x66a   :  { %v5438_v51 = vsel %vm381_vm10, %v5425_v32, %v5429_v57  ;;  %v11833_v53 = vsub.f32 %v5410_v49, %v7005_v40  ;;  %v5408_v60 = vmul.f32 %v11665_v18, %v5381_v55  ;;  %v5411_v16 = vmul.f32 %v11677_v59, %v5375_v27 }
 0x66b   :  { %v6129_v61 = vsub.f32 %v11670_v44, %v14025_v54  ;;  %v11844_v62 = vsub.f32 %v11806_v63, %v13554_v12  ;;  %v11847_v37 = vmul.f32 %v11737_v31, %v5438_v51  ;;  %v11850_v49 = vand.u32 4294901760, %v11815_v21 }
 0x66c   :  { %14024 = vst [vmem:[#allocation59_spill] sm:$0xff] %v11833_v53  ;;  %v5997_v59 = vand.u32 4294901760, %v5408_v60  ;;  %v7003_v32 = vand.u32 4294901760, %v5411_v16  ;;  %v11853_v27 = vpop.permute.xlu0 %5422  ;;  %v14027_v55 = vand.u32 4294901760, %v11798_v25  ;;  %v14031_v12 = vand.u32 4294901760, %v11700_v38 }
 0x66d   :  { %14026 = vst [vmem:[#allocation28_spill] sm:$0xff] %v11850_v49  ;;  %v5433_v54 = vpop.permute.xlu1 %5432  ;;  %v6096_v18 = vsub.f32 %v11815_v21, %v11850_v49 }
 0x66e   :  { %v6141_v30 = vsub.f32 %v11798_v25, %v14027_v55  ;;  %v5436_v51 = vsel %vm381_vm10, %v5429_v57, %v5433_v54  ;;  %v5442_v2 = vsel %vm381_vm10, %v5433_v54, %v11731_v22  ;;  %v11868_v39 = vpack.c.bf16 %v5997_v59, %v14028_v1 }
 0x66f   :  { %v11870_v17 = vsub.f32 %v5408_v60, %v5997_v59  ;;  %v11872_v46 = vsub.f32 %v5411_v16, %v7003_v32  ;;  %v6130_v55 = vand.u32 4294901760, %v6129_v61  ;;  %v11876_v48 = vpack.c.bf16 %v7003_v32, %v14031_v12 }
 0x670   :  { %14029 = vst [vmem:[#allocation42_spill] sm:$0xff] %v11868_v39  ;;  %v14033_v57 = vand.u32 4294901760, %v11847_v37  ;;  %v11884_v54 = vmul.f32 %v11746_v47, %v5442_v2  ;;  %v11887_v1 = vmul.f32 %v11749_v36, %v5436_v51  ;;  %v14035_v60 = vand.u32 4294901760, %v11672_v26  ;;  %v5427_v38 = vpop.permute.xlu0 %5426  ;;  %8757 = vmatpush1.bf16.msra.mxu0 %v11868_v39 }
 0x671   :  { %14030 = vst [vmem:[#allocation45_spill] sm:$0xff] %v11872_v46  ;;  %14032 = vst [vmem:[#allocation51_spill] sm:$0xff] %v11876_v48  ;;  %v13564_v61 = vand.u32 4294901760, %v11870_v17  ;;  %v11895_v12 = vpop.permute.xlu1 %5482  ;;  %v6097_v16 = vand.u32 4294901760, %v6096_v18  ;;  %v6142_v59 = vand.u32 4294901760, %v6141_v30  ;;  %v14037_v32 = vand.u32 4294901760, %v11759_v6  ;;  %8971 = vmatprep.subr.bf16.mxu1 %v11876_v48 }
 0x672   :  { %v11881_v22 = vsub.f32 %v11847_v37, %v14033_v57  ;;  %v11891_v41 = vpack.c.bf16 %v7005_v40, %v14035_v60  ;;  %v5441_v51 = vsel %vm381_vm10, %v11853_v27, %v5427_v38  ;;  %v6001_v26 = vand.u32 4294901760, %v11884_v54 }
 0x673   :  { %v6135_v2 = vsub.f32 %v11759_v6, %v14037_v32  ;;  %v13567_v40 = vand.u32 4294901760, %v11887_v1  ;;  %v6147_v57 = vsub.f32 %v11870_v17, %v13564_v61  ;;  %v5471_v30 = vmul.f32 %v11734_v15, %v5441_v51  ;;  %6098 = vmatprep.mubr.f32.mxu0 %v6097_v16  ;;  %7106 = vmatprep.mubr.f32.mxu1 %v6097_v16 }
 0x674   :  { %14034 = vst [vmem:[#allocation61_spill] sm:$0xff] %v11881_v22  ;;  %14036 = vst [vmem:[#allocation62_spill] sm:$0xff] %v11891_v41  ;;  %8973 = vmatpush1.bf16.msra.mxu1 %v11891_v41  ;;  %v11911_v18 = vpack.c.bf16 %v6142_v59, %v6130_v55  ;;  %v11916_v49 = vsub.f32 %v11884_v54, %v6001_v26  ;;  %v14040_v15 = vand.u32 4294901760, %v11694_v29  ;;  %v5431_v51 = vpop.permute.xlu0 %5430  ;;  %v14041_v16 = vand.u32 4294901760, %v11844_v62 }
 0x675   :  { %v11921_v48 = vsub.f32 %v11887_v1, %v13567_v40  ;;  %v6003_v59 = vand.u32 4294901760, %v5471_v30  ;;  %v5487_v60 = vpop.permute.xlu1 %5486  ;;  %v6148_v32 = vand.u32 4294901760, %v6147_v57  ;;  %v5439_v41 = vsel %vm381_vm10, %v5427_v38, %v5431_v51 }
 0x676   :  { %14038 = vst [vmem:[#allocation30_spill] sm:$0xff] %v11916_v49  ;;  %v11927_v55 = vsub.f32 %v11694_v29, %v14040_v15  ;;  %v5502_v40 = vsel %vm425_vm13, %v11895_v12, %v5487_v60  ;;  %v6136_v61 = vand.u32 4294901760, %v6135_v2  ;;  %v6153_v39 = vsub.f32 %v11844_v62, %v14041_v16 }
 0x677   :  { %14039 = vst [vmem:[#allocation31_spill] sm:$0xff] %v11921_v48  ;;  %v11938_v15 = vsub.f32 %v5471_v30, %v6003_v59  ;;  %v5472_v21 = vmul.f32 %v11737_v31, %v5439_v41  ;;  %v14042_v57 = vand.u32 4294901760, %v11806_v63  ;;  %v11946_v54 = vmul.f32 %v11752_v56, %v5502_v40 }
 0x678   :  { %v14044_v38 = vand.u32 4294901760, %v11833_v53  ;;  %v11952_v42 = vpack.c.bf16 %v6148_v32, %v6136_v61  ;;  %v14045_v30 = vand.u32 4294901760, %v11764_v52  ;;  %v5435_v41 = vpop.permute.xlu0 %5434  ;;  %v6154_v3 = vand.u32 4294901760, %v6153_v39 }
 0x679   :  { %v11943_v45 = vpack.c.bf16 %v6003_v59, %v14042_v57  ;;  %v7013_v31 = vand.u32 4294901760, %v5472_v21  ;;  %v5491_v40 = vpop.permute.xlu1 %5490  ;;  %v14046_v57 = vand.u32 4294901760, %v11872_v46  ;;  %v5437_v32 = vsel %vm381_vm10, %v5431_v51, %v5435_v41 }
 0x67a   :  { %v7155_v35 = vsub.f32 %v11833_v53, %v14044_v38  ;;  %v7137_v16 = vsub.f32 %v11764_v52, %v14045_v30  ;;  %v5443_v30 = vsel %vm381_vm10, %v5435_v41, %v11853_v27  ;;  %v5500_v2 = vsel %vm425_vm13, %v5487_v60, %v5491_v40 }
 0x67b   :  { %14043 = vst [vmem:[#allocation63_spill] sm:$0xff] %v11943_v45  ;;  %8759 = vmatprep.subr.bf16.mxu0 %v11943_v45  ;;  %v7149_v38 = vsub.f32 %v11872_v46, %v14046_v57  ;;  %v11971_v63 = vsub.f32 %v5472_v21, %v7013_v31  ;;  %v5470_v59 = vmul.f32 %v11746_v47, %v5443_v30  ;;  %v14048_v57 = vand.u32 4294901760, %v11946_v54 }
 0x67c   :  { %v5473_v45 = vmul.f32 %v11749_v36, %v5437_v32  ;;  %v11981_v51 = vmul.f32 %v11767_v28, %v5500_v2  ;;  %v14050_v27 = vand.u32 4294901760, %v11938_v15  ;;  %v7138_v60 = vand.u32 4294901760, %v7137_v16  ;;  %v11990_v39 = vpop.permute.xlu0 %5484 }
 0x67d   :  { %14047 = vst [vmem:[#allocation64_spill] sm:$0xff] %v11971_v63  ;;  %v11978_v61 = vsub.f32 %v11946_v54, %v14048_v57  ;;  %v14051_v21 = vand.u32 4294901760, %v11847_v37  ;;  %v6005_v47 = vand.u32 4294901760, %v5470_v59  ;;  %v5495_v32 = vpop.permute.xlu1 %5494  ;;  %v7150_v30 = vand.u32 4294901760, %v7149_v38 }
 0x67e   :  { %v6165_v41 = vsub.f32 %v11938_v15, %v14050_v27  ;;  %v7011_v36 = vand.u32 4294901760, %v5473_v45  ;;  %v13582_v57 = vand.u32 4294901760, %v11981_v51  ;;  %v5498_v2 = vsel %vm425_vm13, %v5491_v40, %v5495_v32 }
 0x67f   :  { %14049 = vst [vmem:[#allocation65_spill] sm:$0xff] %v11978_v61  ;;  %v11988_v53 = vpack.c.bf16 %v7013_v31, %v14051_v21  ;;  %v5504_v27 = vsel %vm425_vm13, %v5495_v32, %v11895_v12  ;;  %v11998_v29 = vpack.c.bf16 %v6005_v47, %v6001_v26  ;;  %v12000_v37 = vsub.f32 %v5470_v59, %v6005_v47 }
 0x680   :  { %v6166_v16 = vand.u32 4294901760, %v6165_v41  ;;  %v12002_v31 = vsub.f32 %v5473_v45, %v7011_v36  ;;  %v7144_v21 = vand.u32 4294901760, %v11927_v55  ;;  %v14056_v38 = vand.u32 4294901760, %v11887_v1  ;;  %v5489_v59 = vpop.permute.xlu0 %5488 }
 0x681   :  { %14052 = vst [vmem:[#allocation66_spill] sm:$0xff] %v11988_v53  ;;  %14053 = vst [vmem:[#allocation20_spill] sm:$0xff] %v11998_v29  ;;  %v12012_v40 = vsub.f32 %v11981_v51, %v13582_v57  ;;  %v12015_v12 = vmul.f32 %v11770_v24, %v5504_v27  ;;  %v12018_v26 = vmul.f32 %v11773_v7, %v5498_v2  ;;  %v13585_v45 = vand.u32 4294901760, %v12000_v37  ;;  %v12022_v55 = vpop.permute.xlu1 %5544 }
 0x682   :  { %14054 = vst [vmem:[#allocation24_spill] sm:$0xff] %v12000_v37  ;;  %14055 = vst [vmem:[#allocation21_spill] sm:$0xff] %v12002_v31  ;;  %v12007_v46 = vpack.c.bf16 %v7011_v36, %v14056_v38  ;;  %8761 = vmatpush1.bf16.msra.mxu0 %v11998_v29  ;;  %v12024_v1 = vpack.c.bf16 %v6166_v16, %v6154_v3  ;;  %v12026_v41 = vpack.c.bf16 %v7150_v30, %v7138_v60 }
 0x683   :  { %14058 = vst [vmem:[#allocation22_spill] sm:$0xff] %v12012_v40  ;;  %v7156_v47 = vand.u32 4294901760, %v7155_v35  ;;  %v14059_v36 = vand.u32 4294901760, %v11916_v49  ;;  %v5503_v2 = vsel %vm425_vm13, %v11990_v39, %v5489_v59  ;;  %v6009_v27 = vand.u32 4294901760, %v12015_v12 }
 0x684   :  { %14057 = vst [vmem:[#allocation25_spill] sm:$0xff] %v12007_v46  ;;  %8975 = vmatprep.subr.bf16.mxu1 %v12007_v46  ;;  %v7015_v38 = vand.u32 4294901760, %v12018_v26  ;;  %v6171_v3 = vsub.f32 %v12000_v37, %v13585_v45  ;;  %v5533_v35 = vmul.f32 %v11752_v56, %v5503_v2  ;;  %v14062_v45 = vand.u32 4294901760, %v11881_v22 }
 0x685   :  { %v6159_v32 = vsub.f32 %v11916_v49, %v14059_v36  ;;  %8977 = vmatpush1.bf16.msra.mxu1 %v11988_v53  ;;  %v12042_v60 = vpack.c.bf16 %v7156_v47, %v7144_v21  ;;  %v12047_v36 = vsub.f32 %v12015_v12, %v6009_v27  ;;  %v5493_v21 = vpop.permute.xlu0 %5492  ;;  %v5549_v47 = vpop.permute.xlu1 %5548  ;;  %v14063_v46 = vand.u32 4294901760, %v11978_v61 }
 0x686   :  { %v12050_v57 = vsub.f32 %v12018_v26, %v7015_v38  ;;  %v12056_v56 = vsub.f32 %v11881_v22, %v14062_v45  ;;  %v6011_v2 = vand.u32 4294901760, %v5533_v35  ;;  %v6172_v53 = vand.u32 4294901760, %v6171_v3 }
 0x687   :  { %14060 = vst [vmem:[#allocation26_spill] sm:$0xff] %v12047_v36  ;;  %v5501_v12 = vsel %vm425_vm13, %v5489_v59, %v5493_v21  ;;  %v5564_v26 = vsel %vm469_vm14, %v12022_v55, %v5549_v47  ;;  %v6160_v16 = vand.u32 4294901760, %v6159_v32  ;;  %v6177_v29 = vsub.f32 %v11978_v61, %v14063_v46 }
 0x688   :  { %14061 = vst [vmem:[#allocation23_spill] sm:$0xff] %v12050_v57  ;;  %v12067_v45 = vsub.f32 %v5533_v35, %v6011_v2  ;;  %v5534_v22 = vmul.f32 %v11767_v28, %v5501_v12  ;;  %v14065_v3 = vand.u32 4294901760, %v11946_v54  ;;  %v12075_v30 = vmul.f32 %v11776_v58, %v5564_v26 }
 0x689   :  { %v14067_v59 = vand.u32 4294901760, %v11971_v63  ;;  %v12081_v52 = vpack.c.bf16 %v6172_v53, %v6160_v16  ;;  %v14068_v46 = vand.u32 4294901760, %v11921_v48  ;;  %v5497_v12 = vpop.permute.xlu0 %5496 }
 0x68a   :  { %14064 = vst [vmem:[#allocation27_spill] sm:$0xff] %v12067_v45  ;;  %v12072_v37 = vpack.c.bf16 %v6011_v2, %v14065_v3  ;;  %v7021_v28 = vand.u32 4294901760, %v5534_v22  ;;  %v5553_v2 = vpop.permute.xlu1 %5552  ;;  %v14069_v3 = vand.u32 4294901760, %v12002_v31  ;;  %v5499_v16 = vsel %vm425_vm13, %v5493_v21, %v5497_v12 }
 0x68b   :  { %v7179_v49 = vsub.f32 %v11971_v63, %v14067_v59  ;;  %v7161_v35 = vsub.f32 %v11921_v48, %v14068_v46  ;;  %v5505_v46 = vsel %vm425_vm13, %v5497_v12, %v11990_v39  ;;  %v5562_v32 = vsel %vm469_vm14, %v5549_v47, %v5553_v2 }
 0x68c   :  { %14066 = vst [vmem:[#allocation17_spill] sm:$0xff] %v12072_v37  ;;  %8763 = vmatprep.subr.bf16.mxu0 %v12072_v37  ;;  %v7173_v59 = vsub.f32 %v12002_v31, %v14069_v3  ;;  %v12100_v54 = vsub.f32 %v5534_v22, %v7021_v28  ;;  %v5532_v26 = vmul.f32 %v11770_v24, %v5505_v46  ;;  %v6178_v63 = vand.u32 4294901760, %v6177_v29 }
 0x68d   :  { %v5535_v37 = vmul.f32 %v11773_v7, %v5499_v16  ;;  %v14071_v3 = vand.u32 4294901760, %v12075_v30  ;;  %v12110_v21 = vmul.f32 %v11779_v8, %v5562_v32  ;;  %v14073_v39 = vand.u32 4294901760, %v12067_v45  ;;  %v12119_v29 = vpop.permute.xlu0 %5546 }
 0x68e   :  { %14070 = vst [vmem:[#allocation19_spill] sm:$0xff] %v12100_v54  ;;  %v7162_v47 = vand.u32 4294901760, %v7161_v35  ;;  %v14074_v22 = vand.u32 4294901760, %v11981_v51  ;;  %v6013_v24 = vand.u32 4294901760, %v5532_v26  ;;  %v5557_v16 = vpop.permute.xlu1 %5556  ;;  %v7174_v46 = vand.u32 4294901760, %v7173_v59 }
 0x68f   :  { %v12107_v53 = vsub.f32 %v12075_v30, %v14071_v3  ;;  %v6189_v12 = vsub.f32 %v12067_v45, %v14073_v39  ;;  %v7019_v7 = vand.u32 4294901760, %v5535_v37  ;;  %v13608_v3 = vand.u32 4294901760, %v12110_v21 }
 0x690   :  { %v12117_v31 = vpack.c.bf16 %v7021_v28, %v14074_v22  ;;  %v5560_v32 = vsel %vm469_vm14, %v5553_v2, %v5557_v16  ;;  %v5566_v39 = vsel %vm469_vm14, %v5557_v16, %v12022_v55  ;;  %v12127_v48 = vpack.c.bf16 %v6013_v24, %v6009_v27 }
 0x691   :  { %14072 = vst [vmem:[#allocation16_spill] sm:$0xff] %v12107_v53  ;;  %v6190_v35 = vand.u32 4294901760, %v6189_v12  ;;  %v12129_v51 = vsub.f32 %v5532_v26, %v6013_v24  ;;  %v12131_v28 = vsub.f32 %v5535_v37, %v7019_v7  ;;  %v7168_v22 = vand.u32 4294901760, %v12056_v56  ;;  %v5551_v26 = vpop.permute.xlu0 %5550 }
 0x692   :  { %14075 = vst [vmem:[#allocation18_spill] sm:$0xff] %v12117_v31  ;;  %14076 = vst [vmem:[#allocation29_spill] sm:$0xff] %v12127_v48  ;;  %v12134_v45 = vpack.c.bf16 %v7019_v7, %v7015_v38  ;;  %v12139_v59 = vsub.f32 %v12110_v21, %v13608_v3  ;;  %v12142_v2 = vmul.f32 %v11782_v50, %v5566_v39  ;;  %8765 = vmatpush1.bf16.msra.mxu0 %v12127_v48  ;;  %v12149_v37 = vpop.permute.xlu1 %5644 }
 0x693   :  { %14077 = vst [vmem:[#allocation67_spill] sm:$0xff] %v12129_v51  ;;  %14078 = vst [vmem:[#allocation68_spill] sm:$0xff] %v12131_v28  ;;  %v12145_v55 = vmul.f32 %v11794_v23, %v5560_v32  ;;  %v13611_v27 = vand.u32 4294901760, %v12129_v51  ;;  %v12151_v38 = vpack.c.bf16 %v6190_v35, %v6178_v63  ;;  %v12153_v56 = vpack.c.bf16 %v7174_v46, %v7162_v47 }
 0x694   :  { %14079 = vst [vmem:[#allocation69_spill] sm:$0xff] %v12134_v45  ;;  %14080 = vst [vmem:[#allocation70_spill] sm:$0xff] %v12139_v59  ;;  %v7180_v12 = vand.u32 4294901760, %v7179_v49  ;;  %v14081_v24 = vand.u32 4294901760, %v12047_v36  ;;  %v5565_v16 = vsel %vm469_vm14, %v12119_v29, %v5551_v26  ;;  %8979 = vmatprep.subr.bf16.mxu1 %v12134_v45  ;;  %v6017_v32 = vand.u32 4294901760, %v12142_v2 }
 0x695   :  { %v7023_v39 = vand.u32 4294901760, %v12145_v55  ;;  %v6195_v49 = vsub.f32 %v12129_v51, %v13611_v27  ;;  %v5595_v47 = vmul.f32 %v11776_v58, %v5565_v16  ;;  %8981 = vmatpush1.bf16.msra.mxu1 %v12117_v31  ;;  %v14085_v45 = vand.u32 4294901760, %v12012_v40  ;;  %v5555_v16 = vpop.permute.xlu0 %5554 }
 0x696   :  { %v6183_v7 = vsub.f32 %v12047_v36, %v14081_v24  ;;  %v12170_v46 = vpack.c.bf16 %v7180_v12, %v7168_v22  ;;  %v12173_v35 = vsub.f32 %v12142_v2, %v6017_v32  ;;  %v5649_v31 = vpop.permute.xlu1 %5648  ;;  %v5563_v2 = vsel %vm469_vm14, %v5551_v26, %v5555_v16 }
 0x697   :  { %v12176_v24 = vsub.f32 %v12145_v55, %v7023_v39  ;;  %v12183_v27 = vsub.f32 %v12012_v40, %v14085_v45  ;;  %v6019_v58 = vand.u32 4294901760, %v5595_v47  ;;  %v6196_v22 = vand.u32 4294901760, %v6195_v49 }
 0x698   :  { %14082 = vst [vmem:[#allocation71_spill] sm:$0xff] %v12170_v46  ;;  %14083 = vst [vmem:[#allocation72_spill] sm:$0xff] %v12173_v35  ;;  %v5664_v63 = vsel %vm544_vm0, %v12149_v37, %v5649_v31  ;;  %v6184_v3 = vand.u32 4294901760, %v6183_v7  ;;  %v5596_v45 = vmul.f32 %v11779_v8, %v5563_v2  ;;  %v14087_v40 = vand.u32 4294901760, %v12075_v30 }
 0x699   :  { %14084 = vst [vmem:[#allocation73_spill] sm:$0xff] %v12176_v24  ;;  %v12192_v48 = vsub.f32 %v5595_v47, %v6019_v58  ;;  %v12200_v49 = vmul.f32 %v11809_v11, %v5664_v63  ;;  %v14089_v26 = vand.u32 4294901760, %v12100_v54  ;;  %v14091_v7 = vand.u32 4294901760, %v12107_v53 }
 0x69a   :  { %v12197_v46 = vpack.c.bf16 %v6019_v58, %v14087_v40  ;;  %v12207_v12 = vpack.c.bf16 %v6196_v22, %v6184_v3  ;;  %v14092_v8 = vand.u32 4294901760, %v12050_v57  ;;  %v7029_v40 = vand.u32 4294901760, %v5596_v45  ;;  %v5559_v58 = vpop.permute.xlu0 %5558  ;;  %v5653_v2 = vpop.permute.xlu1 %5652 }
 0x69b   :  { %14086 = vst [vmem:[#allocation74_spill] sm:$0xff] %v12192_v48  ;;  %v12205_v55 = vsub.f32 %v12100_v54, %v14089_v26  ;;  %v6201_v47 = vsub.f32 %v12107_v53, %v14091_v7  ;;  %v14093_v3 = vand.u32 4294901760, %v12131_v28  ;;  %v5561_v7 = vsel %vm469_vm14, %v5555_v16, %v5559_v58 }
 0x69c   :  { %14088 = vst [vmem:[#allocation75_spill] sm:$0xff] %v12197_v46  ;;  %14090 = vst [vmem:[#allocation76_spill] sm:$0xff] %v12207_v12  ;;  %v7185_v30 = vsub.f32 %v12050_v57, %v14092_v8  ;;  %8767 = vmatprep.subr.bf16.mxu0 %v12197_v46  ;;  %v5567_v8 = vsel %vm469_vm14, %v5559_v58, %v12119_v29  ;;  %v5662_v46 = vsel %vm544_vm0, %v5649_v31, %v5653_v2 }
 0x69d   :  { %v7197_v22 = vsub.f32 %v12131_v28, %v14093_v3  ;;  %v12229_v63 = vsub.f32 %v5596_v45, %v7029_v40  ;;  %v14095_v26 = vand.u32 4294901760, %v12173_v35  ;;  %v5594_v3 = vmul.f32 %v11782_v50, %v5567_v8 }
 0x69e   :  { %v5597_v12 = vmul.f32 %v11794_v23, %v5561_v7  ;;  %v14096_v28 = vand.u32 4294901760, %v12200_v49  ;;  %v12242_v29 = vmul.f32 %v11812_v43, %v5662_v46  ;;  %v6202_v58 = vand.u32 4294901760, %v6201_v47  ;;  %v12244_v53 = vpop.permute.xlu0 %5646  ;;  %v5657_v51 = vpop.permute.xlu1 %5656 }
 0x69f   :  { %14094 = vst [vmem:[#allocation77_spill] sm:$0xff] %v12229_v63  ;;  %v6207_v54 = vsub.f32 %v12173_v35, %v14095_v26  ;;  %v7186_v31 = vand.u32 4294901760, %v7185_v30  ;;  %v6021_v45 = vand.u32 4294901760, %v5594_v3  ;;  %v14098_v26 = vand.u32 4294901760, %v12192_v48 }
 0x6a0   :  { %v12239_v16 = vsub.f32 %v12200_v49, %v14096_v28  ;;  %v7027_v57 = vand.u32 4294901760, %v5597_v12  ;;  %v7198_v23 = vand.u32 4294901760, %v7197_v22  ;;  %v14099_v7 = vand.u32 4294901760, %v12110_v21 }
 0x6a1   :  { %v6213_v50 = vsub.f32 %v12192_v48, %v14098_v26  ;;  %v13634_v28 = vand.u32 4294901760, %v12242_v29  ;;  %v5660_v46 = vsel %vm544_vm0, %v5653_v2, %v5657_v51  ;;  %v5666_v47 = vsel %vm544_vm0, %v5657_v51, %v12149_v37 }
 0x6a2   :  { %14097 = vst [vmem:[#allocation78_spill] sm:$0xff] %v12239_v16  ;;  %v12251_v8 = vpack.c.bf16 %v7029_v40, %v14099_v7  ;;  %v13636_v30 = vand.u32 4294901760, %v12229_v63  ;;  %v12260_v35 = vpack.c.bf16 %v6021_v45, %v6017_v32  ;;  %v12262_v36 = vsub.f32 %v5594_v3, %v6021_v45  ;;  %v5651_v32 = vpop.permute.xlu0 %5650 }
 0x6a3   :  { %v12264_v22 = vsub.f32 %v5597_v12, %v7027_v57  ;;  %v12266_v21 = vpack.c.bf16 %v7027_v57, %v7023_v39  ;;  %v12271_v40 = vsub.f32 %v12242_v29, %v13634_v28  ;;  %v12274_v2 = vmul.f32 %v11819_v20, %v5660_v46  ;;  %v12282_v57 = vpop.permute.xlu1 %5706  ;;  %v14225_v48 = vld [vmem:[#allocation76_spill] sm:$0xff] }
 0x6a4   :  { %14100 = vst [vmem:[#allocation79_spill] sm:$0xff] %v12251_v8  ;;  %14101 = vst [vmem:[#allocation80_spill] sm:$0xff] %v12260_v35  ;;  %v7192_v51 = vand.u32 4294901760, %v12183_v27  ;;  %v13635_v37 = vand.u32 4294901760, %v12262_v36  ;;  %8769 = vmatpush1.bf16.msra.mxu0 %v12260_v35  ;;  %v12280_v12 = vmul.f32 %v11822_v14, %v5666_v47  ;;  %v6214_v39 = vand.u32 4294901760, %v6213_v50 }
 0x6a5   :  { %14102 = vst [vmem:[#allocation81_spill] sm:$0xff] %v12262_v36  ;;  %14103 = vst [vmem:[#allocation82_spill] sm:$0xff] %v12264_v22  ;;  %v12284_v3 = vpack.c.bf16 %v7198_v23, %v7186_v31  ;;  %v5665_v45 = vsel %vm544_vm0, %v12244_v53, %v5651_v32  ;;  %8983 = vmatprep.subr.bf16.mxu1 %v12266_v21  ;;  %8771 = vmatprep.subr.bf16.mxu0 %v11709_v33  ;;  %v7041_v27 = vand.u32 4294901760, %v12274_v2 }
 0x6a6   :  { %14104 = vst [vmem:[#allocation83_spill] sm:$0xff] %v12266_v21  ;;  %14105 = vst [vmem:[#allocation84_spill] sm:$0xff] %v12271_v40  ;;  %v7204_v26 = vand.u32 4294901760, %v12205_v55  ;;  %v6219_v50 = vsub.f32 %v12262_v36, %v13635_v37  ;;  %v5694_v31 = vmul.f32 %v11809_v11, %v5665_v45  ;;  %8985 = vmatpush1.bf16.msra.mxu1 %v12251_v8  ;;  %v7039_v23 = vand.u32 4294901760, %v12280_v12  ;;  %v5655_v45 = vpop.permute.xlu0 %5654  ;;  %v14256_v36 = vld [vmem:[#allocation33_spill] sm:$0xff] }
 0x6a7   :  { %v12300_v46 = vpack.c.bf16 %v6214_v39, %v6202_v58  ;;  %v7227_v47 = vsub.f32 %v12229_v63, %v13636_v30  ;;  %8987 = vmatprep.subr.bf16.mxu1 %v11715_v13  ;;  %v12307_v55 = vsub.f32 %v12274_v2, %v7041_v27  ;;  %v5711_v39 = vpop.permute.xlu1 %5710  ;;  %v14110_v30 = vand.u32 4294901760, %v12176_v24 }
 0x6a8   :  { %v12309_v28 = vpack.c.bf16 %v7204_v26, %v7192_v51  ;;  %v6037_v11 = vand.u32 4294901760, %v5694_v31  ;;  %8773 = vmatpush1.bf16.msra.mxu0 %v11721_v5  ;;  %v12314_v58 = vsub.f32 %v12280_v12, %v7039_v23  ;;  %v6220_v7 = vand.u32 4294901760, %v6219_v50 }
 0x6a9   :  { %14106 = vst [vmem:[#allocation85_spill] sm:$0xff] %v12300_v46  ;;  %14107 = vst [vmem:[#allocation86_spill] sm:$0xff] %v12307_v55  ;;  %v7209_v13 = vsub.f32 %v12176_v24, %v14110_v30  ;;  %v5663_v2 = vsel %vm544_vm0, %v5651_v32, %v5655_v45  ;;  %v6208_v51 = vand.u32 4294901760, %v6207_v54  ;;  %v14111_v26 = vand.u32 4294901760, %v12139_v59 }
 0x6aa   :  { %14108 = vst [vmem:[#allocation87_spill] sm:$0xff] %v12309_v28  ;;  %14109 = vst [vmem:[#allocation88_spill] sm:$0xff] %v12314_v58  ;;  %v12324_v8 = vsub.f32 %v5694_v31, %v6037_v11  ;;  %v5695_v5 = vmul.f32 %v11812_v43, %v5663_v2  ;;  %8989 = vmatpush1.bf16.msra.mxu1 %v11727_v9  ;;  %v14114_v50 = vand.u32 4294901760, %v12264_v22  ;;  %v5659_v54 = vpop.permute.xlu0 %5658  ;;  %v7228_v28 = vand.u32 4294901760, %v7227_v47 }
 0x6ab   :  { %v7215_v37 = vsub.f32 %v12139_v59, %v14111_v26  ;;  %v12328_v12 = vpack.c.bf16 %v6220_v7, %v6208_v51  ;;  %v5715_v21 = vpop.permute.xlu1 %5714  ;;  %v7210_v35 = vand.u32 4294901760, %v7209_v13  ;;  %v5661_v43 = vsel %vm544_vm0, %v5655_v45, %v5659_v54 }
 0x6ac   :  { %14112 = vst [vmem:[#allocation89_spill] sm:$0xff] %v12324_v8  ;;  %v7221_v30 = vsub.f32 %v12264_v22, %v14114_v50  ;;  %v6035_v32 = vand.u32 4294901760, %v5695_v5  ;;  %v5667_v7 = vsel %vm544_vm0, %v5659_v54, %v12244_v53  ;;  %v5696_v26 = vmul.f32 %v11819_v20, %v5661_v43 }
 0x6ad   :  { %14113 = vst [vmem:[#allocation90_spill] sm:$0xff] %v12328_v12  ;;  %v5697_v50 = vmul.f32 %v11822_v14, %v5667_v7  ;;  %v7216_v33 = vand.u32 4294901760, %v7215_v37  ;;  %v14116_v13 = vand.u32 4294901760, %v12242_v29  ;;  %v14119_v45 = vand.u32 4294901760, %v12200_v49 }
 0x6ae   :  { %v7222_v2 = vand.u32 4294901760, %v7221_v30  ;;  %v12340_v51 = vsub.f32 %v5695_v5, %v6035_v32  ;;  %v7045_v53 = vand.u32 4294901760, %v5696_v26  ;;  %v5709_v30 = vpop.permute.xlu0 %5708  ;;  %v14122_v20 = vand.u32 4294901760, %v12239_v16 }
 0x6af   :  { %v12346_v47 = vpack.c.bf16 %v6035_v32, %v14116_v13  ;;  %v12352_v9 = vpack.c.bf16 %v6037_v11, %v14119_v45  ;;  %v7043_v12 = vand.u32 4294901760, %v5697_v50  ;;  %v5719_v5 = vpop.permute.xlu1 %5718  ;;  %v12354_v54 = vpack.c.bf16 %v7228_v28, %v7216_v33 }
 0x6b0   :  { %14115 = vst [vmem:[#allocation91_spill] sm:$0xff] %v12340_v51  ;;  %v12348_v31 = vpack.c.bf16 %v7222_v2, %v7210_v35  ;;  %v6255_v14 = vsub.f32 %v12239_v16, %v14122_v20  ;;  %v14123_v29 = vand.u32 4294901760, %v12324_v8  ;;  %v8049_v35 = vld [vmem:[%s13414_s2 + $0x6] ss:$8 sm:$0xf]  ;;  %v13653_v49 = vand.u32 4294901760, %v12271_v40 }
 0x6b1   :  { %14117 = vst [vmem:[#allocation92_spill] sm:$0xff] %v12346_v47  ;;  %14120 = vst [vmem:[#allocation94_spill] sm:$0xff] %v12352_v9  ;;  %8775 = vmatprep.subr.bf16.mxu0 %v12346_v47  ;;  %v12367_v11 = vpack.c.bf16 %v7045_v53, %v7041_v27  ;;  %v12369_v33 = vsub.f32 %v5697_v50, %v7043_v12  ;;  %v12371_v28 = vsub.f32 %v5696_v26, %v7045_v53  ;;  %v14232_v61 = vld [vmem:[#allocation85_spill] sm:$0xff] }
 0x6b2   :  { %14118 = vst [vmem:[#allocation93_spill] sm:$0xff] %v12348_v31  ;;  %14121 = vst [vmem:[#allocation95_spill] sm:$0xff] %v12354_v54  ;;  %v6267_v37 = vsub.f32 %v12324_v8, %v14123_v29  ;;  %8777 = vmatpush1.bf16.msra.mxu0 %v12352_v9  ;;  %v12374_v32 = vpack.c.bf16 %v7043_v12, %v7039_v23  ;;  %v5735_v43 = vrot.slane %v8049_v35, %v13996_v0  ;;  %v5713_v7 = vpop.permute.xlu0 %5712 }
 0x6b3   :  { %14124 = vst [vmem:[#allocation96_spill] sm:$0xff] %v12367_v11  ;;  %14125 = vst [vmem:[#allocation97_spill] sm:$0xff] %v12369_v33  ;;  %v5739_v2 = vrot.slane %v8049_v35, %v13993_v19  ;;  %v12379_v13 = vpop.permute.xlu1 %5768  ;;  %v13660_v27 = vand.u32 4294901760, %v12340_v51  ;;  %v5727_v50 = vsel %vm588_vm12, %v5709_v30, %v5713_v7  ;;  %v6249_v23 = vsub.f32 %v12271_v40, %v13653_v49 }
 0x6b4   :  { %14126 = vst [vmem:[#allocation98_spill] sm:$0xff] %v12371_v28  ;;  %14127 = vst [vmem:[#allocation99_spill] sm:$0xff] %v12374_v32  ;;  %8991 = vmatprep.subr.bf16.mxu1 %v12374_v32  ;;  %v6256_v12 = vand.u32 4294901760, %v6255_v14  ;;  %v6268_v26 = vand.u32 4294901760, %v6267_v37  ;;  %v5726_v45 = vsel %vm588_vm12, %v12282_v57, %v5711_v39  ;;  %v5724_v53 = vsel %vm588_vm12, %v5711_v39, %v5715_v21 }
 0x6b5   :  { %8993 = vmatpush1.bf16.msra.mxu1 %v12367_v11  ;;  %v6261_v20 = vsub.f32 %v12340_v51, %v13660_v27  ;;  %v5743_v29 = vrot.slane %v8049_v35, %v13997_v34  ;;  %v5747_v11 = vrot.slane %v8049_v35, %v13994_v10  ;;  %v5722_v49 = vsel %vm588_vm12, %v5715_v21, %v5719_v5 }
 0x6b6   :  { %v12400_v14 = vpack.c.bf16 %v6268_v26, %v6256_v12  ;;  %v12402_v37 = vmul.f32 %v5735_v43, %v5727_v50  ;;  %v5717_v32 = vpop.permute.xlu0 %5716  ;;  %v5728_v39 = vsel %vm588_vm12, %v5719_v5, %v12282_v57  ;;  %v13661_v27 = vand.u32 4294901760, %v12369_v33 }
 0x6b7   :  { %v5773_v9 = vpop.permute.xlu1 %5772  ;;  %v6262_v47 = vand.u32 4294901760, %v6261_v20  ;;  %v12408_v54 = vmul.f32 %v5735_v43, %v5726_v45  ;;  %v12410_v31 = vmul.f32 %v5739_v2, %v5724_v53  ;;  %v5725_v21 = vsel %vm588_vm12, %v5713_v7, %v5717_v32 }
 0x6b8   :  { %14128 = vst [vmem:[#allocation100_spill] sm:$0xff] %v12400_v14  ;;  %v6250_v35 = vand.u32 4294901760, %v6249_v23  ;;  %v12414_v12 = vmul.f32 %v5739_v2, %v5725_v21  ;;  %v13662_v50 = vand.u32 4294901760, %v12314_v58  ;;  %v12417_v26 = vmul.f32 %v5743_v29, %v5722_v49 }
 0x6b9   :  { %v12419_v14 = vmul.f32 %v5747_v11, %v5728_v39  ;;  %v7269_v7 = vsub.f32 %v12369_v33, %v13661_v27  ;;  %v13665_v2 = vand.u32 4294901760, %v12408_v54  ;;  %v13664_v49 = vand.u32 4294901760, %v12410_v31  ;;  %v14248_v22 = vld [vmem:[#allocation93_spill] sm:$0xff] }
 0x6ba   :  { %v12421_v57 = vpack.c.bf16 %v6262_v47, %v6250_v35  ;;  %v13663_v45 = vand.u32 4294901760, %v12414_v12  ;;  %v5721_v53 = vpop.permute.xlu0 %5720  ;;  %v13668_v39 = vand.u32 4294901760, %v12371_v28  ;;  %v7257_v27 = vsub.f32 %v12314_v58, %v13662_v50 }
 0x6bb   :  { %v5777_v20 = vpop.permute.xlu1 %5776  ;;  %v5723_v47 = vsel %vm588_vm12, %v5717_v32, %v5721_v53  ;;  %v5729_v23 = vsel %vm588_vm12, %v5721_v53, %v5709_v30  ;;  %v14131_v30 = vand.u32 4294901760, %v12402_v37  ;;  %v7270_v50 = vand.u32 4294901760, %v7269_v7 }
 0x6bc   :  { %14129 = vst [vmem:[#allocation101_spill] sm:$0xff] %v12421_v57  ;;  %v12436_v21 = vmul.f32 %v5743_v29, %v5723_v47  ;;  %v12438_v35 = vmul.f32 %v5747_v11, %v5729_v23  ;;  %v12449_v32 = vpack.c.bf16 %v13663_v45, %v13664_v49  ;;  %v14133_v5 = vand.u32 4294901760, %v12307_v55 }
 0x6bd   :  { %v12455_v11 = vpack.c.bf16 %v14131_v30, %v13665_v2  ;;  %v7275_v45 = vsub.f32 %v12371_v28, %v13668_v39  ;;  %v14134_v30 = vand.u32 4294901760, %v12417_v26  ;;  %v14136_v7 = vand.u32 4294901760, %v12419_v14 }
 0x6be   :  { %14130 = vst [vmem:[#allocation102_spill] sm:$0xff] %v12449_v32  ;;  %v13670_v29 = vand.u32 4294901760, %v12438_v35  ;;  %v13669_v53 = vand.u32 4294901760, %v12436_v21  ;;  %v5771_v47 = vpop.permute.xlu0 %5770  ;;  %v7263_v43 = vsub.f32 %v12307_v55, %v14133_v5  ;;  %8779 = vmatprep.subr.bf16.mxu0 %v12449_v32  ;;  %v7258_v5 = vand.u32 4294901760, %v7257_v27 }
 0x6bf   :  { %14132 = vst [vmem:[#allocation103_spill] sm:$0xff] %v12455_v11  ;;  %v5781_v23 = vpop.permute.xlu1 %5780  ;;  %8781 = vmatpush1.bf16.msra.mxu0 %v12455_v11  ;;  %v8050_v32 = vld [vmem:[%s13414_s2 + $0x7] ss:$8 sm:$0xf]  ;;  %v7276_v28 = vand.u32 4294901760, %v7275_v45 }
 0x6c0   :  { %v12470_v49 = vpack.c.bf16 %v13669_v53, %v14134_v30  ;;  %v12477_v2 = vpack.c.bf16 %v13670_v29, %v14136_v7  ;;  %v12485_v30 = vpack.c.bf16 %v7270_v50, %v7258_v5  ;;  %v5801_v7 = vrot.slane %v8050_v32, %v13993_v19  ;;  %v5896_v5 = vld [vmem:[#allocation8] sm:$0xff] }
 0x6c1   :  { %v5797_v27 = vrot.slane %v8050_v32, %v13996_v0  ;;  %v5786_v29 = vsel %vm632_vm1, %v5773_v9, %v5777_v20  ;;  %v7264_v11 = vand.u32 4294901760, %v7263_v43  ;;  %v5809_v50 = vrot.slane %v8050_v32, %v13994_v10 }
 0x6c2   :  { %14135 = vst [vmem:[#allocation104_spill] sm:$0xff] %v12470_v49  ;;  %14137 = vst [vmem:[#allocation105_spill] sm:$0xff] %v12477_v2  ;;  %v5775_v39 = vpop.permute.xlu0 %5774  ;;  %8995 = vmatprep.subr.bf16.mxu1 %v12477_v2  ;;  %v5788_v2 = vsel %vm632_vm1, %v12379_v13, %v5773_v9  ;;  %v5790_v33 = vsel %vm632_vm1, %v5781_v23, %v12379_v13  ;;  %v12506_v43 = vmul.f32 %v5801_v7, %v5786_v29 }
 0x6c3   :  { %v12483_v57 = vpop.permute.xlu1 %5830  ;;  %14138 = vst [vmem:[#allocation106_spill] sm:$0xff] %v12485_v30  ;;  %v5789_v53 = vsel %vm632_vm1, %v5771_v47, %v5775_v39  ;;  %8997 = vmatpush1.bf16.msra.mxu1 %v12470_v49  ;;  %v5805_v49 = vrot.slane %v8050_v32, %v13997_v34  ;;  %v12504_v58 = vpack.c.bf16 %v7276_v28, %v7264_v11  ;;  %v12516_v32 = vand.u32 4294901760, %v5896_v5 }
 0x6c4   :  { %v12498_v30 = vmul.f32 %v5797_v27, %v5789_v53  ;;  %v5784_v9 = vsel %vm632_vm1, %v5777_v20, %v5781_v23  ;;  %v12512_v53 = vmul.f32 %v5797_v27, %v5788_v2  ;;  %v12518_v46 = vmul.f32 %v5809_v50, %v5790_v33 }
 0x6c5   :  { %14139 = vst [vmem:[#allocation107_spill] sm:$0xff] %v12504_v58  ;;  %14140 = vst [vmem:[#allocation108_spill] sm:$0xff] %v12516_v32  ;;  %v12522_v11 = vmul.f32 %v5805_v49, %v5784_v9  ;;  %v12535_v27 = vsub.f32 %v5896_v5, %v12516_v32  ;;  %v14152_v58 = vand.u32 4294901760, %v12410_v31 }
 0x6c6   :  { %v5779_v55 = vpop.permute.xlu0 %5778  ;;  %v13690_v28 = vand.u32 4294901760, %v12498_v30  ;;  %v13694_v23 = vand.u32 4294901760, %v12512_v53 }
 0x6c7   :  { %v5787_v45 = vsel %vm632_vm1, %v5775_v39, %v5779_v55  ;;  %v5835_v8 = vpop.permute.xlu1 %5834  ;;  %v13691_v39 = vand.u32 4294901760, %v12506_v43  ;;  %14142 = vst [vmem:[#allocation110_spill] sm:$0xff] %v12535_v27 }
 0x6c8   :  { %v12514_v16 = vmul.f32 %v5801_v7, %v5787_v45  ;;  %v13698_v45 = vand.u32 4294901760, %v12518_v46 }
 0x6ca   :  { %v13689_v13 = vand.u32 4294901760, %v12514_v16  ;;  %v5783_v29 = vpop.permute.xlu0 %5782 }
 0x6cb   :  { %v5785_v20 = vsel %vm632_vm1, %v5779_v55, %v5783_v29  ;;  %v5791_v2 = vsel %vm632_vm1, %v5783_v29, %v5771_v47  ;;  %v5839_v55 = vpop.permute.xlu1 %5838  ;;  %v13693_v47 = vand.u32 4294901760, %v12522_v11 }
 0x6cc   :  { %v12530_v7 = vmul.f32 %v5805_v49, %v5785_v20  ;;  %v12532_v33 = vmul.f32 %v5809_v50, %v5791_v2  ;;  %v12542_v9 = vpack.c.bf16 %v13689_v13, %v13691_v39  ;;  %v12548_v49 = vpack.c.bf16 %v13690_v28, %v13694_v23  ;;  %v8051_v28 = vld [vmem:[%s13414_s2 + $0x20] ss:$8 sm:$0xf] }
 0x6cd   :  { %v14145_v20 = vand.u32 4294901760, %v12408_v54  ;;  %v5859_v23 = vrot.slane %v8051_v28, %v13996_v0 }
 0x6ce   :  { %14141 = vst [vmem:[#allocation109_spill] sm:$0xff] %v12532_v33  ;;  %14143 = vst [vmem:[#allocation111_spill] sm:$0xff] %v12542_v9  ;;  %v13697_v50 = vand.u32 4294901760, %v12532_v33  ;;  %v13692_v5 = vand.u32 4294901760, %v12530_v7  ;;  %v5833_v29 = vpop.permute.xlu0 %5832  ;;  %8783 = vmatprep.subr.bf16.mxu0 %v12542_v9 }
 0x6cf   :  { %14144 = vst [vmem:[#allocation112_spill] sm:$0xff] %v12548_v49  ;;  %v12557_v2 = vsub.f32 %v12408_v54, %v14145_v20  ;;  %8785 = vmatpush1.bf16.msra.mxu0 %v12548_v49  ;;  %v12576_v54 = vand.u32 4294901760, %v12535_v27  ;;  %v14150_v20 = vand.u32 4294901760, %v12402_v37  ;;  %v5843_v9 = vpop.permute.xlu1 %5842 }
 0x6d0   :  { %v12563_v13 = vpack.c.bf16 %v13692_v5, %v13693_v47  ;;  %v12573_v39 = vpack.c.bf16 %v13697_v50, %v13698_v45  ;;  %v5863_v50 = vrot.slane %v8051_v28, %v13993_v19  ;;  %v5867_v45 = vrot.slane %v8051_v28, %v13997_v34  ;;  %v12605_v34 = vld [vmem:[#allocation3 + $0x8] sm:$0xff] }
 0x6d1   :  { %14146 = vst [vmem:[#allocation113_spill] sm:$0xff] %v12557_v2  ;;  %14149 = vst [vmem:[#allocation116_spill] sm:$0xff] %v12576_v54  ;;  %v12581_v5 = vsub.f32 %v12402_v37, %v14150_v20  ;;  %v5848_v37 = vsel %vm676_vm15, %v5835_v8, %v5839_v55  ;;  %v5871_v20 = vrot.slane %v8051_v28, %v13994_v10  ;;  %v12608_v32 = vand.u32 4294901760, %v12605_v34 }
 0x6d2   :  { %14147 = vst [vmem:[#allocation114_spill] sm:$0xff] %v12563_v13  ;;  %14148 = vst [vmem:[#allocation115_spill] sm:$0xff] %v12573_v39  ;;  %v5837_v47 = vpop.permute.xlu0 %5836  ;;  %8999 = vmatprep.subr.bf16.mxu1 %v12573_v39  ;;  %v6102_v0 = vsub.f32 %v12535_v27, %v12576_v54  ;;  %v5850_v19 = vsel %vm676_vm15, %v12483_v57, %v5835_v8  ;;  %v14156_v10 = vand.u32 4294901760, %v12414_v12 }
 0x6d3   :  { %14151 = vst [vmem:[#allocation117_spill] sm:$0xff] %v12581_v5  ;;  %v5851_v49 = vsel %vm676_vm15, %v5833_v29, %v5837_v47  ;;  %9001 = vmatpush1.bf16.msra.mxu1 %v12563_v13  ;;  %v12600_v13 = vsub.f32 %v12410_v31, %v14152_v58  ;;  %14154 = vst [vmem:[#allocation119_spill] sm:$0xff] %v12605_v34  ;;  %v5852_v58 = vsel %vm676_vm15, %v5843_v9, %v12483_v57  ;;  %v12620_v31 = vld [vmem:[#allocation3] sm:$0xff] }
 0x6d4   :  { %14155 = vst [vmem:[#allocation120_spill] sm:$0xff] %v12608_v32  ;;  %v12613_v28 = vsub.f32 %v12414_v12, %v14156_v10  ;;  %v12615_v39 = vmul.f32 %v5859_v23, %v5851_v49  ;;  %14158 = vst [vmem:[#allocation122_spill] sm:$0xff] %v12620_v31  ;;  %v12623_v8 = vand.u32 4294901760, %v12620_v31  ;;  %v12625_v27 = vmul.f32 %v5863_v50, %v5848_v37  ;;  %v12631_v49 = vld [vmem:[#allocation3 + $0x18] sm:$0xff] }
 0x6d5   :  { %14153 = vst [vmem:[#allocation118_spill] sm:$0xff] %v12600_v13  ;;  %v5846_v12 = vsel %vm676_vm15, %v5839_v55, %v5843_v9  ;;  %14160 = vst [vmem:[#allocation124_spill] sm:$0xff] %v12631_v49  ;;  %v12634_v10 = vand.u32 4294901760, %v12631_v49  ;;  %v14161_v57 = vand.u32 4294901760, %v12557_v2  ;;  %v12641_v31 = vmul.f32 %v5859_v23, %v5850_v19 }
 0x6d6   :  { %14157 = vst [vmem:[#allocation121_spill] sm:$0xff] %v12613_v28  ;;  %v5841_v54 = vpop.permute.xlu0 %5840  ;;  %14159 = vst [vmem:[#allocation123_spill] sm:$0xff] %v12623_v8  ;;  %v12645_v51 = vand.u32 4294901760, %v6102_v0  ;;  %v14162_v40 = vand.u32 4294901760, %v12581_v5  ;;  %v14163_v55 = vand.u32 4294901760, %v12417_v26  ;;  %v12655_v63 = vmul.f32 %v5871_v20, %v5852_v58 }
 0x6d7   :  { %v5849_v34 = vsel %vm676_vm15, %v5837_v47, %v5841_v54  ;;  %v12639_v33 = vsub.f32 %v12557_v2, %v14161_v57  ;;  %v5899_v47 = vld [vmem:[#allocation8 + $0x18] sm:$0xff]  ;;  %v12660_v0 = vmul.f32 %v5867_v45, %v5846_v12  ;;  %v13724_v12 = vand.u32 4294901760, %v12641_v31 }
 0x6d8   :  { %v12643_v37 = vmul.f32 %v5863_v50, %v5849_v34  ;;  %v6291_v9 = vsub.f32 %v12581_v5, %v14162_v40  ;;  %v12653_v49 = vsub.f32 %v12417_v26, %v14163_v55  ;;  %v5989_v58 = vsel %vm5984_vm3, %v5899_v47, 0  ;;  %v5898_v50 = vld [vmem:[#allocation8 + $0x10] sm:$0xff] }
 0x6d9   :  { %v14165_v55 = vand.u32 4294901760, %v12512_v53  ;;  %v14166_v40 = vand.u32 4294901760, %v12436_v21 }
 0x6da   :  { %14164 = vst [vmem:[#allocation125_spill] sm:$0xff] %v12653_v49  ;;  %v5845_v19 = vpop.permute.xlu0 %5844  ;;  %v14169_v47 = vand.u32 4294901760, %v12643_v37 }
 0x6db   :  { %v5847_v5 = vsel %vm676_vm15, %v5841_v54, %v5845_v19  ;;  %v5853_v26 = vsel %vm676_vm15, %v5845_v19, %v5833_v29  ;;  %v12672_v57 = vsub.f32 %v12512_v53, %v14165_v55  ;;  %v12682_v54 = vsub.f32 %v12436_v21, %v14166_v40 }
 0x6dc   :  { %v12675_v23 = vmul.f32 %v5867_v45, %v5847_v5  ;;  %v12677_v34 = vmul.f32 %v5871_v20, %v5853_v26  ;;  %v14168_v29 = vand.u32 4294901760, %v12625_v27  ;;  %v12691_v19 = vand.u32 4294901760, %v5989_v58 }
 0x6dd   :  { %14167 = vst [vmem:[#allocation126_spill] sm:$0xff] %v12682_v54  ;;  %v14172_v45 = vand.u32 4294901760, %v12615_v39  ;;  %v13731_v20 = vand.u32 4294901760, %v12660_v0  ;;  %v14174_v26 = vand.u32 4294901760, %v12600_v13  ;;  %v14178_v21 = vand.u32 4294901760, %v12506_v43 }
 0x6de   :  { %v12689_v53 = vpack.c.bf16 %v14169_v47, %v14168_v29  ;;  %14171 = vst [vmem:[#allocation128_spill] sm:$0xff] %v12691_v19  ;;  %v14175_v29 = vand.u32 4294901760, %v12613_v28  ;;  %v12710_v4 = vsub.f32 %v5989_v58, %v12691_v19  ;;  %v14181_v58 = vand.u32 4294901760, %v12655_v63 }
 0x6df   :  { %v12697_v5 = vpack.c.bf16 %v14172_v45, %v13724_v12  ;;  %v6273_v55 = vsub.f32 %v12600_v13, %v14174_v26  ;;  %v12712_v45 = vand.u32 4294901760, %v5898_v50  ;;  %v12718_v40 = vsub.f32 %v12506_v43, %v14178_v21 }
 0x6e0   :  { %14170 = vst [vmem:[#allocation127_spill] sm:$0xff] %v12689_v53  ;;  %8787 = vmatprep.subr.bf16.mxu0 %v12689_v53  ;;  %v6285_v47 = vsub.f32 %v12613_v28, %v14175_v29  ;;  %14176 = vst [vmem:[#allocation130_spill] sm:$0xff] %v12710_v4  ;;  %v14179_v26 = vand.u32 4294901760, %v12675_v23  ;;  %v14182_v29 = vand.u32 4294901760, %v12677_v34  ;;  %v14184_v12 = vand.u32 4294901760, %v12419_v14 }
 0x6e1   :  { %14173 = vst [vmem:[#allocation129_spill] sm:$0xff] %v12697_v5  ;;  %14177 = vst [vmem:[#allocation131_spill] sm:$0xff] %v12712_v45  ;;  %8789 = vmatpush1.bf16.msra.mxu0 %v12697_v5  ;;  %v6292_v21 = vand.u32 4294901760, %v6291_v9  ;;  %v12745_v5 = vld [vmem:[#allocation3 + $0x10] sm:$0xff] }
 0x6e2   :  { %v12724_v53 = vpack.c.bf16 %v14179_v26, %v13731_v20  ;;  %v12731_v2 = vpack.c.bf16 %v14182_v29, %v14181_v58  ;;  %v12736_v28 = vsub.f32 %v12419_v14, %v14184_v12  ;;  %6064 = vmatprep.subr.mxu0 %v12608_v32  ;;  %v12741_v26 = vand.u32 4294901760, %v12710_v4 }
 0x6e3   :  { %v12748_v58 = vand.u32 4294901760, %v12745_v5  ;;  %v12751_v14 = vsub.f32 %v5898_v50, %v12712_v45  ;;  %v14187_v12 = vand.u32 4294901760, %v12438_v35  ;;  %v6286_v9 = vand.u32 4294901760, %v6285_v47 }
 0x6e4   :  { %14180 = vst [vmem:[#allocation132_spill] sm:$0xff] %v12724_v53  ;;  %14183 = vst [vmem:[#allocation133_spill] sm:$0xff] %v12731_v2  ;;  %9003 = vmatprep.subr.bf16.mxu1 %v12731_v2  ;;  %v6280_v20 = vand.u32 4294901760, %v12639_v33  ;;  %v6112_v43 = vsub.f32 %v12710_v4, %v12741_v26  ;;  %v14188_v2 = vand.u32 4294901760, %v12653_v49  ;;  %v6274_v50 = vand.u32 4294901760, %v6273_v55 }
 0x6e5   :  { %14185 = vst [vmem:[#allocation134_spill] sm:$0xff] %v12741_v26  ;;  %14186 = vst [vmem:[#allocation135_spill] sm:$0xff] %v12751_v14  ;;  %v12756_v29 = vsub.f32 %v12438_v35, %v14187_v12  ;;  %9005 = vmatpush1.bf16.msra.mxu1 %v12724_v53  ;;  %6066 = vmatpush1.msra.mxu0 %v12623_v8  ;;  %v12771_v12 = vand.u32 4294901760, %v12751_v14  ;;  %v14190_v33 = vand.u32 4294901760, %v12672_v57  ;;  %v13746_v26 = vand.u32 4294901760, %v12736_v28 }
 0x6e6   :  { %v12765_v13 = vsub.f32 %v12653_v49, %v14188_v2  ;;  %7072 = vmatprep.subr.mxu1 %v12634_v10  ;;  %8791 = vmatprep.subr.bf16.mxu0 %v11911_v18  ;;  %v12780_v2 = vpack.c.bf16 %v6292_v21, %v6280_v20  ;;  %v6113_v53 = vand.u32 4294901760, %v6112_v43  ;;  %v14191_v55 = vand.u32 4294901760, %v12682_v54 }
 0x6e7   :  { %14189 = vst [vmem:[#allocation136_spill] sm:$0xff] %v12771_v12  ;;  %v12776_v47 = vsub.f32 %v12672_v57, %v14190_v33  ;;  %6104 = vmatmul.mubr.f32.vlgmr.msra.gmra.mrb[8].mxu0 %v12645_v51  ;;  %v14192_v4 = vand.u32 4294901760, %v12518_v46  ;;  %v14194_v33 = vand.u32 4294901760, %v12522_v11  ;;  %v6118_v20 = vsub.f32 %v12751_v14, %v12771_v12 }
 0x6e8   :  { %v12786_v35 = vsub.f32 %v12682_v54, %v14191_v55  ;;  %8793 = vmatpush1.bf16.msra.mxu0 %v11952_v42  ;;  %v12803_v43 = vpack.c.bf16 %v6286_v9, %v6274_v50  ;;  %6114 = vmatprep.mubr.f32.mxu0 %v6113_v53  ;;  %v14206_v12 = vand.u32 4294901760, %v12756_v29 }
 0x6e9   :  { %v12791_v49 = vsub.f32 %v12518_v46, %v14192_v4  ;;  %v12796_v18 = vsub.f32 %v12522_v11, %v14194_v33  ;;  %8795 = vmatprep.subr.bf16.mxu0 %v12024_v1  ;;  %7074 = vmatpush1.msra.mxu1 %v12748_v58  ;;  %v14195_v4 = vand.u32 4294901760, %v12498_v30  ;;  %v14196_v1 = vand.u32 4294901760, %v12718_v40 }
 0x6ea   :  { %9007 = vmatprep.subr.bf16.mxu1 %v12026_v41  ;;  %7112 = vmatmul.mubr.f32.vlgmr.msra.gmra.mrb[10].mxu1 %v12645_v51  ;;  %v6119_v50 = vand.u32 4294901760, %v6118_v20  ;;  %v14197_v33 = vand.u32 4294901760, %v12514_v16  ;;  %v12833_v41 = vsub.f32 %v12736_v28, %v13746_v26  ;;  %v14219_v20 = vand.u32 4294901760, %v12641_v31 }
 0x6eb   :  { %14193 = vst [vmem:[#allocation137_spill] sm:$0xff] %v12791_v49  ;;  %v12813_v42 = vsub.f32 %v12498_v30, %v14195_v4  ;;  %v12820_v9 = vsub.f32 %v12718_v40, %v14196_v1  ;;  %9009 = vmatpush1.bf16.msra.mxu1 %v12042_v60  ;;  %v14200_v30 = vld [vmem:[#allocation45_spill] sm:$0xff]  ;;  %v12850_v4 = vsub.f32 %v12756_v29, %v14206_v12  ;;  %v14211_v1 = vld [vmem:[#allocation52_spill] sm:$0xff]  ;;  %v7300_v60 = vand.u32 4294901760, %v12786_v35 }
 0x6ec   :  { %v12827_v11 = vsub.f32 %v12514_v16, %v14197_v33  ;;  %8797 = vmatpush1.bf16.msra.mxu0 %v12081_v52  ;;  %9011 = vmatprep.subr.bf16.mxu1 %v12153_v56  ;;  %v14217_v33 = vand.u32 4294901760, %v12530_v7  ;;  %v12872_v46 = vsub.f32 %v12641_v31, %v14219_v20  ;;  %v14235_v31 = vld [vmem:[#allocation109_spill] sm:$0xff]  ;;  %v14245_v20 = vld [vmem:[#allocation87_spill] sm:$0xff] }
 0x6ed   :  { %8799 = vmatprep.subr.bf16.mxu0 %v12151_v38  ;;  %6120 = vmatmul.mubr.f32.gmra.mrb[10].mxu0 %v6119_v50  ;;  %v14229_v38 = vand.u32 4294901760, %v12796_v18  ;;  %v14236_v12 = vand.u32 4294901760, %v14235_v31  ;;  %v14244_v59 = vand.u32 4294901760, %v12813_v42 }
 0x6ee   :  { %14198 = vst [vmem:[#allocation138_spill] sm:$0xff] %v12827_v11  ;;  %6381 = vmatprep.mubr.f32.mxu0 %v14211_v1  ;;  %7122 = vmatprep.mubr.f32.mxu1 %v6113_v53  ;;  %v12867_v14 = vsub.f32 %v12530_v7, %v14217_v33  ;;  %14220 = vst [vmem:[#allocation139_spill] sm:$0xff] %v12872_v46  ;;  %v14221_v53 = vld [vmem:[#allocation71_spill] sm:$0xff]  ;;  %v6308_v7 = vand.u32 4294901760, %v12827_v11  ;;  %v7282_v33 = vand.u32 4294901760, %v12833_v41 }
 0x6ef   :  { %9013 = vmatpush1.bf16.msra.mxu1 %v14221_v53  ;;  %v12891_v55 = vsub.f32 %v12796_v18, %v14229_v38  ;;  %v12905_v16 = vsub.f32 %v14235_v31, %v14236_v12  ;;  %v14238_v38 = vand.u32 4294901760, %v12643_v37  ;;  %v12920_v24 = vsub.f32 %v12813_v42, %v14244_v59 }
 0x6f0   :  { %14218 = vst [vmem:[#allocation45_spill] sm:$0xff] %v12867_v14  ;;  %8801 = vmatpush1.bf16.msra.mxu0 %v14225_v48  ;;  %9015 = vmatprep.subr.bf16.mxu1 %v12284_v3  ;;  %v14230_v48 = vand.u32 4294901760, %v12625_v27  ;;  %v7322_v12 = vand.u32 4294901760, %v12867_v14  ;;  %v6326_v31 = vand.u32 4294901760, %v12872_v46  ;;  %v6309_v59 = vsub.f32 %v12827_v11, %v6308_v7 }
 0x6f1   :  { %8803 = vmatprep.subr.bf16.mxu0 %v14232_v61  ;;  %7128 = vmatmul.mubr.f32.gmra.mrb[12].mxu1 %v6119_v50  ;;  %14237 = vst [vmem:[#allocation76_spill] sm:$0xff] %v12905_v16  ;;  %v12910_v53 = vsub.f32 %v12643_v37, %v14238_v38  ;;  %v14246_v38 = vand.u32 4294901760, %v12660_v0  ;;  %v7294_v50 = vand.u32 4294901760, %v12850_v4  ;;  %v14250_v37 = vand.u32 4294901760, %v12677_v34 }
 0x6f2   :  { %v12896_v3 = vsub.f32 %v12625_v27, %v14230_v48  ;;  %7389 = vmatprep.mubr.f32.mxu1 %v14211_v1  ;;  %v14247_v1 = vld [vmem:[#allocation90_spill] sm:$0xff]  ;;  %v14249_v27 = vand.u32 4294901760, %v12615_v39  ;;  %v14253_v4 = vand.u32 4294901760, %v12655_v63  ;;  %v7288_v61 = vand.u32 4294901760, %v12765_v13 }
 0x6f3   :  { %14239 = vst [vmem:[#allocation85_spill] sm:$0xff] %v12910_v53  ;;  %9017 = vmatpush1.bf16.msra.mxu1 %v14245_v20  ;;  %v12929_v48 = vsub.f32 %v12660_v0, %v14246_v38  ;;  %v12944_v0 = vsub.f32 %v12677_v34, %v14250_v37  ;;  %v14252_v38 = vld [vmem:[#allocation35_spill] sm:$0xff]  ;;  %v7316_v34 = vand.u32 4294901760, %v12905_v16  ;;  %v12962_v37 = vsub.f32 %v12867_v14, %v7322_v12 }
 0x6f4   :  { %14231 = vst [vmem:[#allocation71_spill] sm:$0xff] %v12896_v3  ;;  %8805 = vmatpush1.bf16.msra.mxu0 %v14247_v1  ;;  %9019 = vmatprep.subr.bf16.mxu1 %v14248_v22  ;;  %v12939_v20 = vsub.f32 %v12615_v39, %v14249_v27  ;;  %v14251_v1 = vand.u32 4294901760, %v12675_v23  ;;  %v6320_v41 = vand.u32 4294901760, %v12896_v3  ;;  %v12956_v11 = vsub.f32 %v12655_v63, %v14253_v4  ;;  %v14255_v4 = vld [vmem:[#allocation40_spill] sm:$0xff]  ;;  %v14257_v14 = vld [vmem:[#allocation119_spill] sm:$0xff] }
 0x6f5   :  { %8807 = vmatprep.subr.bf16.mxu0 %v14252_v38  ;;  %v6332_v39 = vand.u32 4294901760, %v12910_v53  ;;  %v7304_v27 = vand.u32 4294901760, %v12791_v49  ;;  %v6316_v38 = vand.u32 4294901760, %v12920_v24  ;;  %v7334_v63 = vand.u32 4294901760, %v12929_v48  ;;  %v14258_v24 = vld [vmem:[#allocation101_spill] sm:$0xff] }
 0x6f6   :  { %v12949_v22 = vsub.f32 %v12675_v23, %v14251_v1  ;;  %v12965_v23 = vsub.f32 %v12872_v46, %v6326_v31  ;;  %v14254_v1 = vld [vmem:[#allocation95_spill] sm:$0xff]  ;;  %v6310_v54 = vand.u32 4294901760, %v6309_v59  ;;  %v12976_v45 = vsub.f32 %v14257_v14, %v12608_v32  ;;  %v14259_v14 = vld [vmem:[#allocation38_spill] sm:$0xff] }
 0x6f7   :  { %9021 = vmatpush1.bf16.msra.mxu1 %v14254_v1  ;;  %v6338_v46 = vand.u32 4294901760, %v12939_v20  ;;  %v6321_v13 = vsub.f32 %v12896_v3, %v6320_v41  ;;  %v7340_v21 = vand.u32 4294901760, %v12944_v0  ;;  %v7317_v35 = vsub.f32 %v12905_v16, %v7316_v34  ;;  %v14260_v32 = vld [vmem:[#allocation122_spill] sm:$0xff] }
 0x6f8   :  { %8809 = vmatpush1.bf16.msra.mxu0 %v14255_v4  ;;  %9023 = vmatprep.subr.bf16.mxu1 %v14256_v36  ;;  %v7346_v1 = vand.u32 4294901760, %v12949_v22  ;;  %v6333_v4 = vsub.f32 %v12910_v53, %v6332_v39  ;;  %v7305_v36 = vsub.f32 %v12791_v49, %v7304_v27  ;;  %v7328_v59 = vand.u32 4294901760, %v12956_v11 }
 0x6f9   :  { %8811 = vmatprep.subr.bf16.mxu0 %v14258_v24  ;;  %v12990_v26 = vsub.f32 %v14260_v32, %v12623_v8  ;;  %v14261_v24 = vand.u32 4294901760, %v12718_v40  ;;  %v14263_v3 = vand.u32 4294901760, %v12736_v28  ;;  %v14264_v53 = vand.u32 4294901760, %v12756_v29  ;;  %v14270_v32 = vld [vmem:[#allocation106_spill] sm:$0xff] }
 0x6fa   :  { %v14266_v16 = vand.u32 4294901760, %v12672_v57  ;;  %v14267_v49 = vand.u32 4294901760, %v12813_v42  ;;  %v6339_v8 = vsub.f32 %v12939_v20, %v6338_v46 }
 0x6fb   :  { %9025 = vmatpush1.bf16.msra.mxu1 %v14259_v14  ;;  %v12994_v52 = vpack.c.bf16 %v6308_v7, %v14261_v24  ;;  %v13000_v56 = vpack.c.bf16 %v14264_v53, %v14263_v3  ;;  %v14269_v14 = vld [vmem:[#allocation100_spill] sm:$0xff]  ;;  %v13017_v53 = vpack.c.bf16 %v7316_v34, %v7304_v27  ;;  %v13020_v3 = vpack.c.bf16 %v6338_v46, %v6326_v31 }
 0x6fc   :  { %v13006_v51 = vpack.c.bf16 %v14267_v49, %v14266_v16  ;;  %8813 = vmatpush1.bf16.msra.mxu0 %v14269_v14  ;;  %9027 = vmatprep.subr.bf16.mxu1 %v14270_v32  ;;  %v14271_v7 = vld [vmem:[#allocation124_spill] sm:$0xff]  ;;  %v14275_v49 = vand.u32 4294901760, %v12796_v18  ;;  %v13026_v14 = vpack.c.bf16 %v7340_v21, %v7328_v59  ;;  %v13028_v32 = vpack.c.bf16 %v7346_v1, %v7334_v63 }
 0x6fd   :  { %14262 = vst [vmem:[#allocation109_spill] sm:$0xff] %v12994_v52  ;;  %14265 = vst [vmem:[#allocation87_spill] sm:$0xff] %v13000_v56  ;;  %v13013_v24 = vsub.f32 %v14271_v7, %v12634_v10  ;;  %v13015_v52 = vpack.c.bf16 %v6332_v39, %v6320_v41  ;;  %8815 = vmatprep.subr.bf16.mxu0 %v12803_v43  ;;  %v9030_v7 = vpack.c.bf16 %v7294_v50, %v7282_v33  ;;  %v14279_v39 = vld [vmem:[#allocation107_spill] sm:$0xff]  ;;  %v14340_v56 = vld [vmem:[#allocation53_spill] sm:$0xff] }
 0x6fe   :  { %14268 = vst [vmem:[#allocation90_spill] sm:$0xff] %v13006_v51  ;;  %14273 = vst [vmem:[#allocation35_spill] sm:$0xff] %v13017_v53  ;;  %v13024_v16 = vpack.c.bf16 %v7322_v12, %v14275_v49  ;;  %v7318_v51 = vand.u32 4294901760, %v7317_v35  ;;  %v7341_v41 = vsub.f32 %v12944_v0, %v7340_v21  ;;  %v14280_v43 = vand.u32 4294901760, %v12820_v9 }
 0x6ff   :  { %14272 = vst [vmem:[#allocation93_spill] sm:$0xff] %v13015_v52  ;;  %14274 = vst [vmem:[#allocation95_spill] sm:$0xff] %v13020_v3  ;;  %9029 = vmatpush1.bf16.msra.mxu1 %v14279_v39  ;;  %v9032_v27 = vpack.c.bf16 %v7300_v60, %v7288_v61  ;;  %v6334_v34 = vand.u32 4294901760, %v6333_v4  ;;  %v13037_v12 = vsub.f32 %v12745_v5, %v12748_v58  ;;  %v7306_v49 = vand.u32 4294901760, %v7305_v36  ;;  %v14334_v3 = vld [vmem:[#allocation46_spill] sm:$0xff]  ;;  %v14337_v52 = vld [vmem:[#allocation84_spill] sm:$0xff] }
 0x700   :  { %14276 = vst [vmem:[#allocation40_spill] sm:$0xff] %v13024_v16  ;;  %14277 = vst [vmem:[#allocation33_spill] sm:$0xff] %v13026_v14  ;;  %v8818_v31 = vpack.c.bf16 %v6310_v54, %v14280_v43  ;;  %8817 = vmatpush1.bf16.msra.mxu0 %v12780_v2  ;;  %9031 = vmatprep.subr.bf16.mxu1 %v9030_v7  ;;  %v7329_v46 = vsub.f32 %v12956_v11, %v7328_v59  ;;  %v13781_v33 = vand.u32 4294901760, %v12990_v26 }
 0x701   :  { %14278 = vst [vmem:[#allocation119_spill] sm:$0xff] %v13028_v32  ;;  %v13780_v21 = vand.u32 4294901760, %v13013_v24  ;;  %v7347_v50 = vsub.f32 %v12949_v22, %v7346_v1  ;;  %v6322_v54 = vand.u32 4294901760, %v6321_v13  ;;  %v7324_v9 = vand.u32 4294901760, %v12962_v37  ;;  %v14331_v32 = vld [vmem:[#allocation43_spill] sm:$0xff] }
 0x702   :  { %8819 = vmatprep.subr.bf16.mxu0 %v8818_v31  ;;  %v14281_v60 = vand.u32 4294901760, %v12976_v45  ;;  %v14282_v2 = vand.u32 4294901760, %v12776_v47  ;;  %v9034_v4 = vpack.c.bf16 %v7318_v51, %v7306_v49  ;;  %v6340_v36 = vand.u32 4294901760, %v6339_v8 }
 0x703   :  { %v7342_v35 = vand.u32 4294901760, %v7341_v41  ;;  %v7335_v59 = vsub.f32 %v12929_v48, %v7334_v63  ;;  %9033 = vmatpush1.bf16.msra.mxu1 %v9032_v27  ;;  %v8822_v7 = vpack.c.bf16 %v6334_v34, %v6322_v54  ;;  %v7312_v1 = vand.u32 4294901760, %v12891_v55 }
 0x704   :  { %v6345_v5 = vsub.f32 %v12976_v45, %v14281_v60  ;;  %v8820_v61 = vpack.c.bf16 %v6316_v38, %v14282_v2  ;;  %v13779_v13 = vand.u32 4294901760, %v13037_v12  ;;  %9035 = vmatprep.subr.bf16.mxu1 %v9034_v4  ;;  %v6328_v37 = vand.u32 4294901760, %v12965_v23  ;;  %v14287_v60 = vld [vmem:[#allocation50_spill] sm:$0xff]  ;;  %v14289_v2 = vld [vmem:[#allocation59_spill] sm:$0xff] }
 0x705   :  { %v7330_v39 = vand.u32 4294901760, %v7329_v46  ;;  %v6351_v47 = vsub.f32 %v12990_v26, %v13781_v33  ;;  %v7353_v8 = vsub.f32 %v13013_v24, %v13780_v21  ;;  %v9036_v51 = vpack.c.bf16 %v7324_v9, %v7312_v1  ;;  %v14296_v1 = vld [vmem:[#allocation21_spill] sm:$0xff] }
 0x706   :  { %8821 = vmatpush1.bf16.msra.mxu0 %v8820_v61  ;;  %v6346_v38 = vand.u32 4294901760, %v6345_v5  ;;  %v7348_v63 = vand.u32 4294901760, %v7347_v50  ;;  %v8824_v55 = vpack.c.bf16 %v6340_v36, %v6328_v37  ;;  %v7336_v43 = vand.u32 4294901760, %v7335_v59  ;;  %v14284_v50 = vld [vmem:[#allocation108_spill] sm:$0xff]  ;;  %v14290_v61 = vld [vmem:[#allocation39_spill] sm:$0xff]  ;;  %v14294_v59 = vld [vmem:[#allocation30_spill] sm:$0xff] }
 0x707   :  { %8823 = vmatprep.subr.bf16.mxu0 %v8822_v7  ;;  %v9038_v41 = vpack.c.bf16 %v7342_v35, %v7330_v39  ;;  %9037 = vmatpush1.bf16.msra.mxu1 %v9036_v51  ;;  %v7359_v23 = vsub.f32 %v13037_v12, %v13779_v13  ;;  %v6352_v31 = vand.u32 4294901760, %v6351_v47  ;;  %v7354_v27 = vand.u32 4294901760, %v7353_v8  ;;  %v14292_v36 = vld [vmem:[#allocation131_spill] sm:$0xff]  ;;  %v14293_v35 = vld [vmem:[#allocation24_spill] sm:$0xff]  ;;  %v14300_v8 = vld [vmem:[#allocation65_spill] sm:$0xff] }
 0x708   :  { %v9040_v34 = vpack.c.bf16 %v7348_v63, %v7336_v43  ;;  %v14283_v46 = vpack.c.bf16 %v11798_v25, %v11670_v44  ;;  %v14285_v54 = vpack.c.bf16 %v11870_v17, %v11759_v6  ;;  %v14286_v9 = vpack.c.bf16 %v11938_v15, %v11844_v62  ;;  %v14297_v37 = vld [vmem:[#allocation31_spill] sm:$0xff]  ;;  %v14303_v63 = vld [vmem:[#allocation64_spill] sm:$0xff]  ;;  %v14322_v13 = vld [vmem:[#allocation73_spill] sm:$0xff] }
 0x709   :  { %9039 = vmatprep.subr.bf16.mxu1 %v9038_v41  ;;  %v7360_v49 = vand.u32 4294901760, %v7359_v23  ;;  %v14288_v5 = vpack.c.bf16 %v14200_v30, %v14287_v60  ;;  %v14291_v4 = vpack.c.bf16 %v14289_v2, %v14290_v61  ;;  %v14295_v7 = vpack.c.bf16 %v14293_v35, %v14294_v59  ;;  %v14299_v47 = vld [vmem:[#allocation27_spill] sm:$0xff]  ;;  %v14307_v23 = vld [vmem:[#allocation26_spill] sm:$0xff]  ;;  %v14325_v33 = vld [vmem:[#allocation37_spill] sm:$0xff] }
 0x70a   :  { %8825 = vmatpush1.bf16.msra.mxu0 %v8824_v55  ;;  %v14298_v39 = vpack.c.bf16 %v14296_v1, %v14297_v37  ;;  %v14301_v51 = vpack.c.bf16 %v14299_v47, %v14300_v8  ;;  %v14304_v55 = vld [vmem:[#allocation61_spill] sm:$0xff]  ;;  %v14306_v43 = vld [vmem:[#allocation67_spill] sm:$0xff] }
 0x70b   :  { %6347 = vmatprep.subr.mxu0 %v6346_v38  ;;  %9041 = vmatpush1.bf16.msra.mxu1 %v9040_v34  ;;  %v14302_v38 = vld [vmem:[#allocation56_spill] sm:$0xff]  ;;  %v14305_v41 = vpack.c.bf16 %v14303_v63, %v14304_v55  ;;  %v14310_v34 = vld [vmem:[#allocation23_spill] sm:$0xff] }
 0x70c   :  { %7355 = vmatprep.subr.mxu1 %v7354_v27  ;;  %v14309_v27 = vld [vmem:[#allocation68_spill] sm:$0xff] }
 0x70e   :  { %6353 = vmatpush1.msra.mxu0 %v6352_v31  ;;  %v14308_v31 = vpack.c.bf16 %v14306_v43, %v14307_v23 }
 0x70f   :  { %8827 = vmatprep.subr.bf16.mxu0 %v14283_v46  ;;  %6383 = vmatmul.mubr.f32.vlgmr.msra.gmra.mrb[8].mxu0 %v14284_v50  ;;  %v14312_v46 = vld [vmem:[#allocation74_spill] sm:$0xff] }
 0x710   :  { %8829 = vmatpush1.bf16.msra.mxu0 %v14285_v54  ;;  %6389 = vmatprep.mubr.f32.mxu0 %v12691_v19  ;;  %v14313_v54 = vld [vmem:[#allocation16_spill] sm:$0xff] }
 0x711   :  { %8831 = vmatprep.subr.bf16.mxu0 %v14286_v9  ;;  %7361 = vmatpush1.msra.mxu1 %v7360_v49  ;;  %v14311_v49 = vpack.c.bf16 %v14309_v27, %v14310_v34  ;;  %v14314_v9 = vpack.c.bf16 %v14312_v46, %v14313_v54 }
 0x712   :  { %9043 = vmatprep.subr.bf16.mxu1 %v14288_v5  ;;  %7391 = vmatmul.mubr.f32.vlgmr.msra.gmra.mrb[10].mxu1 %v14284_v50  ;;  %v14315_v5 = vld [vmem:[#allocation19_spill] sm:$0xff] }
 0x713   :  { %9045 = vmatpush1.bf16.msra.mxu1 %v14291_v4  ;;  %6391 = vmatmul.mubr.f32.gmra.mrb[10].mxu0 %v14292_v36  ;;  %v14316_v4 = vld [vmem:[#allocation22_spill] sm:$0xff] }
 0x714   :  { %8833 = vmatpush1.bf16.msra.mxu0 %v14295_v7  ;;  %9047 = vmatprep.subr.bf16.mxu1 %v14298_v39  ;;  %v14317_v7 = vpack.c.bf16 %v14315_v5, %v14316_v4  ;;  %v14318_v39 = vld [vmem:[#allocation81_spill] sm:$0xff] }
 0x715   :  { %8835 = vmatprep.subr.bf16.mxu0 %v14301_v51  ;;  %6539 = vmatprep.mubr.f32.mxu0 %v14302_v38  ;;  %v14319_v51 = vld [vmem:[#allocation72_spill] sm:$0xff] }
 0x716   :  { %7397 = vmatprep.mubr.f32.mxu1 %v12691_v19 }
 0x717   :  { %9049 = vmatpush1.bf16.msra.mxu1 %v14305_v41  ;;  %v14320_v41 = vpack.c.bf16 %v14318_v39, %v14319_v51 }
 0x718   :  { %8837 = vmatpush1.bf16.msra.mxu0 %v14308_v31  ;;  %9051 = vmatprep.subr.bf16.mxu1 %v14311_v49  ;;  %v14321_v31 = vld [vmem:[#allocation82_spill] sm:$0xff]  ;;  %v14324_v49 = vld [vmem:[#allocation49_spill] sm:$0xff] }
 0x719   :  { %8839 = vmatprep.subr.bf16.mxu0 %v14314_v9  ;;  %7399 = vmatmul.mubr.f32.gmra.mrb[12].mxu1 %v14292_v36  ;;  %v14323_v21 = vpack.c.bf16 %v14321_v31, %v14322_v13  ;;  %v14326_v19 = vpack.c.bf16 %v14324_v49, %v14325_v33  ;;  %v14327_v9 = vld [vmem:[#allocation77_spill] sm:$0xff]  ;;  %v14328_v36 = vld [vmem:[#allocation70_spill] sm:$0xff] }
 0x71a   :  { %7547 = vmatprep.mubr.f32.mxu1 %v14302_v38  ;;  %v14329_v50 = vpack.c.bf16 %v14327_v9, %v14328_v36  ;;  %v14330_v38 = vld [vmem:[#allocation55_spill] sm:$0xff]  ;;  %v14343_v49 = vld [vmem:[#allocation121_spill] sm:$0xff]  ;;  %v14345_v36 = vld [vmem:[#allocation78_spill] sm:$0xff] }
 0x71b   :  { %9053 = vmatpush1.bf16.msra.mxu1 %v14317_v7  ;;  %v14332_v14 = vpack.c.bf16 %v14330_v38, %v14331_v32  ;;  %v14333_v7 = vld [vmem:[#allocation32_spill] sm:$0xff] }
 0x71c   :  { %8841 = vmatpush1.bf16.msra.mxu0 %v14320_v41  ;;  %9055 = vmatprep.subr.bf16.mxu1 %v14323_v21  ;;  %v14335_v16 = vpack.c.bf16 %v14333_v7, %v14334_v3  ;;  %v14336_v41 = vld [vmem:[#allocation91_spill] sm:$0xff]  ;;  %v14339_v21 = vld [vmem:[#allocation54_spill] sm:$0xff]  ;;  %v14348_v32 = vld [vmem:[#allocation88_spill] sm:$0xff] }
 0x71d   :  { %8843 = vmatprep.subr.bf16.mxu0 %v14326_v19  ;;  %v14338_v53 = vpack.c.bf16 %v14336_v41, %v14337_v52  ;;  %v14341_v33 = vpack.c.bf16 %v14339_v21, %v14340_v56  ;;  %v14342_v19 = vld [vmem:[#allocation118_spill] sm:$0xff]  ;;  %v14350_v3 = vld [vmem:[#allocation113_spill] sm:$0xff] }
 0x71e   :  { %v8850_v9 = vpack.c.bf16 %v14343_v49, %v14342_v19  ;;  %v14352_v56 = vld [vmem:[#allocation98_spill] sm:$0xff] }
 0x71f   :  { %9057 = vmatpush1.bf16.msra.mxu1 %v14329_v50  ;;  %v14344_v50 = vld [vmem:[#allocation89_spill] sm:$0xff]  ;;  %v14353_v21 = vld [vmem:[#allocation86_spill] sm:$0xff] }
 0x720   :  { %8845 = vmatpush1.bf16.msra.mxu0 %v14332_v14  ;;  %9059 = vmatprep.subr.bf16.mxu1 %v14335_v16  ;;  %v14346_v31 = vpack.c.bf16 %v14344_v50, %v14345_v36  ;;  %v14347_v14 = vld [vmem:[#allocation97_spill] sm:$0xff]  ;;  %v14355_v49 = vld [vmem:[#allocation138_spill] sm:$0xff] }
 0x721   :  { %8847 = vmatprep.subr.bf16.mxu0 %v14338_v53  ;;  %v14349_v38 = vpack.c.bf16 %v14347_v14, %v14348_v32  ;;  %v14351_v16 = vld [vmem:[#allocation117_spill] sm:$0xff]  ;;  %v9066_v53 = vpack.c.bf16 %v12756_v29, %v12736_v28  ;;  %v8854_v19 = vpack.c.bf16 %v14355_v49, %v12718_v40  ;;  %v14357_v14 = vld [vmem:[#allocation126_spill] sm:$0xff]  ;;  %v14360_v28 = vld [vmem:[#allocation71_spill] sm:$0xff] }
 0x722   :  { %v8852_v7 = vpack.c.bf16 %v14351_v16, %v14350_v3  ;;  %v14358_v16 = vld [vmem:[#allocation137_spill] sm:$0xff]  ;;  %v14359_v3 = vld [vmem:[#allocation76_spill] sm:$0xff] }
 0x723   :  { %9061 = vmatpush1.bf16.msra.mxu1 %v14341_v33  ;;  %v14354_v33 = vpack.c.bf16 %v14352_v56, %v14353_v21  ;;  %v9070_v32 = vpack.c.bf16 %v14359_v3, %v14358_v16  ;;  %v14361_v29 = vld [vmem:[#allocation85_spill] sm:$0xff]  ;;  %v14369_v3 = vld [vmem:[#allocation51_spill] sm:$0xff]  ;;  %v14370_v16 = vld [vmem:[#allocation62_spill] sm:$0xff] }
 0x724   :  { %8849 = vmatpush1.bf16.msra.mxu0 %v14346_v31  ;;  %9063 = vmatprep.subr.bf16.mxu1 %v14349_v38  ;;  %v14356_v31 = vld [vmem:[#allocation125_spill] sm:$0xff]  ;;  %v8858_v56 = vpack.c.bf16 %v14361_v29, %v14360_v28  ;;  %v14375_v28 = vld [vmem:[#allocation28_spill] sm:$0xff]  ;;  %v14376_v29 = vld [vmem:[#allocation66_spill] sm:$0xff] }
 0x725   :  { %8851 = vmatprep.subr.bf16.mxu0 %v8850_v9  ;;  %v9068_v38 = vpack.c.bf16 %v14357_v14, %v14356_v31  ;;  %v8856_v9 = vpack.c.bf16 %v12813_v42, %v12672_v57  ;;  %v14362_v40 = vld [vmem:[#allocation45_spill] sm:$0xff]  ;;  %v9604_v57 = vmov 6   ;;  %v9076_v42 = vpack.c.bf16 %v12949_v22, %v12929_v48  ;;  %v14366_v48 = vld [vmem:[#allocation42_spill] sm:$0xff] }
 0x726   :  { %v9072_v49 = vpack.c.bf16 %v14362_v40, %v12796_v18  ;;  %9377 = vset.pattern.permute.xlu1 %v9604_v57  ;;  %v9461_v18 = vld [vmem:[%s13415_s3] sm:$0xff]  ;;  %9378 = vset.pattern.permute.xlu0 %v9604_v57  ;;  %v14367_v22 = vld [vmem:[#allocation130_spill] sm:$0xff]  ;;  %v14377_v40 = vld [vmem:[#allocation29_spill] sm:$0xff] }
 0x727   :  { %9065 = vmatpush1.bf16.msra.mxu1 %v14354_v33  ;;  %5977 = vperm.xlu1 %9377, %v9461_v18   ;;  %v14372_v33 = vld [vmem:[#allocation20_spill] sm:$0xff]  ;;  %v14382_v57 = vld [vmem:[#allocation83_spill] sm:$0xff] }
 0x728   :  { %8853 = vmatpush1.bf16.msra.mxu0 %v8852_v7  ;;  %9067 = vmatprep.subr.bf16.mxu1 %v9066_v53  ;;  %v9074_v53 = vpack.c.bf16 %v12944_v0, %v12956_v11  ;;  %v9462_v11 = vld [vmem:[%s13415_s3 + $0x8] sm:$0xff]  ;;  %v14365_v0 = vld [vmem:[#allocation110_spill] sm:$0xff]  ;;  %v14384_v18 = vld [vmem:[#allocation79_spill] sm:$0xff]  ;;  %s9605_s3 = smov [#allocation11]  }
 0x729   :  { %8855 = vmatprep.subr.bf16.mxu0 %v8854_v19  ;;  %v14363_v19 = vld [vmem:[#allocation139_spill] sm:$0xff]  ;;  %5981 = vperm.xlu0 %9378, %v9462_v11   ;;  %v14385_v11 = vld [vmem:[#allocation57_spill] sm:$0xff]  ;;  %s8020_s24 = sshll.u32 %s9605_s3, 4  ;;  %s8021_s24 = int_to_ptr.vmem [resolvable:$true] %s8020_s24 }
 0x72a   :  { %v8860_v7 = vpack.c.bf16 %v12939_v20, %v14363_v19  ;;  %v14364_v20 = vld [vmem:[#allocation34_spill] sm:$0xff]  ;;  %v14379_v19 = vld [vmem:[#allocation75_spill] sm:$0xff]  ;;  %s9551_s25 = scalar_lea.vmem %s8021_s24, 1024  ;;  %p9556_p5 = scmp.lt.s32.totalorder %s8021_s24, %s8021_s24 }
 0x72b   :  { %9069 = vmatpush1.bf16.msra.mxu1 %v9068_v38  ;;  %v14373_v38 = vld [vmem:[#allocation25_spill] sm:$0xff]  ;;  %p9552_p4 = scmp.ne.s32.totalorder %s8021_s24, %s9551_s25  ;;  %p9557_p6 = scmp.lt.s32.totalorder %s9551_s25, %s9551_s25 }
 0x72c   :  { %8857 = vmatpush1.bf16.msra.mxu0 %v8856_v9  ;;  %9071 = vmatprep.subr.bf16.mxu1 %v9070_v32  ;;  %v14368_v32 = vld [vmem:[#allocation63_spill] sm:$0xff]  ;;  %v14374_v9 = vld [vmem:[#allocation17_spill] sm:$0xff] }
 0x72d   :  { %8859 = vmatprep.subr.bf16.mxu0 %v8858_v56  ;;  %v14371_v56 = vld [vmem:[#allocation135_spill] sm:$0xff]  ;;  %p9558_p7 = por %p9557_p6, %p9556_p5 }
 0x72f   :  { %9073 = vmatpush1.bf16.msra.mxu1 %v9072_v49  ;;  %v14378_v49 = vld [vmem:[#allocation69_spill] sm:$0xff]  ;;  %p9559_p8 = pnand %p9558_p7, %p9552_p4 }
 0x730   :  { %8861 = vmatpush1.bf16.msra.mxu0 %v8860_v7  ;;  %9075 = vmatprep.subr.bf16.mxu1 %v9074_v53  ;;  %v14380_v7 = vld [vmem:[#allocation18_spill] sm:$0xff]  ;;  %v14381_v53 = vld [vmem:[#allocation80_spill] sm:$0xff] }
 0x731   :  { %6507 = vmatprep.subr.mxu0 %v12976_v45 }
 0x733   :  { %9077 = vmatpush1.bf16.msra.mxu1 %v9076_v42  ;;  %v14383_v42 = vld [vmem:[#allocation41_spill] sm:$0xff] }
 0x734   :  { %6510 = vmatpush1.msra.mxu0 %v12990_v26  ;;  %7515 = vmatprep.subr.mxu1 %v13013_v24 }
 0x735   :  { %8863 = vmatprep.subr.bf16.mxu0 %v14364_v20  ;;  %6542 = vmatmul.mubr.f32.vlgmr.msra.gmra.mrb[8].mxu0 %v14365_v0 }
 0x736   :  { %8865 = vmatpush1.bf16.msra.mxu0 %v14366_v48  ;;  %6549 = vmatprep.mubr.f32.mxu0 %v14367_v22 }
 0x737   :  { %8867 = vmatprep.subr.bf16.mxu0 %v14368_v32  ;;  %7518 = vmatpush1.msra.mxu1 %v13037_v12 }
 0x738   :  { %9079 = vmatprep.subr.bf16.mxu1 %v14369_v3  ;;  %7550 = vmatmul.mubr.f32.vlgmr.msra.gmra.mrb[10].mxu1 %v14365_v0  ;;  %v14386_v0 = vld [vmem:[#allocation47_spill] sm:$0xff] }
 0x739   :  { %9081 = vmatpush1.bf16.msra.mxu1 %v14370_v16  ;;  %6552 = vmatmul.mubr.f32.gmra.mrb[10].mxu0 %v14371_v56 }
 0x73a   :  { %8869 = vmatpush1.bf16.msra.mxu0 %v14372_v33  ;;  %9083 = vmatprep.subr.bf16.mxu1 %v14373_v38 }
 0x73b   :  { %8871 = vmatprep.subr.bf16.mxu0 %v14374_v9  ;;  %6663 = vmatprep.mubr.f32.mxu0 %v14375_v28 }
 0x73c   :  { %7557 = vmatprep.mubr.f32.mxu1 %v14367_v22  ;;  %v14387_v22 = vld [vmem:[#allocation92_spill] sm:$0xff] }
 0x73d   :  { %9085 = vmatpush1.bf16.msra.mxu1 %v14376_v29 }
 0x73e   :  { %8873 = vmatpush1.bf16.msra.mxu0 %v14377_v40  ;;  %9087 = vmatprep.subr.bf16.mxu1 %v14378_v49 }
 0x73f   :  { %8875 = vmatprep.subr.bf16.mxu0 %v14379_v19  ;;  %7560 = vmatmul.mubr.f32.gmra.mrb[12].mxu1 %v14371_v56  ;;  %v14388_v19 = vld [vmem:[#allocation44_spill] sm:$0xff]  ;;  %v14389_v56 = vld [vmem:[#allocation94_spill] sm:$0xff] }
 0x740   :  { %7671 = vmatprep.mubr.f32.mxu1 %v14375_v28  ;;  %v14390_v28 = vld [vmem:[#allocation99_spill] sm:$0xff] }
 0x741   :  { %9089 = vmatpush1.bf16.msra.mxu1 %v14380_v7  ;;  %v14391_v7 = vld [vmem:[#allocation102_spill] sm:$0xff] }
 0x742   :  { %8877 = vmatpush1.bf16.msra.mxu0 %v14381_v53  ;;  %9091 = vmatprep.subr.bf16.mxu1 %v14382_v57  ;;  %v14392_v53 = vld [vmem:[#allocation96_spill] sm:$0xff]  ;;  %v14393_v57 = vld [vmem:[#allocation103_spill] sm:$0xff] }
 0x743   :  { %8879 = vmatprep.subr.bf16.mxu0 %v14383_v42  ;;  %v14394_v42 = vld [vmem:[#allocation105_spill] sm:$0xff] }
 0x745   :  { %9093 = vmatpush1.bf16.msra.mxu1 %v14384_v18  ;;  %v14395_v18 = vld [vmem:[#allocation111_spill] sm:$0xff] }
 0x746   :  { %8881 = vmatpush1.bf16.msra.mxu0 %v14385_v11  ;;  %9095 = vmatprep.subr.bf16.mxu1 %v14386_v0  ;;  %v14396_v11 = vld [vmem:[#allocation104_spill] sm:$0xff] }
 0x747   :  { %8883 = vmatprep.subr.bf16.mxu0 %v14387_v22  ;;  %v14397_v0 = vld [vmem:[#allocation112_spill] sm:$0xff]  ;;  %v14398_v22 = vld [vmem:[#allocation115_spill] sm:$0xff] }
 0x749   :  { %9097 = vmatpush1.bf16.msra.mxu1 %v14388_v19  ;;  %v14399_v19 = vld [vmem:[#allocation127_spill] sm:$0xff] }
 0x74a   :  { %8885 = vmatpush1.bf16.msra.mxu0 %v14389_v56  ;;  %9099 = vmatprep.subr.bf16.mxu1 %v14390_v28  ;;  %v14400_v56 = vld [vmem:[#allocation114_spill] sm:$0xff]  ;;  %v14401_v28 = vld [vmem:[#allocation129_spill] sm:$0xff] }
 0x74b   :  { %8887 = vmatprep.subr.bf16.mxu0 %v14391_v7  ;;  %v14402_v7 = vld [vmem:[#allocation133_spill] sm:$0xff] }
 0x74d   :  { %9101 = vmatpush1.bf16.msra.mxu1 %v14392_v53  ;;  %v14403_v53 = vld [vmem:[#allocation120_spill] sm:$0xff] }
 0x74e   :  { %8889 = vmatpush1.bf16.msra.mxu0 %v14393_v57  ;;  %9103 = vmatprep.subr.bf16.mxu1 %v14394_v42  ;;  %v14404_v57 = vld [vmem:[#allocation132_spill] sm:$0xff] }
 0x74f   :  { %8891 = vmatprep.subr.bf16.mxu0 %v14395_v18  ;;  %v14405_v18 = vand.u32 4294901760, %v11670_v44 }
 0x751   :  { %9105 = vmatpush1.bf16.msra.mxu1 %v14396_v11  ;;  %v14406_v11 = vand.u32 4294901760, %v11798_v25  ;;  %v14413_v25 = vand.u32 4294901760, %v14287_v60  ;;  %v14421_v60 = vand.u32 4294901760, %v14296_v1  ;;  %v14428_v1 = vand.u32 4294901760, %v14307_v23 }
 0x752   :  { %8893 = vmatpush1.bf16.msra.mxu0 %v14397_v0  ;;  %9107 = vmatprep.subr.bf16.mxu1 %v14398_v22  ;;  %v14407_v0 = vld [vmem:[#allocation123_spill] sm:$0xff]  ;;  %v14408_v22 = vand.u32 4294901760, %v11759_v6  ;;  %v14415_v6 = vld [vmem:[#allocation134_spill] sm:$0xff]  ;;  %v14434_v23 = vand.u32 4294901760, %v14316_v4  ;;  %v14441_v4 = vld [vmem:[#allocation48_spill] sm:$0xff] }
 0x753   :  { %8895 = vmatprep.subr.bf16.mxu0 %v14399_v19  ;;  %v8898_v42 = vpack.c.bf16 %v14406_v11, %v14405_v18  ;;  %v14409_v19 = vand.u32 4294901760, %v11870_v17  ;;  %v14414_v18 = vand.u32 4294901760, %v14200_v30  ;;  %v14416_v17 = vand.u32 4294901760, %v14290_v61 }
 0x754   :  { %v14420_v30 = vand.u32 4294901760, %v14297_v37  ;;  %v14423_v61 = vand.u32 4294901760, %v14299_v47  ;;  %v14427_v37 = vld [vmem:[#allocation52_spill] sm:$0xff]  ;;  %v14430_v47 = vand.u32 4294901760, %v14310_v34  ;;  %v14437_v34 = vand.u32 4294901760, %v14318_v39 }
 0x755   :  { %9109 = vmatpush1.bf16.msra.mxu1 %v14400_v56  ;;  %v8900_v56 = vpack.c.bf16 %v14409_v19, %v14408_v22  ;;  %v9114_v11 = vpack.c.bf16 %v14414_v18, %v14413_v25  ;;  %v14417_v19 = vand.u32 4294901760, %v14289_v2  ;;  %v14422_v22 = vand.u32 4294901760, %v14300_v8 }
 0x756   :  { %8897 = vmatpush1.bf16.msra.mxu0 %v14401_v28  ;;  %9111 = vmatprep.subr.bf16.mxu1 %v14402_v7  ;;  %v14410_v7 = vld [vmem:[#allocation116_spill] sm:$0xff]  ;;  %v14431_v25 = vand.u32 4294901760, %v14309_v27  ;;  %v14436_v27 = vand.u32 4294901760, %v14319_v51  ;;  %v14446_v39 = vand.u32 4294901760, %v14337_v52  ;;  %v14457_v52 = vld [vmem:[#allocation118_spill] sm:$0xff] }
 0x757   :  { %6631 = vmatprep.subr.mxu0 %v14403_v53  ;;  %v14411_v53 = vand.u32 4294901760, %v11844_v62  ;;  %v14418_v62 = vand.u32 4294901760, %v14294_v59  ;;  %v8906_v2 = vpack.c.bf16 %v14423_v61, %v14422_v22  ;;  %v14426_v59 = vand.u32 4294901760, %v14303_v63 }
 0x758   :  { %v9122_v18 = vpack.c.bf16 %v14431_v25, %v14430_v47  ;;  %v14433_v63 = vand.u32 4294901760, %v14312_v46  ;;  %v14450_v22 = vand.u32 4294901760, %v14345_v36  ;;  %v14451_v61 = vand.u32 4294901760, %v14344_v50 }
 0x759   :  { %9113 = vmatpush1.bf16.msra.mxu1 %v14404_v57  ;;  %v14412_v57 = vand.u32 4294901760, %v11938_v15  ;;  %v14419_v15 = vand.u32 4294901760, %v14293_v35  ;;  %v14425_v35 = vand.u32 4294901760, %v14304_v55  ;;  %v14432_v55 = vand.u32 4294901760, %v14313_v54 }
 0x75a   :  { %6633 = vmatpush1.msra.mxu0 %v14407_v0  ;;  %7639 = vmatprep.subr.mxu1 %v12634_v10  ;;  %v14438_v54 = vand.u32 4294901760, %v14322_v13  ;;  %v14447_v13 = vand.u32 4294901760, %v14336_v41  ;;  %v14458_v41 = vand.u32 4294901760, %v14457_v52  ;;  %v14461_v36 = vand.u32 4294901760, %v14353_v21  ;;  %v14472_v21 = vld [vmem:[#allocation90_spill] sm:$0xff] }
 0x75b   :  { %8899 = vmatprep.subr.bf16.mxu0 %v8898_v42  ;;  %6667 = vmatmul.mubr.f32.vlgmr.msra.gmra.mrb[8].mxu0 %v14410_v7  ;;  %v8902_v44 = vpack.c.bf16 %v14412_v57, %v14411_v53  ;;  %v9116_v42 = vpack.c.bf16 %v14417_v19, %v14416_v17  ;;  %v8904_v53 = vpack.c.bf16 %v14419_v15, %v14418_v62  ;;  %v14439_v19 = vld [vmem:[#allocation82_spill] sm:$0xff]  ;;  %v14444_v15 = vld [vmem:[#allocation77_spill] sm:$0xff] }
 0x75c   :  { %8901 = vmatpush1.bf16.msra.mxu0 %v8900_v56  ;;  %6675 = vmatprep.mubr.f32.mxu0 %v14415_v6  ;;  %v9118_v57 = vpack.c.bf16 %v14421_v60, %v14420_v30  ;;  %v14424_v56 = vld [vmem:[#allocation136_spill] sm:$0xff]  ;;  %v14440_v46 = vand.u32 4294901760, %v14439_v19  ;;  %v8918_v30 = vpack.c.bf16 %v14447_v13, %v14446_v39  ;;  %v14448_v60 = vld [vmem:[#allocation58_spill] sm:$0xff]  ;;  %v14500_v13 = vld [vmem:[#allocation103_spill] sm:$0xff] }
 0x75d   :  { %8903 = vmatprep.subr.bf16.mxu0 %v8902_v44  ;;  %7641 = vmatpush1.msra.mxu1 %v12748_v58  ;;  %v14429_v44 = vand.u32 4294901760, %v14306_v43  ;;  %v14435_v43 = vand.u32 4294901760, %v14315_v5  ;;  %v14442_v5 = vld [vmem:[#allocation70_spill] sm:$0xff]  ;;  %v14483_v39 = vld [vmem:[#allocation128_spill] sm:$0xff] }
 0x75e   :  { %9115 = vmatprep.subr.bf16.mxu1 %v9114_v11  ;;  %7675 = vmatmul.mubr.f32.vlgmr.msra.gmra.mrb[10].mxu1 %v14410_v7  ;;  %v9120_v7 = vpack.c.bf16 %v14426_v59, %v14425_v35  ;;  %v8910_v11 = vpack.c.bf16 %v14433_v63, %v14432_v55  ;;  %v14443_v62 = vand.u32 4294901760, %v14442_v5  ;;  %v14454_v59 = vld [vmem:[#allocation97_spill] sm:$0xff]  ;;  %v14476_v5 = vld [vmem:[#allocation95_spill] sm:$0xff] }
 0x75f   :  { %9117 = vmatpush1.bf16.msra.mxu1 %v9116_v42  ;;  %6679 = vmatmul.mubr.f32.gmra.mrb[10].mxu0 %v14424_v56  ;;  %v8908_v8 = vpack.c.bf16 %v14429_v44, %v14428_v1  ;;  %v9124_v17 = vpack.c.bf16 %v14435_v43, %v14434_v23  ;;  %v9126_v42 = vpack.c.bf16 %v14440_v46, %v14438_v54  ;;  %v14456_v44 = vld [vmem:[#allocation36_spill] sm:$0xff]  ;;  %v14464_v63 = vld [vmem:[#allocation113_spill] sm:$0xff]  ;;  %v14471_v54 = vand.u32 4294901760, %v14357_v14  ;;  %v14473_v46 = vld [vmem:[#allocation35_spill] sm:$0xff] }
 0x760   :  { %8905 = vmatpush1.bf16.msra.mxu0 %v8904_v53  ;;  %9119 = vmatprep.subr.bf16.mxu1 %v9118_v57  ;;  %v14445_v53 = vand.u32 4294901760, %v14444_v15  ;;  %v14449_v57 = vld [vmem:[#allocation60_spill] sm:$0xff]  ;;  %v14466_v23 = vld [vmem:[#allocation117_spill] sm:$0xff]  ;;  %v14478_v15 = vand.u32 4294901760, %v12976_v45  ;;  %v14480_v14 = vand.u32 4294901760, %v12990_v26  ;;  %v14484_v45 = vand.u32 4294901760, %v13037_v12 }
 0x761   :  { %8907 = vmatprep.subr.bf16.mxu0 %v8906_v2  ;;  %6864 = vmatprep.mubr.f32.mxu0 %v14427_v37  ;;  %v8920_v2 = vpack.c.bf16 %v14451_v61, %v14450_v22  ;;  %v14467_v43 = vand.u32 4294901760, %v14466_v23  ;;  %v14485_v26 = vld [vmem:[#allocation131_spill] sm:$0xff]  ;;  %v14487_v12 = vld [vmem:[#allocation18_spill] sm:$0xff]  ;;  %v14504_v22 = vld [vmem:[#allocation112_spill] sm:$0xff] }
 0x762   :  { %7683 = vmatprep.mubr.f32.mxu1 %v14415_v6  ;;  %v8912_v6 = vpack.c.bf16 %v14437_v34, %v14436_v27  ;;  %v9128_v51 = vpack.c.bf16 %v14445_v53, %v14443_v62  ;;  %v14468_v27 = vld [vmem:[#allocation87_spill] sm:$0xff]  ;;  %v14469_v34 = vld [vmem:[#allocation109_spill] sm:$0xff]  ;;  %v14481_v53 = vand.u32 4294901760, %v13013_v24 }
 0x763   :  { %9121 = vmatpush1.bf16.msra.mxu1 %v9120_v7  ;;  %v14455_v7 = vand.u32 4294901760, %v14454_v59  ;;  %v14477_v62 = vld [vmem:[#allocation33_spill] sm:$0xff]  ;;  %v14486_v24 = vld [vmem:[#allocation75_spill] sm:$0xff]  ;;  %v14509_v59 = vld [vmem:[#allocation120_spill] sm:$0xff] }
 0x764   :  { %8909 = vmatpush1.bf16.msra.mxu0 %v8908_v8  ;;  %9123 = vmatprep.subr.bf16.mxu1 %v9122_v18  ;;  %v14459_v8 = vld [vmem:[#allocation121_spill] sm:$0xff]  ;;  %v14462_v18 = vld [vmem:[#allocation98_spill] sm:$0xff]  ;;  %v14505_v61 = vld [vmem:[#allocation115_spill] sm:$0xff] }
 0x765   :  { %8911 = vmatprep.subr.bf16.mxu0 %v8910_v11  ;;  %7687 = vmatmul.mubr.f32.gmra.mrb[12].mxu1 %v14424_v56  ;;  %v14452_v56 = vld [vmem:[#allocation88_spill] sm:$0xff]  ;;  %v14460_v47 = vand.u32 4294901760, %v14459_v8  ;;  %v14463_v50 = vand.u32 4294901760, %v14462_v18  ;;  %v14465_v11 = vand.u32 4294901760, %v14464_v63 }
 0x766   :  { %7872 = vmatprep.mubr.f32.mxu1 %v14427_v37  ;;  %v14453_v35 = vand.u32 4294901760, %v14452_v56  ;;  %v14507_v56 = vld [vmem:[#allocation114_spill] sm:$0xff] }
 0x767   :  { %9125 = vmatpush1.bf16.msra.mxu1 %v9124_v17  ;;  %v8922_v25 = vpack.c.bf16 %v14460_v47, %v14458_v41  ;;  %v9136_v55 = vpack.c.bf16 %v14463_v50, %v14461_v36  ;;  %v8924_v17 = vpack.c.bf16 %v14467_v43, %v14465_v11 }
 0x768   :  { %8913 = vmatpush1.bf16.msra.mxu0 %v8912_v6  ;;  %9127 = vmatprep.subr.bf16.mxu1 %v9126_v42  ;;  %v9134_v1 = vpack.c.bf16 %v14455_v7, %v14453_v35  ;;  %v14470_v6 = vand.u32 4294901760, %v14356_v31  ;;  %v14474_v42 = vld [vmem:[#allocation93_spill] sm:$0xff]  ;;  %v14479_v31 = vld [vmem:[#allocation119_spill] sm:$0xff]  ;;  %v14510_v7 = vld [vmem:[#allocation132_spill] sm:$0xff] }
 0x769   :  { %8915 = vmatprep.subr.bf16.mxu0 %v14441_v4  ;;  %v14475_v4 = vld [vmem:[#allocation40_spill] sm:$0xff]  ;;  %v14508_v35 = vld [vmem:[#allocation133_spill] sm:$0xff] }
 0x76a   :  { %v9140_v19 = vpack.c.bf16 %v14471_v54, %v14470_v6 }
 0x76b   :  { %9129 = vmatpush1.bf16.msra.mxu1 %v9128_v51  ;;  %v14482_v51 = vld [vmem:[#allocation108_spill] sm:$0xff] }
 0x76c   :  { %8917 = vmatpush1.bf16.msra.mxu0 %v14448_v60  ;;  %9131 = vmatprep.subr.bf16.mxu1 %v14449_v57  ;;  %v14502_v60 = vld [vmem:[#allocation111_spill] sm:$0xff]  ;;  %v14503_v57 = vld [vmem:[#allocation104_spill] sm:$0xff] }
 0x76d   :  { %8919 = vmatprep.subr.bf16.mxu0 %v8918_v30  ;;  %v14501_v30 = vld [vmem:[#allocation105_spill] sm:$0xff] }
 0x76f   :  { %9133 = vmatpush1.bf16.msra.mxu1 %v14456_v44 }
 0x770   :  { %8921 = vmatpush1.bf16.msra.mxu0 %v8920_v2  ;;  %9135 = vmatprep.subr.bf16.mxu1 %v9134_v1  ;;  %v14506_v2 = vld [vmem:[#allocation127_spill] sm:$0xff] }
 0x771   :  { %8923 = vmatprep.subr.bf16.mxu0 %v8922_v25 }
 0x773   :  { %9137 = vmatpush1.bf16.msra.mxu1 %v9136_v55 }
 0x774   :  { %8925 = vmatpush1.bf16.msra.mxu0 %v8924_v17  ;;  %9139 = vmatprep.subr.bf16.mxu1 %v14468_v27 }
 0x775   :  { %8927 = vmatprep.subr.bf16.mxu0 %v14469_v34 }
 0x777   :  { %9141 = vmatpush1.bf16.msra.mxu1 %v9140_v19 }
 0x778   :  { %8929 = vmatpush1.bf16.msra.mxu0 %v14472_v21  ;;  %9143 = vmatprep.subr.bf16.mxu1 %v14473_v46 }
 0x779   :  { %8931 = vmatprep.subr.bf16.mxu0 %v14474_v42 }
 0x77b   :  { %9145 = vmatpush1.bf16.msra.mxu1 %v14475_v4 }
 0x77c   :  { %8933 = vmatpush1.bf16.msra.mxu0 %v14476_v5  ;;  %9147 = vmatprep.subr.bf16.mxu1 %v14477_v62 }
 0x77d   :  { %6832 = vmatprep.subr.mxu0 %v14478_v15 }
 0x77f   :  { %9149 = vmatpush1.bf16.msra.mxu1 %v14479_v31 }
 0x780   :  { %6836 = vmatpush1.msra.mxu0 %v14480_v14  ;;  %7840 = vmatprep.subr.mxu1 %v14481_v53 }
 0x781   :  { %8935 = vmatprep.subr.bf16.mxu0 %v14364_v20  ;;  %6866 = vmatmul.mubr.f32.vlgmr.msra.gmra.mrb[8].mxu0 %v14482_v51  ;;  %v14488_v20 = vld [vmem:[#allocation80_spill] sm:$0xff] }
 0x782   :  { %8937 = vmatpush1.bf16.msra.mxu0 %v14366_v48  ;;  %6872 = vmatprep.mubr.f32.mxu0 %v14483_v39  ;;  %v14489_v48 = vld [vmem:[#allocation83_spill] sm:$0xff] }
 0x783   :  { %8939 = vmatprep.subr.bf16.mxu0 %v14368_v32  ;;  %7844 = vmatpush1.msra.mxu1 %v14484_v45  ;;  %v14490_v32 = vld [vmem:[#allocation41_spill] sm:$0xff] }
 0x784   :  { %9151 = vmatprep.subr.bf16.mxu1 %v14369_v3  ;;  %7874 = vmatmul.mubr.f32.vlgmr.msra.gmra.mrb[10].mxu1 %v14482_v51  ;;  %v14491_v3 = vld [vmem:[#allocation79_spill] sm:$0xff] }
 0x785   :  { %9153 = vmatpush1.bf16.msra.mxu1 %v14370_v16  ;;  %6874 = vmatmul.mubr.f32.gmra.mrb[10].mxu0 %v14485_v26  ;;  %v14492_v16 = vld [vmem:[#allocation57_spill] sm:$0xff] }
 0x786   :  { %8941 = vmatpush1.bf16.msra.mxu0 %v14372_v33  ;;  %9155 = vmatprep.subr.bf16.mxu1 %v14373_v38  ;;  %v14493_v33 = vld [vmem:[#allocation47_spill] sm:$0xff]  ;;  %v14494_v38 = vld [vmem:[#allocation92_spill] sm:$0xff] }
 0x787   :  { %8943 = vmatprep.subr.bf16.mxu0 %v14374_v9  ;;  %6983 = vmatprep.mubr.f32.mxu0 %v14427_v37  ;;  %v14495_v9 = vld [vmem:[#allocation44_spill] sm:$0xff] }
 0x788   :  { %7880 = vmatprep.mubr.f32.mxu1 %v14483_v39 }
 0x789   :  { %9157 = vmatpush1.bf16.msra.mxu1 %v14376_v29  ;;  %v14496_v29 = vld [vmem:[#allocation94_spill] sm:$0xff] }
 0x78a   :  { %8945 = vmatpush1.bf16.msra.mxu0 %v14377_v40  ;;  %9159 = vmatprep.subr.bf16.mxu1 %v14378_v49  ;;  %v14497_v40 = vld [vmem:[#allocation99_spill] sm:$0xff]  ;;  %v14498_v49 = vld [vmem:[#allocation102_spill] sm:$0xff] }
 0x78b   :  { %8947 = vmatprep.subr.bf16.mxu0 %v14486_v24  ;;  %7882 = vmatmul.mubr.f32.gmra.mrb[12].mxu1 %v14485_v26 }
 0x78c   :  { %7991 = vmatprep.mubr.f32.mxu1 %v14427_v37  ;;  %v14499_v37 = vld [vmem:[#allocation96_spill] sm:$0xff] }
 0x78d   :  { %9161 = vmatpush1.bf16.msra.mxu1 %v14487_v12 }
 0x78e   :  { %8949 = vmatpush1.bf16.msra.mxu0 %v14488_v20  ;;  %9163 = vmatprep.subr.bf16.mxu1 %v14489_v48 }
 0x78f   :  { %8951 = vmatprep.subr.bf16.mxu0 %v14490_v32 }
 0x791   :  { %9165 = vmatpush1.bf16.msra.mxu1 %v14491_v3 }
 0x792   :  { %8953 = vmatpush1.bf16.msra.mxu0 %v14492_v16  ;;  %9167 = vmatprep.subr.bf16.mxu1 %v14493_v33 }
 0x793   :  { %8955 = vmatprep.subr.bf16.mxu0 %v14494_v38 }
 0x795   :  { %9169 = vmatpush1.bf16.msra.mxu1 %v14495_v9 }
 0x796   :  { %8957 = vmatpush1.bf16.msra.mxu0 %v14496_v29  ;;  %9171 = vmatprep.subr.bf16.mxu1 %v14497_v40 }
 0x797   :  { %8959 = vmatprep.subr.bf16.mxu0 %v14498_v49 }
 0x799   :  { %9173 = vmatpush1.bf16.msra.mxu1 %v14499_v37 }
 0x79a   :  { %8961 = vmatpush1.bf16.msra.mxu0 %v14500_v13  ;;  %9175 = vmatprep.subr.bf16.mxu1 %v14501_v30 }
 0x79b   :  { %8963 = vmatprep.subr.bf16.mxu0 %v14502_v60 }
 0x79d   :  { %9177 = vmatpush1.bf16.msra.mxu1 %v14503_v57 }
 0x79e   :  { %8965 = vmatpush1.bf16.msra.mxu0 %v14504_v22  ;;  %9179 = vmatprep.subr.bf16.mxu1 %v14505_v61 }
 0x79f   :  { %8967 = vmatprep.subr.bf16.mxu0 %v14506_v2 }
 0x7a1   :  { %9181 = vmatpush1.bf16.msra.mxu1 %v14507_v56 }
 0x7a2   :  { %8969 = vmatpush1.bf16.msra.mxu0 %v14401_v28  ;;  %9183 = vmatprep.subr.bf16.mxu1 %v14508_v35 }
 0x7a3   :  { %6953 = vmatprep.subr.mxu0 %v14509_v59 }
 0x7a5   :  { %9185 = vmatpush1.bf16.msra.mxu1 %v14510_v7 }
 0x7a6   :  { %6955 = vmatpush1.msra.mxu0 %v14407_v0  ;;  %7961 = vmatprep.subr.mxu1 %v12634_v10  ;;  %v5978_v28 = vpop.permute.xlu1 %5977 }
 0x7a7   :  { %6985 = vmatmul.mubr.f32.vlgmr.msra.gmra.mrb[8].mxu0 %v14482_v51 }
 0x7a8   :  { %6991 = vmatprep.mubr.f32.mxu0 %v14483_v39  ;;  %v5982_v10 = vpop.permute.xlu0 %5981 }
 0x7a9   :  { %7963 = vmatpush1.msra.mxu1 %v12748_v58 }
 0x7aa   :  { %7993 = vmatmul.mubr.f32.vlgmr.msra.gmra.mrb[10].mxu1 %v14482_v51 }
 0x7ab   :  { %6993 = vmatmul.mubr.f32.gmra.mrb[10].mxu0 %v14485_v26  ;;  %7999 = vmatprep.mubr.f32.mxu1 %v14483_v39 }
 0x7ae   :  { %8001 = vmatmul.mubr.f32.gmra.mrb[12].mxu1 %v14485_v26 }
 0x87a   :  { %v6986_v1 = vpop.f32.mrb[8].mxu0 }
 0x87b   :  { %v9196_v44 = vadd.f32 %v6986_v1, %v5978_v28  ;;  %v6988_v0 = vpop.f32.mrb[9].mxu0 }
 0x87c   :  { %v9197_v52 = vadd.f32 %v6988_v0, %v5978_v28 }
 0x87d   :  { %8007 = vst [vmem:[#allocation11] sm:$0xff] %v9196_v44  ;;  %v7994_v41 = vpop.f32.mrb[10].mxu1 }
 0x87e   :  { %8008 = vst [vmem:[#allocation11 + $0x8] sm:$0xff] %v9197_v52  ;;  %v6994_v8 = vpop.f32.mrb[10].mxu0  ;;  %v9200_v47 = vadd.f32 %v7994_v41, %v5978_v28  ;;  %v7996_v58 = vpop.f32.mrb[11].mxu1 }
 0x87f   :  { %v9198_v25 = vadd.f32 %v6994_v8, %v5982_v10  ;;  %v6996_v36 = vpop.f32.mrb[11].mxu0  ;;  %v9201_v18 = vadd.f32 %v7996_v58, %v5978_v28 }
 0x880   :  { %8009 = vst [vmem:[#allocation11 + $0x10] sm:$0xff] %v9200_v47  ;;  %v9199_v50 = vadd.f32 %v6996_v36, %v5982_v10 }
 0x881   :  { %8011 = vst [vmem:[#allocation11 + $0x20] sm:$0xff] %v9198_v25  ;;  %8010 = vst [vmem:[#allocation11 + $0x18] sm:$0xff] %v9201_v18  ;;  %v8002_v55 = vpop.f32.mrb[12].mxu1 }
 0x882   :  { %8012 = vst [vmem:[#allocation11 + $0x28] sm:$0xff] %v9199_v50  ;;  %v9202_v63 = vadd.f32 %v8002_v55, %v5982_v10  ;;  %v8004_v11 = vpop.f32.mrb[13].mxu1 }
 0x883   :  { %v9203_v23 = vadd.f32 %v8004_v11, %v5982_v10 }
 0x884   :  { %8013 = vst [vmem:[#allocation11 + $0x30] sm:$0xff] %v9202_v63 }
 0x885   :  { %8014 = vst [vmem:[#allocation11 + $0x38] sm:$0xff] %v9203_v23 }
 0x886   :  { %9562 = shalt.err (!%p9559_p8)
}
 0x887   :  { %s9563_s22 = scalar_lea.hbm %s13420_s8, 1024 }
 0x888   :  { %p9564_p9 = scmp.ne.s32.totalorder %s13420_s8, %s9563_s22  ;;  %p9567_p10 = scmp.lt.u32.totalorder %s9563_s22, %s13420_s8 }
 0x88a   :  { %p9569_p11 = pnand %p9567_p10, %p9564_p9 }
 0x88c   :  { %9572 = shalt.err (!%p9569_p11)
}
 0x88d   :  { %s9606_s20 = smov 512   ;;  %s9607_s27 = smov 32  }
 0x88e   :  { %8026 = dma.vmem_to_hbm [thread:$0]  %s8021_s24, 1024, %s13420_s8, [#allocation5], %s9606_s20, %s9606_s20, %s9607_s27  }
 0x88f   :  { %9579 = dma.done.wait [#allocation5], 1024  }
 0x890   :  { %9580 = vsyncadd [#allocation5], 4294966272 }
 0x891   :  { %8030 = vsyncpa [#allocation4], 1 }
 0x892   :  { %8031 = vsyncpa [#allocation7], 1 }
 0x893   :  { %8032 = vsyncpa [#allocation10], 1 }
 0x894   :  { %8033 = vsyncpa [#allocation5], 1 }

</bundles_post_ra>
